<compile_context>
chip_gen: v6e
topology: v6e:2x2x1
jax: 0.10.0
libtpu: 0.0.40
codegen_flags: <defaults>
</compile_context>

<pallas_src>
import jax
import jax.numpy as jnp
import numpy as np
from jax.experimental import pallas as pl
from jax.experimental.pallas import tpu as pltpu


def _full_reduce(v, op):
    """Reduce over all axes (keepdims), one axis at a time (robust lowering)."""
    for ax in range(v.ndim - 1, -1, -1):
        v = op(v, axis=ax, keepdims=True)
    return v


# ----------------------------- Pallas kernel ------------------------------ #
def edge_score_kernel(x_ref, q_ref, pt_ref, out_ref, pad_ref):
    n, c, h, w = x_ref.shape
    hout = pt_ref.shape[0]
    wout = q_ref.shape[1]

    x = x_ref[...].astype(jnp.float32)

    # --- replicate-pad into VMEM scratch (N, C, H+2, W+2).
    # Every element written exactly once (interior, top/bottom rows, then full
    # left/right columns incl. corners) -> no memset needed.
    pad_ref[:, :, 1:h + 1, 1:w + 1] = x
    pad_ref[:, :, 0:1, 1:w + 1] = x[:, :, 0:1, :]
    pad_ref[:, :, h + 1:h + 2, 1:w + 1] = x[:, :, h - 1:h, :]
    pad_ref[:, :, :, 0:1] = pad_ref[:, :, :, 1:2]
    pad_ref[:, :, :, w + 1:w + 2] = pad_ref[:, :, :, w:w + 1]

    def tap(dy, dx):
        return pad_ref[:, :, dy:dy + h, dx:dx + w]

    # normalized Sobel kernels ( / 8 ), correlation form; magnitude is
    # sign-invariant so conv-vs-correlation does not matter.
    t00 = tap(0, 0); t01 = tap(0, 1); t02 = tap(0, 2)
    t10 = tap(1, 0);                  t12 = tap(1, 2)
    t20 = tap(2, 0); t21 = tap(2, 1); t22 = tap(2, 2)

    gx = ((t02 - t00) + 2.0 * (t12 - t10) + (t22 - t20)) * 0.125
    gy = ((t20 - t00) + 2.0 * (t21 - t01) + (t22 - t02)) * 0.125
    mag = jnp.sqrt(gx * gx + gy * gy + 1e-6)                 # kornia eps=1e-6

    # channel average of the first three (RGB) channels -> (N, H, W)
    grad = (mag[:, 0] + mag[:, 1] + mag[:, 2]) * (1.0 / 3.0)

    # --- first global (whole-batch) normalization ---
    grad = grad + jnp.abs(_full_reduce(grad, jnp.min))
    grad = grad / _full_reduce(grad, jnp.max)

    # --- 70x70 / stride-8 / pad-23 all-ones conv  ==  PT @ grad @ Q  (MXU) ---
    t = jnp.dot(grad.reshape(n * h, w), q_ref[...],
                preferred_element_type=jnp.float32)           # (N*H, Wout)
    t = t.reshape(n, h, wout)
    pt = pt_ref[...]                                          # (Hout, H)
    for s in range(n):
        out_ref[s] = jnp.dot(pt, t[s], preferred_element_type=jnp.float32)

    # --- LeakyReLU(0.2) + second global normalization, written back ---
    y = out_ref[...]
    y = jnp.where(y > 0.0, y, 0.2 * y)
    y = y + jnp.abs(_full_reduce(y, jnp.min))
    y = y / _full_reduce(y, jnp.max)
    out_ref[...] = y.astype(out_ref.dtype)


# ------------------------------- wrapper ----------------------------------- #
def _box_selection_matrix(size, out_size, kernel, stride, pad):
    """M[r, o] = 1.0 iff input index r lies inside output window o.
    Zero padding is folded in: out-of-range taps simply contribute nothing."""
    r = np.arange(size)[:, None]
    start = np.arange(out_size)[None, :] * stride - pad
    m = ((r >= start) & (r <= start + kernel - 1)).astype(np.float32)
    return jnp.asarray(m)


def edge_score_forward(x_nchw):
    n, c, h, w = x_nchw.shape
    assert c >= 3, "EdgeScoreNet averages the first three (RGB) channels"
    kw, stride, padw = 70, 8, 23
    hout = (h + 2 * padw - kw) // stride + 1
    wout = (w + 2 * padw - kw) // stride + 1
    assert hout >= 1 and wout >= 1, "spatial size too small for 70x70/stride-8 conv"

    q = _box_selection_matrix(w, wout, kw, stride, padw)        # (W,   Wout)
    pt = _box_selection_matrix(h, hout, kw, stride, padw).T     # (Hout, H)

    vmem = pl.BlockSpec(memory_space=pltpu.MemorySpace.VMEM)

    # TODO(synk): at real SRTGAN resolutions / batch sizes, split into a grid
    # over (N, H-row tiles) with dimension_semantics=("parallel", ...) plus a
    # tiny second pass for the two *global* min/max normalizations (they couple
    # the whole batch, so a single-invocation kernel is used at this size).
    out = pl.pallas_call(
        edge_score_kernel,
        out_shape=jax.ShapeDtypeStruct((n, hout, wout), jnp.float32),
        in_specs=[vmem, vmem, vmem],
        out_specs=vmem,
        scratch_shapes=[pltpu.VMEM((n, c, h + 2, w + 2), jnp.float32)],
    )(x_nchw.astype(jnp.float32), q, pt)
    return out[:, None, :, :]            # (N, 1, Hout, Wout), matches module


# ------------------------- pure-JAX reference ------------------------------ #
def edge_score_reference(x):
    n, c, h, w = x.shape
    xp = jnp.pad(x, ((0, 0), (0, 0), (1, 1), (1, 1)), mode="edge")
    kx = jnp.array([[-1., 0., 1.], [-2., 0., 2.], [-1., 0., 1.]],
                   jnp.float32) / 8.0
    ky = kx.T

    def corr(k):
        acc = jnp.zeros((n, c, h, w), jnp.float32)
        for dy in range(3):
            for dx in range(3):
                acc = acc + k[dy, dx] * xp[:, :, dy:dy + h, dx:dx + w]
        return acc

    gx, gy = corr(kx), corr(ky)
    mag = jnp.sqrt(gx * gx + gy * gy + 1e-6)
    grad = (mag[:, 0] + mag[:, 1] + mag[:, 2]) / 3.0            # (N, H, W)
    grad = grad + jnp.abs(jnp.min(grad))
    grad = grad / jnp.max(grad)

    wgt = jnp.ones((1, 1, 70, 70), jnp.float32)
    y = jax.lax.conv_general_dilated(grad[:, None], wgt, (8, 8),
                                     ((23, 23), (23, 23)),
                                     dimension_numbers=("NCHW", "OIHW", "NCHW"))
    y = jnp.where(y > 0, y, 0.2 * y)
    y = y + jnp.abs(jnp.min(y))
    y = y / jnp.max(y)
    return y                                                   # (N, 1, Ho, Wo)


# --------------------------------- main ------------------------------------ #
if __name__ == "__main__":
    # 70x70 / stride-8 / pad-23 conv needs H, W >= 24; use 64 (output 6x6).
    N, C, H, W = 2, 3, 64, 64
    key = jax.random.PRNGKey(0)
    x = jax.random.normal(key, (N, C, H, W), jnp.float32)

    out = jax.block_until_ready(edge_score_forward(x))
    ref = jax.block_until_ready(edge_score_reference(x))

    np.testing.assert_allclose(np.asarray(out), np.asarray(ref),
                               rtol=1e-4, atol=1e-4)
    assert out.shape == (N, 1, 6, 6)
    print("KERNEL_OK")
</pallas_src>

<mosaic_0001>
module attributes {stable_mosaic.version = 11 : i64} {
  func.func @edge_score_kernel(%arg0: memref<2x3x64x64xf32, #tpu.memory_space<vmem>>, %arg1: memref<64x6xf32, #tpu.memory_space<vmem>>, %arg2: memref<6x64xf32, #tpu.memory_space<vmem>>, %arg3: memref<2x6x6xf32, #tpu.memory_space<vmem>>, %arg4: memref<2x3x66x66xf32, #tpu.memory_space<vmem>>) attributes {dimension_semantics = [], scalar_prefetch = 0 : i64, scratch_operands = 1 : i64, tpu.core_type = #tpu.core_type<tc>} {
    %c0 = arith.constant 0 : index
    %c0_0 = arith.constant 0 : index
    %c0_1 = arith.constant 0 : index
    %c0_2 = arith.constant 0 : index
    %0 = vector.load %arg0[%c0, %c0_0, %c0_1, %c0_2] : memref<2x3x64x64xf32, #tpu.memory_space<vmem>>, vector<2x3x64x64xf32>
    %c0_3 = arith.constant 0 : index
    %c0_4 = arith.constant 0 : index
    %c1 = arith.constant 1 : index
    %c1_5 = arith.constant 1 : index
    %1 = vector.load %arg4[%c0_3, %c0_4, %c1, %c1_5] : memref<2x3x66x66xf32, #tpu.memory_space<vmem>>, vector<2x3x64x64xf32>
    tpu.vector_store %arg4[%c0_3, %c0_4, %c1, %c1_5], %0 {strides = array<i32>} : memref<2x3x66x66xf32, #tpu.memory_space<vmem>>, vector<2x3x64x64xf32>,
    %2 = vector.extract_strided_slice %0 {offsets = [0, 0, 0, 0], sizes = [2, 3, 1, 64], strides = [1, 1, 1, 1]} : vector<2x3x64x64xf32> to vector<2x3x1x64xf32>
    %c0_6 = arith.constant 0 : index
    %c0_7 = arith.constant 0 : index
    %c0_8 = arith.constant 0 : index
    %c1_9 = arith.constant 1 : index
    %3 = vector.load %arg4[%c0_6, %c0_7, %c0_8, %c1_9] : memref<2x3x66x66xf32, #tpu.memory_space<vmem>>, vector<2x3x1x64xf32>
    tpu.vector_store %arg4[%c0_6, %c0_7, %c0_8, %c1_9], %2 {strides = array<i32>} : memref<2x3x66x66xf32, #tpu.memory_space<vmem>>, vector<2x3x1x64xf32>,
    %4 = vector.extract_strided_slice %0 {offsets = [0, 0, 63, 0], sizes = [2, 3, 1, 64], strides = [1, 1, 1, 1]} : vector<2x3x64x64xf32> to vector<2x3x1x64xf32>
    %c0_10 = arith.constant 0 : index
    %c0_11 = arith.constant 0 : index
    %c65 = arith.constant 65 : index
    %c1_12 = arith.constant 1 : index
    %5 = vector.load %arg4[%c0_10, %c0_11, %c65, %c1_12] : memref<2x3x66x66xf32, #tpu.memory_space<vmem>>, vector<2x3x1x64xf32>
    tpu.vector_store %arg4[%c0_10, %c0_11, %c65, %c1_12], %4 {strides = array<i32>} : memref<2x3x66x66xf32, #tpu.memory_space<vmem>>, vector<2x3x1x64xf32>,
    %c0_13 = arith.constant 0 : index
    %c0_14 = arith.constant 0 : index
    %c0_15 = arith.constant 0 : index
    %c1_16 = arith.constant 1 : index
    %6 = vector.load %arg4[%c0_13, %c0_14, %c0_15, %c1_16] : memref<2x3x66x66xf32, #tpu.memory_space<vmem>>, vector<2x3x66x1xf32>
    %c0_17 = arith.constant 0 : index
    %c0_18 = arith.constant 0 : index
    %c0_19 = arith.constant 0 : index
    %c0_20 = arith.constant 0 : index
    %7 = vector.load %arg4[%c0_17, %c0_18, %c0_19, %c0_20] : memref<2x3x66x66xf32, #tpu.memory_space<vmem>>, vector<2x3x66x1xf32>
    tpu.vector_store %arg4[%c0_17, %c0_18, %c0_19, %c0_20], %6 {strides = array<i32>} : memref<2x3x66x66xf32, #tpu.memory_space<vmem>>, vector<2x3x66x1xf32>,
    %c0_21 = arith.constant 0 : index
    %c0_22 = arith.constant 0 : index
    %c0_23 = arith.constant 0 : index
    %c64 = arith.constant 64 : index
    %8 = vector.load %arg4[%c0_21, %c0_22, %c0_23, %c64] : memref<2x3x66x66xf32, #tpu.memory_space<vmem>>, vector<2x3x66x1xf32>
    %c0_24 = arith.constant 0 : index
    %c0_25 = arith.constant 0 : index
    %c0_26 = arith.constant 0 : index
    %c65_27 = arith.constant 65 : index
    %9 = vector.load %arg4[%c0_24, %c0_25, %c0_26, %c65_27] : memref<2x3x66x66xf32, #tpu.memory_space<vmem>>, vector<2x3x66x1xf32>
    tpu.vector_store %arg4[%c0_24, %c0_25, %c0_26, %c65_27], %8 {strides = array<i32>} : memref<2x3x66x66xf32, #tpu.memory_space<vmem>>, vector<2x3x66x1xf32>,
    %c0_28 = arith.constant 0 : index
    %c0_29 = arith.constant 0 : index
    %c0_30 = arith.constant 0 : index
    %c0_31 = arith.constant 0 : index
    %10 = vector.load %arg4[%c0_28, %c0_29, %c0_30, %c0_31] : memref<2x3x66x66xf32, #tpu.memory_space<vmem>>, vector<2x3x64x64xf32>
    %c0_32 = arith.constant 0 : index
    %c0_33 = arith.constant 0 : index
    %c0_34 = arith.constant 0 : index
    %c1_35 = arith.constant 1 : index
    %11 = vector.load %arg4[%c0_32, %c0_33, %c0_34, %c1_35] : memref<2x3x66x66xf32, #tpu.memory_space<vmem>>, vector<2x3x64x64xf32>
    %c0_36 = arith.constant 0 : index
    %c0_37 = arith.constant 0 : index
    %c0_38 = arith.constant 0 : index
    %c2 = arith.constant 2 : index
    %12 = vector.load %arg4[%c0_36, %c0_37, %c0_38, %c2] : memref<2x3x66x66xf32, #tpu.memory_space<vmem>>, vector<2x3x64x64xf32>
    %c0_39 = arith.constant 0 : index
    %c0_40 = arith.constant 0 : index
    %c1_41 = arith.constant 1 : index
    %c0_42 = arith.constant 0 : index
    %13 = vector.load %arg4[%c0_39, %c0_40, %c1_41, %c0_42] : memref<2x3x66x66xf32, #tpu.memory_space<vmem>>, vector<2x3x64x64xf32>
    %c0_43 = arith.constant 0 : index
    %c0_44 = arith.constant 0 : index
    %c1_45 = arith.constant 1 : index
    %c2_46 = arith.constant 2 : index
    %14 = vector.load %arg4[%c0_43, %c0_44, %c1_45, %c2_46] : memref<2x3x66x66xf32, #tpu.memory_space<vmem>>, vector<2x3x64x64xf32>
    %c0_47 = arith.constant 0 : index
    %c0_48 = arith.constant 0 : index
    %c2_49 = arith.constant 2 : index
    %c0_50 = arith.constant 0 : index
    %15 = vector.load %arg4[%c0_47, %c0_48, %c2_49, %c0_50] : memref<2x3x66x66xf32, #tpu.memory_space<vmem>>, vector<2x3x64x64xf32>
    %c0_51 = arith.constant 0 : index
    %c0_52 = arith.constant 0 : index
    %c2_53 = arith.constant 2 : index
    %c1_54 = arith.constant 1 : index
    %16 = vector.load %arg4[%c0_51, %c0_52, %c2_53, %c1_54] : memref<2x3x66x66xf32, #tpu.memory_space<vmem>>, vector<2x3x64x64xf32>
    %c0_55 = arith.constant 0 : index
    %c0_56 = arith.constant 0 : index
    %c2_57 = arith.constant 2 : index
    %c2_58 = arith.constant 2 : index
    %17 = vector.load %arg4[%c0_55, %c0_56, %c2_57, %c2_58] : memref<2x3x66x66xf32, #tpu.memory_space<vmem>>, vector<2x3x64x64xf32>
    %18 = arith.subf %12, %10 : vector<2x3x64x64xf32>
    %19 = arith.subf %14, %13 : vector<2x3x64x64xf32>
    %cst = arith.constant 2.000000e+00 : f32
    %20 = vector.broadcast %cst : f32 to vector<2x3x64x64xf32>
    %21 = arith.mulf %20, %19 : vector<2x3x64x64xf32>
    %22 = arith.addf %18, %21 : vector<2x3x64x64xf32>
    %23 = arith.subf %17, %15 : vector<2x3x64x64xf32>
    %24 = arith.addf %22, %23 : vector<2x3x64x64xf32>
    %cst_59 = arith.constant 1.250000e-01 : f32
    %25 = vector.broadcast %cst_59 : f32 to vector<2x3x64x64xf32>
    %26 = arith.mulf %24, %25 : vector<2x3x64x64xf32>
    %27 = arith.subf %15, %10 : vector<2x3x64x64xf32>
    %28 = arith.subf %16, %11 : vector<2x3x64x64xf32>
    %cst_60 = arith.constant 2.000000e+00 : f32
    %29 = vector.broadcast %cst_60 : f32 to vector<2x3x64x64xf32>
    %30 = arith.mulf %29, %28 : vector<2x3x64x64xf32>
    %31 = arith.addf %27, %30 : vector<2x3x64x64xf32>
    %32 = arith.subf %17, %12 : vector<2x3x64x64xf32>
    %33 = arith.addf %31, %32 : vector<2x3x64x64xf32>
    %cst_61 = arith.constant 1.250000e-01 : f32
    %34 = vector.broadcast %cst_61 : f32 to vector<2x3x64x64xf32>
    %35 = arith.mulf %33, %34 : vector<2x3x64x64xf32>
    %36 = arith.mulf %26, %26 : vector<2x3x64x64xf32>
    %37 = arith.mulf %35, %35 : vector<2x3x64x64xf32>
    %38 = arith.addf %36, %37 : vector<2x3x64x64xf32>
    %cst_62 = arith.constant 9.99999997E-7 : f32
    %39 = vector.broadcast %cst_62 : f32 to vector<2x3x64x64xf32>
    %40 = arith.addf %38, %39 : vector<2x3x64x64xf32>
    %41 = math.sqrt %40 : vector<2x3x64x64xf32>
    %42 = vector.extract_strided_slice %41 {offsets = [0, 0, 0, 0], sizes = [2, 1, 64, 64], strides = [1, 1, 1, 1]} : vector<2x3x64x64xf32> to vector<2x1x64x64xf32>
    %43 = vector.shape_cast %42 : vector<2x1x64x64xf32> to vector<2x64x64xf32>
    %44 = vector.extract_strided_slice %41 {offsets = [0, 1, 0, 0], sizes = [2, 1, 64, 64], strides = [1, 1, 1, 1]} : vector<2x3x64x64xf32> to vector<2x1x64x64xf32>
    %45 = vector.shape_cast %44 : vector<2x1x64x64xf32> to vector<2x64x64xf32>
    %46 = arith.addf %43, %45 : vector<2x64x64xf32>
    %47 = vector.extract_strided_slice %41 {offsets = [0, 2, 0, 0], sizes = [2, 1, 64, 64], strides = [1, 1, 1, 1]} : vector<2x3x64x64xf32> to vector<2x1x64x64xf32>
    %48 = vector.shape_cast %47 : vector<2x1x64x64xf32> to vector<2x64x64xf32>
    %49 = arith.addf %46, %48 : vector<2x64x64xf32>
    %cst_63 = arith.constant 0.333333343 : f32
    %50 = vector.broadcast %cst_63 : f32 to vector<2x64x64xf32>
    %51 = arith.mulf %49, %50 : vector<2x64x64xf32>
    %cst_64 = arith.constant dense<0x7F800000> : vector<2x64xf32>
    %52 = vector.multi_reduction <minimumf>, %51, %cst_64 [2] : vector<2x64x64xf32> to vector<2x64xf32>
    %53 = vector.shape_cast %52 : vector<2x64xf32> to vector<2x64x1xf32>
    %cst_65 = arith.constant dense<0x7F800000> : vector<2x1xf32>
    %54 = vector.multi_reduction <minimumf>, %53, %cst_65 [1] : vector<2x64x1xf32> to vector<2x1xf32>
    %55 = vector.shape_cast %54 : vector<2x1xf32> to vector<2x1x1xf32>
    %cst_66 = arith.constant dense<0x7F800000> : vector<1x1xf32>
    %56 = vector.multi_reduction <minimumf>, %55, %cst_66 [0] : vector<2x1x1xf32> to vector<1x1xf32>
    %57 = vector.shape_cast %56 : vector<1x1xf32> to vector<1x1x1xf32>
    %58 = math.absf %57 : vector<1x1x1xf32>
    %59 = vector.broadcast %58 : vector<1x1x1xf32> to vector<2x64x64xf32>
    %60 = arith.addf %51, %59 : vector<2x64x64xf32>
    %cst_67 = arith.constant dense<0xFF800000> : vector<2x64xf32>
    %61 = vector.multi_reduction <maximumf>, %60, %cst_67 [2] : vector<2x64x64xf32> to vector<2x64xf32>
    %62 = vector.shape_cast %61 : vector<2x64xf32> to vector<2x64x1xf32>
    %cst_68 = arith.constant dense<0xFF800000> : vector<2x1xf32>
    %63 = vector.multi_reduction <maximumf>, %62, %cst_68 [1] : vector<2x64x1xf32> to vector<2x1xf32>
    %64 = vector.shape_cast %63 : vector<2x1xf32> to vector<2x1x1xf32>
    %cst_69 = arith.constant dense<0xFF800000> : vector<1x1xf32>
    %65 = vector.multi_reduction <maximumf>, %64, %cst_69 [0] : vector<2x1x1xf32> to vector<1x1xf32>
    %66 = vector.shape_cast %65 : vector<1x1xf32> to vector<1x1x1xf32>
    %67 = vector.broadcast %66 : vector<1x1x1xf32> to vector<2x64x64xf32>
    %68 = arith.divf %60, %67 : vector<2x64x64xf32>
    %69 = vector.shape_cast %68 : vector<2x64x64xf32> to vector<128x64xf32>
    %c0_70 = arith.constant 0 : index
    %c0_71 = arith.constant 0 : index
    %70 = vector.load %arg1[%c0_70, %c0_71] : memref<64x6xf32, #tpu.memory_space<vmem>>, vector<64x6xf32>
    %cst_72 = arith.constant dense<0.000000e+00> : vector<128x6xf32>
    %71 = tpu.matmul %69, %70, %cst_72 {dimension_numbers = #tpu.dot_dimension_numbers<[1], [0], [0], [1], [0, 0, 1, 1], [], []>} : vector<128x64xf32>, vector<64x6xf32>, vector<128x6xf32> -> vector<128x6xf32>
    %72 = vector.shape_cast %71 : vector<128x6xf32> to vector<2x64x6xf32>
    %c0_73 = arith.constant 0 : index
    %c0_74 = arith.constant 0 : index
    %73 = vector.load %arg2[%c0_73, %c0_74] : memref<6x64xf32, #tpu.memory_space<vmem>>, vector<6x64xf32>
    %74 = vector.extract_strided_slice %72 {offsets = [0, 0, 0], sizes = [1, 64, 6], strides = [1, 1, 1]} : vector<2x64x6xf32> to vector<1x64x6xf32>
    %75 = vector.shape_cast %74 : vector<1x64x6xf32> to vector<64x6xf32>
    %cst_75 = arith.constant dense<0.000000e+00> : vector<6x6xf32>
    %76 = tpu.matmul %73, %75, %cst_75 {dimension_numbers = #tpu.dot_dimension_numbers<[1], [0], [0], [1], [0, 0, 1, 1], [], []>} : vector<6x64xf32>, vector<64x6xf32>, vector<6x6xf32> -> vector<6x6xf32>
    %c0_76 = arith.constant 0 : index
    %c0_77 = arith.constant 0 : index
    %c0_78 = arith.constant 0 : index
    %77 = vector.load %arg3[%c0_76, %c0_77, %c0_78] : memref<2x6x6xf32, #tpu.memory_space<vmem>>, vector<1x6x6xf32>
    %78 = vector.shape_cast %77 : vector<1x6x6xf32> to vector<6x6xf32>
    %79 = vector.shape_cast %76 : vector<6x6xf32> to vector<1x6x6xf32>
    tpu.vector_store %arg3[%c0_76, %c0_77, %c0_78], %79 {strides = array<i32>} : memref<2x6x6xf32, #tpu.memory_space<vmem>>, vector<1x6x6xf32>,
    %80 = vector.extract_strided_slice %72 {offsets = [1, 0, 0], sizes = [1, 64, 6], strides = [1, 1, 1]} : vector<2x64x6xf32> to vector<1x64x6xf32>
    %81 = vector.shape_cast %80 : vector<1x64x6xf32> to vector<64x6xf32>
    %cst_79 = arith.constant dense<0.000000e+00> : vector<6x6xf32>
    %82 = tpu.matmul %73, %81, %cst_79 {dimension_numbers = #tpu.dot_dimension_numbers<[1], [0], [0], [1], [0, 0, 1, 1], [], []>} : vector<6x64xf32>, vector<64x6xf32>, vector<6x6xf32> -> vector<6x6xf32>
    %c1_80 = arith.constant 1 : index
    %c0_81 = arith.constant 0 : index
    %c0_82 = arith.constant 0 : index
    %83 = vector.load %arg3[%c1_80, %c0_81, %c0_82] : memref<2x6x6xf32, #tpu.memory_space<vmem>>, vector<1x6x6xf32>
    %84 = vector.shape_cast %83 : vector<1x6x6xf32> to vector<6x6xf32>
    %85 = vector.shape_cast %82 : vector<6x6xf32> to vector<1x6x6xf32>
    tpu.vector_store %arg3[%c1_80, %c0_81, %c0_82], %85 {strides = array<i32>} : memref<2x6x6xf32, #tpu.memory_space<vmem>>, vector<1x6x6xf32>,
    %c0_83 = arith.constant 0 : index
    %c0_84 = arith.constant 0 : index
    %c0_85 = arith.constant 0 : index
    %86 = vector.load %arg3[%c0_83, %c0_84, %c0_85] : memref<2x6x6xf32, #tpu.memory_space<vmem>>, vector<2x6x6xf32>
    %cst_86 = arith.constant 0.000000e+00 : f32
    %87 = vector.broadcast %cst_86 : f32 to vector<2x6x6xf32>
    %88 = arith.cmpf ogt, %86, %87 : vector<2x6x6xf32>
    %cst_87 = arith.constant 2.000000e-01 : f32
    %89 = vector.broadcast %cst_87 : f32 to vector<2x6x6xf32>
    %90 = arith.mulf %89, %86 : vector<2x6x6xf32>
    %91 = arith.select %88, %86, %90 : vector<2x6x6xi1>, vector<2x6x6xf32>
    %cst_88 = arith.constant dense<0x7F800000> : vector<2x6xf32>
    %92 = vector.multi_reduction <minimumf>, %91, %cst_88 [2] : vector<2x6x6xf32> to vector<2x6xf32>
    %93 = vector.shape_cast %92 : vector<2x6xf32> to vector<2x6x1xf32>
    %cst_89 = arith.constant dense<0x7F800000> : vector<2x1xf32>
    %94 = vector.multi_reduction <minimumf>, %93, %cst_89 [1] : vector<2x6x1xf32> to vector<2x1xf32>
    %95 = vector.shape_cast %94 : vector<2x1xf32> to vector<2x1x1xf32>
    %cst_90 = arith.constant dense<0x7F800000> : vector<1x1xf32>
    %96 = vector.multi_reduction <minimumf>, %95, %cst_90 [0] : vector<2x1x1xf32> to vector<1x1xf32>
    %97 = vector.shape_cast %96 : vector<1x1xf32> to vector<1x1x1xf32>
    %98 = math.absf %97 : vector<1x1x1xf32>
    %99 = vector.broadcast %98 : vector<1x1x1xf32> to vector<2x6x6xf32>
    %100 = arith.addf %91, %99 : vector<2x6x6xf32>
    %cst_91 = arith.constant dense<0xFF800000> : vector<2x6xf32>
    %101 = vector.multi_reduction <maximumf>, %100, %cst_91 [2] : vector<2x6x6xf32> to vector<2x6xf32>
    %102 = vector.shape_cast %101 : vector<2x6xf32> to vector<2x6x1xf32>
    %cst_92 = arith.constant dense<0xFF800000> : vector<2x1xf32>
    %103 = vector.multi_reduction <maximumf>, %102, %cst_92 [1] : vector<2x6x1xf32> to vector<2x1xf32>
    %104 = vector.shape_cast %103 : vector<2x1xf32> to vector<2x1x1xf32>
    %cst_93 = arith.constant dense<0xFF800000> : vector<1x1xf32>
    %105 = vector.multi_reduction <maximumf>, %104, %cst_93 [0] : vector<2x1x1xf32> to vector<1x1xf32>
    %106 = vector.shape_cast %105 : vector<1x1xf32> to vector<1x1x1xf32>
    %107 = vector.broadcast %106 : vector<1x1x1xf32> to vector<2x6x6xf32>
    %108 = arith.divf %100, %107 : vector<2x6x6xf32>
    %c0_94 = arith.constant 0 : index
    %c0_95 = arith.constant 0 : index
    %c0_96 = arith.constant 0 : index
    %109 = vector.load %arg3[%c0_94, %c0_95, %c0_96] : memref<2x6x6xf32, #tpu.memory_space<vmem>>, vector<2x6x6xf32>
    tpu.vector_store %arg3[%c0_94, %c0_95, %c0_96], %108 {strides = array<i32>} : memref<2x6x6xf32, #tpu.memory_space<vmem>>, vector<2x6x6xf32>,
    return
  }
}

</mosaic_0001>

<bundles_post_ra>
// kernel: tpu_custom_call.1
= control target key start
LH: loop header
LB: loop body
LE: loop exit
PB: predicated region body
PF: predicated region fallthrough
CT: control target
= control target key end

     0   :  { %8 = vsyncpa [#allocation4], 0  ;;  %s4504_s12 = smov [#allocation3]   ;;  %s7753_s0 = inlined_call_operand.hbm [shape: f32[2,3,64,64], index: 0, kind: input, shape index: {}]   ;;  %s7754_s1 = inlined_call_operand.vmem [shape: f32[64,6], index: 1, kind: input, shape index: {}]   ;;  %s7755_s2 = inlined_call_operand.vmem [shape: f32[6,64], index: 2, kind: input, shape index: {}]   ;;  %s7756_s3 = inlined_call_operand.vmem [shape: f32[2,6,6], index: 3, kind: output, shape index: {}]  }
   0x1   :  { %s14_s13 = sshll.u32 %s4504_s12, 4  ;;  %s15_s13 = int_to_ptr.vmem [resolvable:$true] %s14_s13 }
   0x2   :  { %s4490_s14 = scalar_lea.vmem %s15_s13, 6144  ;;  %p4495_p1 = scmp.lt.s32.totalorder %s15_s13, %s15_s13 }
   0x3   :  { %p4491_p0 = scmp.ne.s32.totalorder %s15_s13, %s4490_s14  ;;  %p4496_p2 = scmp.lt.s32.totalorder %s4490_s14, %s4490_s14 }
   0x5   :  { %p4497_p3 = por %p4496_p2, %p4495_p1 }
   0x7   :  { %p4498_p4 = pnand %p4497_p3, %p4491_p0 }
   0x9   :  { %4501 = shalt.err (!%p4498_p4)
}
   0xa   :  { %s4505_s15 = smov 128   ;;  %s4506_s16 = smov 8  }
   0xb   :  { %20 = dma.hbm_to_vmem [thread:$0]  %s7753_s0, 6144, %s15_s13, [#allocation4], %s4505_s15, %s4505_s15, %s4506_s16  }
   0xc   :  { %4502 = dma.done.wait [#allocation4], 6144  }
   0xd   :  { %4503 = vsyncadd [#allocation4], 4294961152  ;;  %v30_v0 = vld [vmem:[#allocation3 + $0x10] sm:$0xff]  ;;  %v28_v1 = vld [vmem:[#allocation3] sm:$0xff]  ;;  %s4507_s19 = smov 1   ;;  %vm268_vm0 = vcmask 531464  }
   0xe   :  { %128 = vrot.lane.b32.xlu1 %v30_v0, %s4507_s19  ;;  %124 = vrot.lane.b32.xlu0 %v28_v1, %s4507_s19  ;;  %v31_v2 = vld [vmem:[#allocation3 + $0x18] sm:$0xff]  ;;  %v29_v3 = vld [vmem:[#allocation3 + $0x8] sm:$0xff]  ;;  %v36_v4 = vld [vmem:[#allocation3 + $0x40] sm:$0xff]  ;;  %vm317_vm1 = vcmask 524296   ;;  %s4508_s0 = smov 127   ;;  %vm324_vm2 = vcmask 531471  }
   0xf   :  { %v32_v5 = vld [vmem:[#allocation3 + $0x20] sm:$0xff]  ;;  %v38_v6 = vld [vmem:[#allocation3 + $0x50] sm:$0xff]  ;;  %v37_v7 = vld [vmem:[#allocation3 + $0x48] sm:$0xff]  ;;  %vm601_vm3 = vcmask 7168   ;;  %vm610_vm4 = vcmask 1024   ;;  %vm927_vm5 = vcmask 540168  }
  0x10   :  { %v40_v8 = vld [vmem:[#allocation3 + $0x60] sm:$0xff]  ;;  %v39_v9 = vld [vmem:[#allocation3 + $0x58] sm:$0xff]  ;;  %v53_v10 = vld [vmem:[#allocation3 + $0xc8] sm:$0xff]  ;;  %s4509_s20 = smov 126   ;;  %vm936_vm6 = vcmask 534024   ;;  %s4510_s21 = smov 2  }
  0x11   :  { %v52_v11 = vld [vmem:[#allocation3 + $0xc0] sm:$0xff]  ;;  %v55_v12 = vld [vmem:[#allocation3 + $0xd8] sm:$0xff]  ;;  %v54_v13 = vld [vmem:[#allocation3 + $0xd0] sm:$0xff] }
  0x12   :  { %130 = vrot.lane.b32.xlu1 %v31_v2, %s4507_s19  ;;  %126 = vrot.lane.b32.xlu0 %v29_v3, %s4507_s19  ;;  %v60_v14 = vld [vmem:[#allocation3 + $0x100] sm:$0xff]  ;;  %v62_v16 = vld [vmem:[#allocation3 + $0x110] sm:$0xff]  ;;  %v61_v17 = vld [vmem:[#allocation3 + $0x108] sm:$0xff] }
  0x13   :  { %v56_v15 = vld [vmem:[#allocation3 + $0xe0] sm:$0xff]  ;;  %v63_v19 = vld [vmem:[#allocation3 + $0x118] sm:$0xff]  ;;  %v34_v20 = vld [vmem:[#allocation3 + $0x30] sm:$0xff] }
  0x14   :  { %v64_v18 = vld [vmem:[#allocation3 + $0x120] sm:$0xff]  ;;  %v33_v21 = vld [vmem:[#allocation3 + $0x28] sm:$0xff]  ;;  %v42_v22 = vld [vmem:[#allocation3 + $0x70] sm:$0xff] }
  0x15   :  { %v41_v23 = vld [vmem:[#allocation3 + $0x68] sm:$0xff]  ;;  %v44_v25 = vld [vmem:[#allocation3 + $0x80] sm:$0xff]  ;;  %v47_v26 = vld [vmem:[#allocation3 + $0x98] sm:$0xff] }
  0x16   :  { %140 = vrot.lane.b32.xlu1 %v36_v4, %s4507_s19  ;;  %132 = vrot.lane.b32.xlu0 %v32_v5, %s4507_s19  ;;  %v45_v24 = vld [vmem:[#allocation3 + $0x88] sm:$0xff]  ;;  %v46_v27 = vld [vmem:[#allocation3 + $0x90] sm:$0xff]  ;;  %v48_v29 = vld [vmem:[#allocation3 + $0xa0] sm:$0xff] }
  0x17   :  { %v57_v28 = vld [vmem:[#allocation3 + $0xe8] sm:$0xff]  ;;  %v58_v31 = vld [vmem:[#allocation3 + $0xf0] sm:$0xff]  ;;  %v68_v32 = vld [vmem:[#allocation3 + $0x140] sm:$0xff] }
  0x18   :  { %v65_v30 = vld [vmem:[#allocation3 + $0x128] sm:$0xff]  ;;  %v66_v33 = vld [vmem:[#allocation3 + $0x130] sm:$0xff]  ;;  %v72_v36 = vld [vmem:[#allocation3 + $0x160] sm:$0xff] }
  0x19   :  { %v70_v34 = vld [vmem:[#allocation3 + $0x150] sm:$0xff]  ;;  %v69_v35 = vld [vmem:[#allocation3 + $0x148] sm:$0xff]  ;;  %v71_v37 = vld [vmem:[#allocation3 + $0x158] sm:$0xff] }
  0x1a   :  { %144 = vrot.lane.b32.xlu1 %v38_v6, %s4507_s19  ;;  %142 = vrot.lane.b32.xlu0 %v37_v7, %s4507_s19  ;;  %v43_v38 = vld [vmem:[#allocation3 + $0x78] sm:$0xff]  ;;  %v50_v40 = vld [vmem:[#allocation3 + $0xb0] sm:$0xff]  ;;  %v49_v41 = vld [vmem:[#allocation3 + $0xa8] sm:$0xff] }
  0x1b   :  { %v35_v39 = vld [vmem:[#allocation3 + $0x38] sm:$0xff]  ;;  %v73_v44 = vld [vmem:[#allocation3 + $0x168] sm:$0xff]  ;;  %v74_v45 = vld [vmem:[#allocation3 + $0x170] sm:$0xff] }
  0x1c   :  { %v67_v42 = vld [vmem:[#allocation3 + $0x138] sm:$0xff] }
  0x1d   :  { %v59_v43 = vld [vmem:[#allocation3 + $0xf8] sm:$0xff] }
  0x1e   :  { %148 = vrot.lane.b32.xlu1 %v40_v8, %s4507_s19  ;;  %146 = vrot.lane.b32.xlu0 %v39_v9, %s4507_s19  ;;  %v51_v46 = vld [vmem:[#allocation3 + $0xb8] sm:$0xff] }
  0x1f   :  { %v75_v47 = vld [vmem:[#allocation3 + $0x178] sm:$0xff] }
  0x22   :  { %174 = vrot.lane.b32.xlu1 %v53_v10, %s4507_s19  ;;  %172 = vrot.lane.b32.xlu0 %v52_v11, %s4507_s19 }
  0x26   :  { %178 = vrot.lane.b32.xlu1 %v55_v12, %s4507_s19  ;;  %176 = vrot.lane.b32.xlu0 %v54_v13, %s4507_s19 }
  0x2a   :  { %188 = vrot.lane.b32.xlu1 %v60_v14, %s4507_s19  ;;  %180 = vrot.lane.b32.xlu0 %v56_v15, %s4507_s19 }
  0x2e   :  { %192 = vrot.lane.b32.xlu1 %v62_v16, %s4507_s19  ;;  %190 = vrot.lane.b32.xlu0 %v61_v17, %s4507_s19 }
  0x32   :  { %196 = vrot.lane.b32.xlu1 %v64_v18, %s4507_s19  ;;  %194 = vrot.lane.b32.xlu0 %v63_v19, %s4507_s19 }
  0x36   :  { %136 = vrot.lane.b32.xlu1 %v34_v20, %s4507_s19  ;;  %134 = vrot.lane.b32.xlu0 %v33_v21, %s4507_s19 }
  0x3a   :  { %152 = vrot.lane.b32.xlu1 %v42_v22, %s4507_s19  ;;  %150 = vrot.lane.b32.xlu0 %v41_v23, %s4507_s19 }
  0x3e   :  { %158 = vrot.lane.b32.xlu1 %v45_v24, %s4507_s19  ;;  %156 = vrot.lane.b32.xlu0 %v44_v25, %s4507_s19 }
  0x42   :  { %162 = vrot.lane.b32.xlu1 %v47_v26, %s4507_s19  ;;  %160 = vrot.lane.b32.xlu0 %v46_v27, %s4507_s19 }
  0x46   :  { %182 = vrot.lane.b32.xlu1 %v57_v28, %s4507_s19  ;;  %164 = vrot.lane.b32.xlu0 %v48_v29, %s4507_s19 }
  0x4a   :  { %198 = vrot.lane.b32.xlu1 %v65_v30, %s4507_s19  ;;  %184 = vrot.lane.b32.xlu0 %v58_v31, %s4507_s19 }
  0x4e   :  { %204 = vrot.lane.b32.xlu1 %v68_v32, %s4507_s19  ;;  %200 = vrot.lane.b32.xlu0 %v66_v33, %s4507_s19 }
  0x52   :  { %208 = vrot.lane.b32.xlu1 %v70_v34, %s4507_s19  ;;  %206 = vrot.lane.b32.xlu0 %v69_v35, %s4507_s19 }
  0x56   :  { %212 = vrot.lane.b32.xlu1 %v72_v36, %s4507_s19  ;;  %210 = vrot.lane.b32.xlu0 %v71_v37, %s4507_s19 }
  0x5a   :  { %154 = vrot.lane.b32.xlu1 %v43_v38, %s4507_s19  ;;  %138 = vrot.lane.b32.xlu0 %v35_v39, %s4507_s19 }
  0x5e   :  { %168 = vrot.lane.b32.xlu1 %v50_v40, %s4507_s19  ;;  %166 = vrot.lane.b32.xlu0 %v49_v41, %s4507_s19 }
  0x62   :  { %202 = vrot.lane.b32.xlu1 %v67_v42, %s4507_s19  ;;  %186 = vrot.lane.b32.xlu0 %v59_v43, %s4507_s19 }
  0x66   :  { %214 = vrot.lane.b32.xlu0 %v73_v44, %s4507_s19  ;;  %216 = vrot.lane.b32.xlu1 %v74_v45, %s4507_s19 }
  0x6a   :  { %170 = vrot.lane.b32.xlu0 %v51_v46, %s4507_s19  ;;  %218 = vrot.lane.b32.xlu1 %v75_v47, %s4507_s19 }
  0x80   :  { %v129_v48 = vpop.permute.xlu1 %128  ;;  %v125_v49 = vpop.permute.xlu0 %124 }
  0x81   :  { %271 = vst.msk [vmem:[#allocation2 + $0x11] sm:$0xff] %vm268_vm0, %v129_v48  ;;  %269 = vst.msk [vmem:[#allocation2 + $0x1] sm:$0xff] %vm268_vm0, %v125_v49 }
  0x82   :  { %318 = vst.msk [vmem:[#allocation2] sm:$0x1] %vm317_vm1, %v125_v49 }
  0x84   :  { %v131_v50 = vpop.permute.xlu1 %130  ;;  %v127_v51 = vpop.permute.xlu0 %126 }
  0x85   :  { %272 = vst.msk [vmem:[#allocation2 + $0x19] sm:$0xff] %vm268_vm0, %v131_v50  ;;  %270 = vst.msk [vmem:[#allocation2 + $0x9] sm:$0xff] %vm268_vm0, %v127_v51 }
  0x88   :  { %v141_v52 = vpop.permute.xlu1 %140  ;;  %v133_v53 = vpop.permute.xlu0 %132 }
  0x89   :  { %v331_v54 = vld [vmem:[#allocation2] sm:$0xff]  ;;  %277 = vst.msk [vmem:[#allocation2 + $0x49] sm:$0xff] %vm268_vm0, %v141_v52  ;;  %273 = vst.msk [vmem:[#allocation2 + $0x21] sm:$0xff] %vm268_vm0, %v133_v53 }
  0x8a   :  { %319 = vst.msk [vmem:[#allocation2 + $0x48] sm:$0x1] %vm317_vm1, %v141_v52  ;;  %439 = vrot.lane.b32.xlu0 %v331_v54, %s4508_s0 }
  0x8c   :  { %v145_v55 = vpop.permute.xlu1 %144  ;;  %v143_v56 = vpop.permute.xlu0 %142  ;;  %v333_v57 = vld [vmem:[#allocation2 + $0x10] sm:$0xff]  ;;  %v332_v58 = vld [vmem:[#allocation2 + $0x8] sm:$0xff]  ;;  %v334_v61 = vld [vmem:[#allocation2 + $0x18] sm:$0xff] }
  0x8d   :  { %279 = vst.msk [vmem:[#allocation2 + $0x59] sm:$0xff] %vm268_vm0, %v145_v55  ;;  %278 = vst.msk [vmem:[#allocation2 + $0x51] sm:$0xff] %vm268_vm0, %v143_v56  ;;  %441 = vrot.lane.b32.xlu1 %v332_v58, %s4508_s0 }
  0x8e   :  { %443 = vrot.lane.b32.xlu0 %v333_v57, %s4508_s0 }
  0x90   :  { %v149_v59 = vpop.permute.xlu1 %148  ;;  %v147_v60 = vpop.permute.xlu0 %146  ;;  %v335_v62 = vld [vmem:[#allocation2 + $0x20] sm:$0xff] }
  0x91   :  { %281 = vst.msk [vmem:[#allocation2 + $0x69] sm:$0xff] %vm268_vm0, %v149_v59  ;;  %280 = vst.msk [vmem:[#allocation2 + $0x61] sm:$0xff] %vm268_vm0, %v147_v60  ;;  %445 = vrot.lane.b32.xlu1 %v334_v61, %s4508_s0  ;;  %v340_v63 = vld [vmem:[#allocation2 + $0x48] sm:$0xff] }
  0x92   :  { %447 = vrot.lane.b32.xlu0 %v335_v62, %s4508_s0 }
  0x94   :  { %v175_v0 = vpop.permute.xlu1 %174  ;;  %v173_v1 = vpop.permute.xlu0 %172  ;;  %v341_v2 = vld [vmem:[#allocation2 + $0x50] sm:$0xff]  ;;  %v342_v3 = vld [vmem:[#allocation2 + $0x58] sm:$0xff] }
  0x95   :  { %294 = vst.msk [vmem:[#allocation2 + $0xe1] sm:$0xff] %vm268_vm0, %v175_v0  ;;  %293 = vst.msk [vmem:[#allocation2 + $0xd9] sm:$0xff] %vm268_vm0, %v173_v1  ;;  %457 = vrot.lane.b32.xlu1 %v340_v63, %s4508_s0 }
  0x96   :  { %321 = vst.msk [vmem:[#allocation2 + $0xd8] sm:$0x1] %vm317_vm1, %v173_v1  ;;  %459 = vrot.lane.b32.xlu0 %v341_v2, %s4508_s0 }
  0x98   :  { %v179_v4 = vpop.permute.xlu1 %178  ;;  %v177_v5 = vpop.permute.xlu0 %176  ;;  %v343_v6 = vld [vmem:[#allocation2 + $0x60] sm:$0xff]  ;;  %v344_v7 = vld [vmem:[#allocation2 + $0x68] sm:$0xff] }
  0x99   :  { %296 = vst.msk [vmem:[#allocation2 + $0xf1] sm:$0xff] %vm268_vm0, %v179_v4  ;;  %295 = vst.msk [vmem:[#allocation2 + $0xe9] sm:$0xff] %vm268_vm0, %v177_v5  ;;  %461 = vrot.lane.b32.xlu1 %v342_v3, %s4508_s0 }
  0x9a   :  { %463 = vrot.lane.b32.xlu0 %v343_v6, %s4508_s0 }
  0x9c   :  { %v189_v8 = vpop.permute.xlu1 %188  ;;  %v181_v9 = vpop.permute.xlu0 %180  ;;  %v359_v11 = vld [vmem:[#allocation2 + $0xe0] sm:$0xff] }
  0x9d   :  { %v358_v10 = vld [vmem:[#allocation2 + $0xd8] sm:$0xff]  ;;  %301 = vst.msk [vmem:[#allocation2 + $0x121] sm:$0xff] %vm268_vm0, %v189_v8  ;;  %297 = vst.msk [vmem:[#allocation2 + $0xf9] sm:$0xff] %vm268_vm0, %v181_v9  ;;  %465 = vrot.lane.b32.xlu1 %v344_v7, %s4508_s0 }
  0x9e   :  { %322 = vst.msk [vmem:[#allocation2 + $0x120] sm:$0x1] %vm317_vm1, %v189_v8  ;;  %493 = vrot.lane.b32.xlu0 %v358_v10, %s4508_s0 }
  0xa0   :  { %v193_v12 = vpop.permute.xlu1 %192  ;;  %v191_v13 = vpop.permute.xlu0 %190  ;;  %v360_v14 = vld [vmem:[#allocation2 + $0xe8] sm:$0xff]  ;;  %v361_v15 = vld [vmem:[#allocation2 + $0xf0] sm:$0xff] }
  0xa1   :  { %303 = vst.msk [vmem:[#allocation2 + $0x131] sm:$0xff] %vm268_vm0, %v193_v12  ;;  %302 = vst.msk [vmem:[#allocation2 + $0x129] sm:$0xff] %vm268_vm0, %v191_v13  ;;  %495 = vrot.lane.b32.xlu1 %v359_v11, %s4508_s0 }
  0xa2   :  { %497 = vrot.lane.b32.xlu0 %v360_v14, %s4508_s0 }
  0xa4   :  { %v197_v16 = vpop.permute.xlu1 %196  ;;  %v195_v17 = vpop.permute.xlu0 %194  ;;  %v362_v18 = vld [vmem:[#allocation2 + $0xf8] sm:$0xff] }
  0xa5   :  { %305 = vst.msk [vmem:[#allocation2 + $0x141] sm:$0xff] %vm268_vm0, %v197_v16  ;;  %304 = vst.msk [vmem:[#allocation2 + $0x139] sm:$0xff] %vm268_vm0, %v195_v17  ;;  %499 = vrot.lane.b32.xlu1 %v361_v15, %s4508_s0  ;;  %v367_v19 = vld [vmem:[#allocation2 + $0x120] sm:$0xff] }
  0xa6   :  { %501 = vrot.lane.b32.xlu0 %v362_v18, %s4508_s0 }
  0xa8   :  { %v137_v20 = vpop.permute.xlu1 %136  ;;  %v135_v21 = vpop.permute.xlu0 %134  ;;  %v368_v22 = vld [vmem:[#allocation2 + $0x128] sm:$0xff]  ;;  %v369_v23 = vld [vmem:[#allocation2 + $0x130] sm:$0xff] }
  0xa9   :  { %275 = vst.msk [vmem:[#allocation2 + $0x31] sm:$0xff] %vm268_vm0, %v137_v20  ;;  %274 = vst.msk [vmem:[#allocation2 + $0x29] sm:$0xff] %vm268_vm0, %v135_v21  ;;  %511 = vrot.lane.b32.xlu1 %v367_v19, %s4508_s0 }
  0xaa   :  { %513 = vrot.lane.b32.xlu0 %v368_v22, %s4508_s0 }
  0xac   :  { %v153_v24 = vpop.permute.xlu1 %152  ;;  %v151_v25 = vpop.permute.xlu0 %150  ;;  %v370_v26 = vld [vmem:[#allocation2 + $0x138] sm:$0xff]  ;;  %v371_v27 = vld [vmem:[#allocation2 + $0x140] sm:$0xff] }
  0xad   :  { %283 = vst.msk [vmem:[#allocation2 + $0x79] sm:$0xff] %vm268_vm0, %v153_v24  ;;  %282 = vst.msk [vmem:[#allocation2 + $0x71] sm:$0xff] %vm268_vm0, %v151_v25  ;;  %515 = vrot.lane.b32.xlu1 %v369_v23, %s4508_s0 }
  0xae   :  { %517 = vrot.lane.b32.xlu0 %v370_v26, %s4508_s0 }
  0xb0   :  { %v159_v28 = vpop.permute.xlu1 %158  ;;  %v157_v29 = vpop.permute.xlu0 %156  ;;  %v336_v30 = vld [vmem:[#allocation2 + $0x28] sm:$0xff]  ;;  %v337_v31 = vld [vmem:[#allocation2 + $0x30] sm:$0xff] }
  0xb1   :  { %286 = vst.msk [vmem:[#allocation2 + $0x99] sm:$0xff] %vm268_vm0, %v159_v28  ;;  %285 = vst.msk [vmem:[#allocation2 + $0x91] sm:$0xff] %vm268_vm0, %v157_v29  ;;  %519 = vrot.lane.b32.xlu1 %v371_v27, %s4508_s0 }
  0xb2   :  { %320 = vst.msk [vmem:[#allocation2 + $0x90] sm:$0x1] %vm317_vm1, %v157_v29  ;;  %449 = vrot.lane.b32.xlu0 %v336_v30, %s4508_s0 }
  0xb4   :  { %v163_v32 = vpop.permute.xlu1 %162  ;;  %v161_v33 = vpop.permute.xlu0 %160  ;;  %v345_v34 = vld [vmem:[#allocation2 + $0x70] sm:$0xff]  ;;  %v346_v35 = vld [vmem:[#allocation2 + $0x78] sm:$0xff] }
  0xb5   :  { %288 = vst.msk [vmem:[#allocation2 + $0xa9] sm:$0xff] %vm268_vm0, %v163_v32  ;;  %287 = vst.msk [vmem:[#allocation2 + $0xa1] sm:$0xff] %vm268_vm0, %v161_v33  ;;  %451 = vrot.lane.b32.xlu1 %v337_v31, %s4508_s0 }
  0xb6   :  { %467 = vrot.lane.b32.xlu0 %v345_v34, %s4508_s0 }
  0xb8   :  { %v183_v36 = vpop.permute.xlu1 %182  ;;  %v165_v37 = vpop.permute.xlu0 %164  ;;  %v350_v39 = vld [vmem:[#allocation2 + $0x98] sm:$0xff] }
  0xb9   :  { %v349_v38 = vld [vmem:[#allocation2 + $0x90] sm:$0xff]  ;;  %298 = vst.msk [vmem:[#allocation2 + $0x101] sm:$0xff] %vm268_vm0, %v183_v36  ;;  %289 = vst.msk [vmem:[#allocation2 + $0xb1] sm:$0xff] %vm268_vm0, %v165_v37  ;;  %469 = vrot.lane.b32.xlu1 %v346_v35, %s4508_s0 }
  0xba   :  { %475 = vrot.lane.b32.xlu0 %v349_v38, %s4508_s0 }
  0xbc   :  { %v199_v40 = vpop.permute.xlu1 %198  ;;  %v185_v41 = vpop.permute.xlu0 %184  ;;  %v351_v42 = vld [vmem:[#allocation2 + $0xa0] sm:$0xff]  ;;  %v352_v43 = vld [vmem:[#allocation2 + $0xa8] sm:$0xff] }
  0xbd   :  { %306 = vst.msk [vmem:[#allocation2 + $0x149] sm:$0xff] %vm268_vm0, %v199_v40  ;;  %299 = vst.msk [vmem:[#allocation2 + $0x109] sm:$0xff] %vm268_vm0, %v185_v41  ;;  %477 = vrot.lane.b32.xlu1 %v350_v39, %s4508_s0 }
  0xbe   :  { %479 = vrot.lane.b32.xlu0 %v351_v42, %s4508_s0 }
  0xc0   :  { %v205_v44 = vpop.permute.xlu1 %204  ;;  %v201_v45 = vpop.permute.xlu0 %200  ;;  %v353_v46 = vld [vmem:[#allocation2 + $0xb0] sm:$0xff]  ;;  %v363_v49 = vld [vmem:[#allocation2 + $0x100] sm:$0xff] }
  0xc1   :  { %309 = vst.msk [vmem:[#allocation2 + $0x169] sm:$0xff] %vm268_vm0, %v205_v44  ;;  %307 = vst.msk [vmem:[#allocation2 + $0x151] sm:$0xff] %vm268_vm0, %v201_v45  ;;  %481 = vrot.lane.b32.xlu1 %v352_v43, %s4508_s0 }
  0xc2   :  { %323 = vst.msk [vmem:[#allocation2 + $0x168] sm:$0x1] %vm317_vm1, %v205_v44  ;;  %483 = vrot.lane.b32.xlu0 %v353_v46, %s4508_s0 }
  0xc4   :  { %v209_v47 = vpop.permute.xlu1 %208  ;;  %v207_v48 = vpop.permute.xlu0 %206  ;;  %v364_v50 = vld [vmem:[#allocation2 + $0x108] sm:$0xff] }
  0xc5   :  { %311 = vst.msk [vmem:[#allocation2 + $0x179] sm:$0xff] %vm268_vm0, %v209_v47  ;;  %310 = vst.msk [vmem:[#allocation2 + $0x171] sm:$0xff] %vm268_vm0, %v207_v48  ;;  %503 = vrot.lane.b32.xlu1 %v363_v49, %s4508_s0  ;;  %v372_v53 = vld [vmem:[#allocation2 + $0x148] sm:$0xff] }
  0xc6   :  { %505 = vrot.lane.b32.xlu0 %v364_v50, %s4508_s0 }
  0xc8   :  { %v213_v51 = vpop.permute.xlu1 %212  ;;  %v211_v52 = vpop.permute.xlu0 %210  ;;  %v373_v54 = vld [vmem:[#allocation2 + $0x150] sm:$0xff] }
  0xc9   :  { %313 = vst.msk [vmem:[#allocation2 + $0x189] sm:$0xff] %vm268_vm0, %v213_v51  ;;  %312 = vst.msk [vmem:[#allocation2 + $0x181] sm:$0xff] %vm268_vm0, %v211_v52  ;;  %521 = vrot.lane.b32.xlu1 %v372_v53, %s4508_s0  ;;  %v376_v55 = vld [vmem:[#allocation2 + $0x168] sm:$0xff] }
  0xca   :  { %523 = vrot.lane.b32.xlu0 %v373_v54, %s4508_s0 }
  0xcc   :  { %v155_v56 = vpop.permute.xlu1 %154  ;;  %v139_v57 = vpop.permute.xlu0 %138  ;;  %v377_v58 = vld [vmem:[#allocation2 + $0x170] sm:$0xff]  ;;  %v378_v59 = vld [vmem:[#allocation2 + $0x178] sm:$0xff] }
  0xcd   :  { %284 = vst.msk [vmem:[#allocation2 + $0x81] sm:$0xff] %vm268_vm0, %v155_v56  ;;  %276 = vst.msk [vmem:[#allocation2 + $0x39] sm:$0xff] %vm268_vm0, %v139_v57  ;;  %529 = vrot.lane.b32.xlu1 %v376_v55, %s4508_s0 }
  0xce   :  { %326 = vst.msk [vmem:[#allocation2 + $0x82] sm:$0x80] %vm324_vm2, %v155_v56  ;;  %325 = vst.msk [vmem:[#allocation2 + $0x3a] sm:$0x80] %vm324_vm2, %v139_v57  ;;  %531 = vrot.lane.b32.xlu0 %v377_v58, %s4508_s0 }
  0xd0   :  { %v169_v60 = vpop.permute.xlu1 %168  ;;  %v167_v61 = vpop.permute.xlu0 %166  ;;  %v379_v62 = vld [vmem:[#allocation2 + $0x180] sm:$0xff]  ;;  %v380_v63 = vld [vmem:[#allocation2 + $0x188] sm:$0xff] }
  0xd1   :  { %291 = vst.msk [vmem:[#allocation2 + $0xc1] sm:$0xff] %vm268_vm0, %v169_v60  ;;  %290 = vst.msk [vmem:[#allocation2 + $0xb9] sm:$0xff] %vm268_vm0, %v167_v61  ;;  %533 = vrot.lane.b32.xlu1 %v378_v59, %s4508_s0 }
  0xd2   :  { %535 = vrot.lane.b32.xlu0 %v379_v62, %s4508_s0 }
  0xd4   :  { %v203_v0 = vpop.permute.xlu1 %202  ;;  %v187_v1 = vpop.permute.xlu0 %186  ;;  %v338_v2 = vld [vmem:[#allocation2 + $0x38] sm:$0xff]  ;;  %v347_v5 = vld [vmem:[#allocation2 + $0x80] sm:$0xff] }
  0xd5   :  { %308 = vst.msk [vmem:[#allocation2 + $0x159] sm:$0xff] %vm268_vm0, %v203_v0  ;;  %300 = vst.msk [vmem:[#allocation2 + $0x111] sm:$0xff] %vm268_vm0, %v187_v1  ;;  %537 = vrot.lane.b32.xlu1 %v380_v63, %s4508_s0  ;;  %v339_v3 = vld [vmem:[#allocation2 + $0x40] sm:$0x3]  ;;  %v348_v7 = vld [vmem:[#allocation2 + $0x88] sm:$0x3] }
  0xd6   :  { %329 = vst.msk [vmem:[#allocation2 + $0x15a] sm:$0x80] %vm324_vm2, %v203_v0  ;;  %328 = vst.msk [vmem:[#allocation2 + $0x112] sm:$0x80] %vm324_vm2, %v187_v1  ;;  %453 = vrot.lane.b32.xlu0 %v338_v2, %s4508_s0 }
  0xd8   :  { %v215_v4 = vpop.permute.xlu0 %214  ;;  %v217_v6 = vpop.permute.xlu1 %216  ;;  %v354_v8 = vld [vmem:[#allocation2 + $0xb8] sm:$0xff]  ;;  %v355_v11 = vld [vmem:[#allocation2 + $0xc0] sm:$0xff] }
  0xd9   :  { %314 = vst.msk [vmem:[#allocation2 + $0x191] sm:$0xff] %vm268_vm0, %v215_v4  ;;  %455 = vrot.lane.b32.xlu1 %v339_v3, %s4508_s0  ;;  %315 = vst.msk [vmem:[#allocation2 + $0x199] sm:$0xff] %vm268_vm0, %v217_v6 }
  0xda   :  { %471 = vrot.lane.b32.xlu0 %v347_v5, %s4508_s0 }
  0xdc   :  { %v171_v9 = vpop.permute.xlu0 %170  ;;  %v219_v10 = vpop.permute.xlu1 %218  ;;  %v365_v12 = vld [vmem:[#allocation2 + $0x110] sm:$0xff]  ;;  %v374_v14 = vld [vmem:[#allocation2 + $0x158] sm:$0xff] }
  0xdd   :  { %473 = vrot.lane.b32.xlu1 %v348_v7, %s4508_s0  ;;  %292 = vst.msk [vmem:[#allocation2 + $0xc9] sm:$0xff] %vm268_vm0, %v171_v9  ;;  %316 = vst.msk [vmem:[#allocation2 + $0x1a1] sm:$0xff] %vm268_vm0, %v219_v10  ;;  %v366_v13 = vld [vmem:[#allocation2 + $0x118] sm:$0x3]  ;;  %v375_v15 = vld [vmem:[#allocation2 + $0x160] sm:$0x3] }
  0xde   :  { %485 = vrot.lane.b32.xlu0 %v354_v8, %s4508_s0  ;;  %327 = vst.msk [vmem:[#allocation2 + $0xca] sm:$0x80] %vm324_vm2, %v171_v9  ;;  %330 = vst.msk [vmem:[#allocation2 + $0x1a2] sm:$0x80] %vm324_vm2, %v219_v10 }
  0xe0   :  { %v381_v16 = vld [vmem:[#allocation2 + $0x190] sm:$0xff]  ;;  %v382_v17 = vld [vmem:[#allocation2 + $0x198] sm:$0xff] }
  0xe1   :  { %487 = vrot.lane.b32.xlu1 %v355_v11, %s4508_s0 }
  0xe2   :  { %507 = vrot.lane.b32.xlu0 %v365_v12, %s4508_s0 }
  0xe4   :  { %v356_v18 = vld [vmem:[#allocation2 + $0xc8] sm:$0xff]  ;;  %v383_v20 = vld [vmem:[#allocation2 + $0x1a0] sm:$0xff] }
  0xe5   :  { %509 = vrot.lane.b32.xlu1 %v366_v13, %s4508_s0  ;;  %v357_v19 = vld [vmem:[#allocation2 + $0xd0] sm:$0x3]  ;;  %v384_v21 = vld [vmem:[#allocation2 + $0x1a8] sm:$0x3] }
  0xe6   :  { %525 = vrot.lane.b32.xlu0 %v374_v14, %s4508_s0 }
  0xe9   :  { %527 = vrot.lane.b32.xlu1 %v375_v15, %s4508_s0 }
  0xea   :  { %539 = vrot.lane.b32.xlu0 %v381_v16, %s4508_s0 }
  0xed   :  { %541 = vrot.lane.b32.xlu1 %v382_v17, %s4508_s0 }
  0xee   :  { %489 = vrot.lane.b32.xlu0 %v356_v18, %s4508_s0 }
  0xf1   :  { %491 = vrot.lane.b32.xlu1 %v357_v19, %s4508_s0 }
  0xf2   :  { %543 = vrot.lane.b32.xlu0 %v383_v20, %s4508_s0 }
  0xf5   :  { %545 = vrot.lane.b32.xlu1 %v384_v21, %s4508_s0 }
  0xfc   :  { %v440_v22 = vpop.permute.xlu0 %439 }
  0xfd   :  { %602 = vst.msk [vmem:[#allocation2] sm:$0xff] %vm601_vm3, %v440_v22 }
  0xff   :  { %v442_v23 = vpop.permute.xlu1 %441 }
 0x100   :  { %v444_v24 = vpop.permute.xlu0 %443  ;;  %603 = vst.msk [vmem:[#allocation2 + $0x8] sm:$0xff] %vm601_vm3, %v442_v23 }
 0x101   :  { %604 = vst.msk [vmem:[#allocation2 + $0x10] sm:$0xff] %vm601_vm3, %v444_v24 }
 0x103   :  { %v446_v25 = vpop.permute.xlu1 %445 }
 0x104   :  { %v448_v26 = vpop.permute.xlu0 %447  ;;  %v657_v27 = vld [vmem:[#allocation2] sm:$0xff]  ;;  %605 = vst.msk [vmem:[#allocation2 + $0x18] sm:$0xff] %vm601_vm3, %v446_v25 }
 0x105   :  { %606 = vst.msk [vmem:[#allocation2 + $0x20] sm:$0xff] %vm601_vm3, %v448_v26  ;;  %765 = vrot.lane.b32.xlu0 %v657_v27, %s4507_s19 }
 0x107   :  { %v458_v28 = vpop.permute.xlu1 %457  ;;  %v658_v30 = vld [vmem:[#allocation2 + $0x8] sm:$0xff] }
 0x108   :  { %v460_v29 = vpop.permute.xlu0 %459  ;;  %v659_v31 = vld [vmem:[#allocation2 + $0x10] sm:$0xff]  ;;  %612 = vst.msk [vmem:[#allocation2 + $0x48] sm:$0xff] %vm601_vm3, %v458_v28  ;;  %767 = vrot.lane.b32.xlu1 %v658_v30, %s4507_s19 }
 0x109   :  { %613 = vst.msk [vmem:[#allocation2 + $0x50] sm:$0xff] %vm601_vm3, %v460_v29  ;;  %769 = vrot.lane.b32.xlu0 %v659_v31, %s4507_s19 }
 0x10b   :  { %v462_v32 = vpop.permute.xlu1 %461  ;;  %v660_v34 = vld [vmem:[#allocation2 + $0x18] sm:$0xff] }
 0x10c   :  { %v464_v33 = vpop.permute.xlu0 %463  ;;  %v661_v35 = vld [vmem:[#allocation2 + $0x20] sm:$0xff]  ;;  %614 = vst.msk [vmem:[#allocation2 + $0x58] sm:$0xff] %vm601_vm3, %v462_v32  ;;  %771 = vrot.lane.b32.xlu1 %v660_v34, %s4507_s19 }
 0x10d   :  { %615 = vst.msk [vmem:[#allocation2 + $0x60] sm:$0xff] %vm601_vm3, %v464_v33  ;;  %773 = vrot.lane.b32.xlu0 %v661_v35, %s4507_s19 }
 0x10f   :  { %v466_v36 = vpop.permute.xlu1 %465  ;;  %v666_v38 = vld [vmem:[#allocation2 + $0x48] sm:$0xff] }
 0x110   :  { %v494_v37 = vpop.permute.xlu0 %493  ;;  %v667_v39 = vld [vmem:[#allocation2 + $0x50] sm:$0xff]  ;;  %616 = vst.msk [vmem:[#allocation2 + $0x68] sm:$0xff] %vm601_vm3, %v466_v36  ;;  %783 = vrot.lane.b32.xlu1 %v666_v38, %s4507_s19 }
 0x111   :  { %630 = vst.msk [vmem:[#allocation2 + $0xd8] sm:$0xff] %vm601_vm3, %v494_v37  ;;  %785 = vrot.lane.b32.xlu0 %v667_v39, %s4507_s19 }
 0x113   :  { %v496_v40 = vpop.permute.xlu1 %495  ;;  %v668_v42 = vld [vmem:[#allocation2 + $0x58] sm:$0xff] }
 0x114   :  { %v498_v41 = vpop.permute.xlu0 %497  ;;  %v669_v43 = vld [vmem:[#allocation2 + $0x60] sm:$0xff]  ;;  %631 = vst.msk [vmem:[#allocation2 + $0xe0] sm:$0xff] %vm601_vm3, %v496_v40  ;;  %787 = vrot.lane.b32.xlu1 %v668_v42, %s4507_s19 }
 0x115   :  { %632 = vst.msk [vmem:[#allocation2 + $0xe8] sm:$0xff] %vm601_vm3, %v498_v41  ;;  %789 = vrot.lane.b32.xlu0 %v669_v43, %s4507_s19 }
 0x117   :  { %v500_v44 = vpop.permute.xlu1 %499  ;;  %v670_v46 = vld [vmem:[#allocation2 + $0x68] sm:$0xff] }
 0x118   :  { %v502_v45 = vpop.permute.xlu0 %501  ;;  %v684_v47 = vld [vmem:[#allocation2 + $0xd8] sm:$0xff]  ;;  %633 = vst.msk [vmem:[#allocation2 + $0xf0] sm:$0xff] %vm601_vm3, %v500_v44  ;;  %791 = vrot.lane.b32.xlu1 %v670_v46, %s4507_s19 }
 0x119   :  { %634 = vst.msk [vmem:[#allocation2 + $0xf8] sm:$0xff] %vm601_vm3, %v502_v45  ;;  %819 = vrot.lane.b32.xlu0 %v684_v47, %s4507_s19 }
 0x11b   :  { %v512_v48 = vpop.permute.xlu1 %511  ;;  %v685_v50 = vld [vmem:[#allocation2 + $0xe0] sm:$0xff] }
 0x11c   :  { %v514_v49 = vpop.permute.xlu0 %513  ;;  %v686_v51 = vld [vmem:[#allocation2 + $0xe8] sm:$0xff]  ;;  %639 = vst.msk [vmem:[#allocation2 + $0x120] sm:$0xff] %vm601_vm3, %v512_v48  ;;  %821 = vrot.lane.b32.xlu1 %v685_v50, %s4507_s19 }
 0x11d   :  { %640 = vst.msk [vmem:[#allocation2 + $0x128] sm:$0xff] %vm601_vm3, %v514_v49  ;;  %823 = vrot.lane.b32.xlu0 %v686_v51, %s4507_s19 }
 0x11f   :  { %v516_v52 = vpop.permute.xlu1 %515  ;;  %v687_v54 = vld [vmem:[#allocation2 + $0xf0] sm:$0xff] }
 0x120   :  { %v518_v53 = vpop.permute.xlu0 %517  ;;  %v688_v55 = vld [vmem:[#allocation2 + $0xf8] sm:$0xff]  ;;  %641 = vst.msk [vmem:[#allocation2 + $0x130] sm:$0xff] %vm601_vm3, %v516_v52  ;;  %825 = vrot.lane.b32.xlu1 %v687_v54, %s4507_s19 }
 0x121   :  { %642 = vst.msk [vmem:[#allocation2 + $0x138] sm:$0xff] %vm601_vm3, %v518_v53  ;;  %827 = vrot.lane.b32.xlu0 %v688_v55, %s4507_s19 }
 0x123   :  { %v520_v56 = vpop.permute.xlu1 %519  ;;  %v693_v58 = vld [vmem:[#allocation2 + $0x120] sm:$0xff] }
 0x124   :  { %v450_v57 = vpop.permute.xlu0 %449  ;;  %v694_v59 = vld [vmem:[#allocation2 + $0x128] sm:$0xff]  ;;  %643 = vst.msk [vmem:[#allocation2 + $0x140] sm:$0xff] %vm601_vm3, %v520_v56  ;;  %837 = vrot.lane.b32.xlu1 %v693_v58, %s4507_s19 }
 0x125   :  { %607 = vst.msk [vmem:[#allocation2 + $0x28] sm:$0xff] %vm601_vm3, %v450_v57  ;;  %839 = vrot.lane.b32.xlu0 %v694_v59, %s4507_s19 }
 0x127   :  { %v452_v60 = vpop.permute.xlu1 %451  ;;  %v695_v62 = vld [vmem:[#allocation2 + $0x130] sm:$0xff] }
 0x128   :  { %v468_v61 = vpop.permute.xlu0 %467  ;;  %v696_v63 = vld [vmem:[#allocation2 + $0x138] sm:$0xff]  ;;  %608 = vst.msk [vmem:[#allocation2 + $0x30] sm:$0xff] %vm601_vm3, %v452_v60  ;;  %841 = vrot.lane.b32.xlu1 %v695_v62, %s4507_s19 }
 0x129   :  { %617 = vst.msk [vmem:[#allocation2 + $0x70] sm:$0xff] %vm601_vm3, %v468_v61  ;;  %843 = vrot.lane.b32.xlu0 %v696_v63, %s4507_s19 }
 0x12b   :  { %v470_v0 = vpop.permute.xlu1 %469  ;;  %v697_v2 = vld [vmem:[#allocation2 + $0x140] sm:$0xff] }
 0x12c   :  { %v476_v1 = vpop.permute.xlu0 %475  ;;  %v662_v3 = vld [vmem:[#allocation2 + $0x28] sm:$0xff]  ;;  %618 = vst.msk [vmem:[#allocation2 + $0x78] sm:$0xff] %vm601_vm3, %v470_v0  ;;  %845 = vrot.lane.b32.xlu1 %v697_v2, %s4507_s19 }
 0x12d   :  { %621 = vst.msk [vmem:[#allocation2 + $0x90] sm:$0xff] %vm601_vm3, %v476_v1  ;;  %775 = vrot.lane.b32.xlu0 %v662_v3, %s4507_s19 }
 0x12f   :  { %v478_v4 = vpop.permute.xlu1 %477  ;;  %v663_v6 = vld [vmem:[#allocation2 + $0x30] sm:$0xff] }
 0x130   :  { %v480_v5 = vpop.permute.xlu0 %479  ;;  %v671_v7 = vld [vmem:[#allocation2 + $0x70] sm:$0xff]  ;;  %622 = vst.msk [vmem:[#allocation2 + $0x98] sm:$0xff] %vm601_vm3, %v478_v4  ;;  %777 = vrot.lane.b32.xlu1 %v663_v6, %s4507_s19 }
 0x131   :  { %623 = vst.msk [vmem:[#allocation2 + $0xa0] sm:$0xff] %vm601_vm3, %v480_v5  ;;  %793 = vrot.lane.b32.xlu0 %v671_v7, %s4507_s19 }
 0x133   :  { %v482_v8 = vpop.permute.xlu1 %481  ;;  %v672_v10 = vld [vmem:[#allocation2 + $0x78] sm:$0xff] }
 0x134   :  { %v484_v9 = vpop.permute.xlu0 %483  ;;  %v675_v11 = vld [vmem:[#allocation2 + $0x90] sm:$0xff]  ;;  %624 = vst.msk [vmem:[#allocation2 + $0xa8] sm:$0xff] %vm601_vm3, %v482_v8  ;;  %795 = vrot.lane.b32.xlu1 %v672_v10, %s4507_s19 }
 0x135   :  { %625 = vst.msk [vmem:[#allocation2 + $0xb0] sm:$0xff] %vm601_vm3, %v484_v9  ;;  %801 = vrot.lane.b32.xlu0 %v675_v11, %s4507_s19 }
 0x137   :  { %v504_v12 = vpop.permute.xlu1 %503  ;;  %v676_v14 = vld [vmem:[#allocation2 + $0x98] sm:$0xff] }
 0x138   :  { %v506_v13 = vpop.permute.xlu0 %505  ;;  %v677_v15 = vld [vmem:[#allocation2 + $0xa0] sm:$0xff]  ;;  %635 = vst.msk [vmem:[#allocation2 + $0x100] sm:$0xff] %vm601_vm3, %v504_v12  ;;  %803 = vrot.lane.b32.xlu1 %v676_v14, %s4507_s19 }
 0x139   :  { %636 = vst.msk [vmem:[#allocation2 + $0x108] sm:$0xff] %vm601_vm3, %v506_v13  ;;  %805 = vrot.lane.b32.xlu0 %v677_v15, %s4507_s19 }
 0x13b   :  { %v522_v16 = vpop.permute.xlu1 %521  ;;  %v678_v18 = vld [vmem:[#allocation2 + $0xa8] sm:$0xff] }
 0x13c   :  { %v524_v17 = vpop.permute.xlu0 %523  ;;  %v679_v19 = vld [vmem:[#allocation2 + $0xb0] sm:$0xff]  ;;  %644 = vst.msk [vmem:[#allocation2 + $0x148] sm:$0xff] %vm601_vm3, %v522_v16  ;;  %807 = vrot.lane.b32.xlu1 %v678_v18, %s4507_s19 }
 0x13d   :  { %645 = vst.msk [vmem:[#allocation2 + $0x150] sm:$0xff] %vm601_vm3, %v524_v17  ;;  %809 = vrot.lane.b32.xlu0 %v679_v19, %s4507_s19 }
 0x13f   :  { %v530_v20 = vpop.permute.xlu1 %529  ;;  %v689_v22 = vld [vmem:[#allocation2 + $0x100] sm:$0xff] }
 0x140   :  { %v532_v21 = vpop.permute.xlu0 %531  ;;  %v690_v23 = vld [vmem:[#allocation2 + $0x108] sm:$0xff]  ;;  %648 = vst.msk [vmem:[#allocation2 + $0x168] sm:$0xff] %vm601_vm3, %v530_v20  ;;  %829 = vrot.lane.b32.xlu1 %v689_v22, %s4507_s19 }
 0x141   :  { %649 = vst.msk [vmem:[#allocation2 + $0x170] sm:$0xff] %vm601_vm3, %v532_v21  ;;  %831 = vrot.lane.b32.xlu0 %v690_v23, %s4507_s19 }
 0x143   :  { %v534_v24 = vpop.permute.xlu1 %533  ;;  %v698_v26 = vld [vmem:[#allocation2 + $0x148] sm:$0xff] }
 0x144   :  { %v536_v25 = vpop.permute.xlu0 %535  ;;  %v699_v27 = vld [vmem:[#allocation2 + $0x150] sm:$0xff]  ;;  %650 = vst.msk [vmem:[#allocation2 + $0x178] sm:$0xff] %vm601_vm3, %v534_v24  ;;  %847 = vrot.lane.b32.xlu1 %v698_v26, %s4507_s19 }
 0x145   :  { %651 = vst.msk [vmem:[#allocation2 + $0x180] sm:$0xff] %vm601_vm3, %v536_v25  ;;  %849 = vrot.lane.b32.xlu0 %v699_v27, %s4507_s19 }
 0x147   :  { %v538_v28 = vpop.permute.xlu1 %537  ;;  %v702_v30 = vld [vmem:[#allocation2 + $0x168] sm:$0xff] }
 0x148   :  { %v454_v29 = vpop.permute.xlu0 %453  ;;  %v703_v31 = vld [vmem:[#allocation2 + $0x170] sm:$0xff]  ;;  %652 = vst.msk [vmem:[#allocation2 + $0x188] sm:$0xff] %vm601_vm3, %v538_v28  ;;  %855 = vrot.lane.b32.xlu1 %v702_v30, %s4507_s19 }
 0x149   :  { %609 = vst.msk [vmem:[#allocation2 + $0x38] sm:$0xff] %vm601_vm3, %v454_v29  ;;  %857 = vrot.lane.b32.xlu0 %v703_v31, %s4507_s19 }
 0x14b   :  { %v456_v32 = vpop.permute.xlu1 %455  ;;  %v704_v34 = vld [vmem:[#allocation2 + $0x178] sm:$0xff] }
 0x14c   :  { %v472_v33 = vpop.permute.xlu0 %471  ;;  %v705_v35 = vld [vmem:[#allocation2 + $0x180] sm:$0xff]  ;;  %611 = vst.msk [vmem:[#allocation2 + $0x40] sm:$0x3] %vm610_vm4, %v456_v32  ;;  %859 = vrot.lane.b32.xlu1 %v704_v34, %s4507_s19 }
 0x14d   :  { %619 = vst.msk [vmem:[#allocation2 + $0x80] sm:$0xff] %vm601_vm3, %v472_v33  ;;  %861 = vrot.lane.b32.xlu0 %v705_v35, %s4507_s19 }
 0x14f   :  { %v474_v36 = vpop.permute.xlu1 %473  ;;  %v706_v38 = vld [vmem:[#allocation2 + $0x188] sm:$0xff] }
 0x150   :  { %v486_v37 = vpop.permute.xlu0 %485  ;;  %v664_v39 = vld [vmem:[#allocation2 + $0x38] sm:$0xff]  ;;  %620 = vst.msk [vmem:[#allocation2 + $0x88] sm:$0x3] %vm610_vm4, %v474_v36  ;;  %863 = vrot.lane.b32.xlu1 %v706_v38, %s4507_s19 }
 0x151   :  { %626 = vst.msk [vmem:[#allocation2 + $0xb8] sm:$0xff] %vm601_vm3, %v486_v37  ;;  %779 = vrot.lane.b32.xlu0 %v664_v39, %s4507_s19 }
 0x153   :  { %v488_v40 = vpop.permute.xlu1 %487  ;;  %v665_v42 = vld [vmem:[#allocation2 + $0x40] sm:$0x3] }
 0x154   :  { %v508_v41 = vpop.permute.xlu0 %507  ;;  %v673_v43 = vld [vmem:[#allocation2 + $0x80] sm:$0xff]  ;;  %627 = vst.msk [vmem:[#allocation2 + $0xc0] sm:$0xff] %vm601_vm3, %v488_v40  ;;  %781 = vrot.lane.b32.xlu1 %v665_v42, %s4507_s19 }
 0x155   :  { %637 = vst.msk [vmem:[#allocation2 + $0x110] sm:$0xff] %vm601_vm3, %v508_v41  ;;  %797 = vrot.lane.b32.xlu0 %v673_v43, %s4507_s19 }
 0x157   :  { %v510_v44 = vpop.permute.xlu1 %509  ;;  %v674_v46 = vld [vmem:[#allocation2 + $0x88] sm:$0x3] }
 0x158   :  { %v526_v45 = vpop.permute.xlu0 %525  ;;  %v680_v47 = vld [vmem:[#allocation2 + $0xb8] sm:$0xff]  ;;  %638 = vst.msk [vmem:[#allocation2 + $0x118] sm:$0x3] %vm610_vm4, %v510_v44  ;;  %799 = vrot.lane.b32.xlu1 %v674_v46, %s4507_s19 }
 0x159   :  { %646 = vst.msk [vmem:[#allocation2 + $0x158] sm:$0xff] %vm601_vm3, %v526_v45  ;;  %811 = vrot.lane.b32.xlu0 %v680_v47, %s4507_s19 }
 0x15b   :  { %v528_v48 = vpop.permute.xlu1 %527  ;;  %v681_v50 = vld [vmem:[#allocation2 + $0xc0] sm:$0xff] }
 0x15c   :  { %v540_v49 = vpop.permute.xlu0 %539  ;;  %v691_v51 = vld [vmem:[#allocation2 + $0x110] sm:$0xff]  ;;  %647 = vst.msk [vmem:[#allocation2 + $0x160] sm:$0x3] %vm610_vm4, %v528_v48  ;;  %813 = vrot.lane.b32.xlu1 %v681_v50, %s4507_s19 }
 0x15d   :  { %653 = vst.msk [vmem:[#allocation2 + $0x190] sm:$0xff] %vm601_vm3, %v540_v49  ;;  %833 = vrot.lane.b32.xlu0 %v691_v51, %s4507_s19 }
 0x15f   :  { %v542_v52 = vpop.permute.xlu1 %541  ;;  %v692_v53 = vld [vmem:[#allocation2 + $0x118] sm:$0x3] }
 0x160   :  { %v700_v54 = vld [vmem:[#allocation2 + $0x158] sm:$0xff]  ;;  %v490_v55 = vpop.permute.xlu0 %489  ;;  %654 = vst.msk [vmem:[#allocation2 + $0x198] sm:$0xff] %vm601_vm3, %v542_v52  ;;  %835 = vrot.lane.b32.xlu1 %v692_v53, %s4507_s19 }
 0x161   :  { %851 = vrot.lane.b32.xlu0 %v700_v54, %s4507_s19  ;;  %628 = vst.msk [vmem:[#allocation2 + $0xc8] sm:$0xff] %vm601_vm3, %v490_v55 }
 0x163   :  { %v492_v56 = vpop.permute.xlu1 %491  ;;  %v701_v57 = vld [vmem:[#allocation2 + $0x160] sm:$0x3] }
 0x164   :  { %v707_v58 = vld [vmem:[#allocation2 + $0x190] sm:$0xff]  ;;  %v544_v59 = vpop.permute.xlu0 %543  ;;  %629 = vst.msk [vmem:[#allocation2 + $0xd0] sm:$0x3] %vm610_vm4, %v492_v56  ;;  %853 = vrot.lane.b32.xlu1 %v701_v57, %s4507_s19 }
 0x165   :  { %865 = vrot.lane.b32.xlu0 %v707_v58, %s4507_s19  ;;  %655 = vst.msk [vmem:[#allocation2 + $0x1a0] sm:$0xff] %vm601_vm3, %v544_v59 }
 0x167   :  { %v708_v60 = vld [vmem:[#allocation2 + $0x198] sm:$0xff]  ;;  %v546_v62 = vpop.permute.xlu1 %545 }
 0x168   :  { %v682_v61 = vld [vmem:[#allocation2 + $0xc8] sm:$0xff]  ;;  %867 = vrot.lane.b32.xlu1 %v708_v60, %s4507_s19  ;;  %656 = vst.msk [vmem:[#allocation2 + $0x1a8] sm:$0x3] %vm610_vm4, %v546_v62 }
 0x169   :  { %815 = vrot.lane.b32.xlu0 %v682_v61, %s4507_s19 }
 0x16b   :  { %v683_v63 = vld [vmem:[#allocation2 + $0xd0] sm:$0x3] }
 0x16c   :  { %v709_v0 = vld [vmem:[#allocation2 + $0x1a0] sm:$0xff]  ;;  %817 = vrot.lane.b32.xlu1 %v683_v63, %s4507_s19 }
 0x16d   :  { %869 = vrot.lane.b32.xlu0 %v709_v0, %s4507_s19 }
 0x16f   :  { %v710_v1 = vld [vmem:[#allocation2 + $0x1a8] sm:$0x3] }
 0x170   :  { %871 = vrot.lane.b32.xlu1 %v710_v1, %s4507_s19 }
 0x177   :  { %v766_v2 = vpop.permute.xlu0 %765 }
 0x178   :  { %928 = vst.msk [vmem:[#allocation2] sm:$0xff] %vm927_vm5, %v766_v2 }
 0x17a   :  { %v768_v3 = vpop.permute.xlu1 %767 }
 0x17b   :  { %v770_v4 = vpop.permute.xlu0 %769  ;;  %929 = vst.msk [vmem:[#allocation2 + $0x8] sm:$0xff] %vm927_vm5, %v768_v3 }
 0x17c   :  { %930 = vst.msk [vmem:[#allocation2 + $0x10] sm:$0xff] %vm927_vm5, %v770_v4 }
 0x17e   :  { %v772_v5 = vpop.permute.xlu1 %771 }
 0x17f   :  { %v774_v6 = vpop.permute.xlu0 %773  ;;  %931 = vst.msk [vmem:[#allocation2 + $0x18] sm:$0xff] %vm927_vm5, %v772_v5  ;;  %v4811_v7 = vld [vmem:[#allocation2] sm:$0xff] }
 0x180   :  { %932 = vst.msk [vmem:[#allocation2 + $0x20] sm:$0xff] %vm927_vm5, %v774_v6 }
 0x182   :  { %v784_v8 = vpop.permute.xlu1 %783  ;;  %v1079_v10 = vld [vmem:[#allocation2 + $0x2] sm:$0xff] }
 0x183   :  { %v786_v9 = vpop.permute.xlu0 %785  ;;  %v4813_v11 = vld [vmem:[#allocation2 + $0x8] sm:$0xff]  ;;  %938 = vst.msk [vmem:[#allocation2 + $0x48] sm:$0xff] %vm927_vm5, %v784_v8  ;;  %v4818_v13 = vsub.f32 %v1079_v10, %v4811_v7  ;;  %v4827_v15 = vld [vmem:[#allocation2 + $0x10] sm:$0xff] }
 0x184   :  { %v1080_v12 = vld [vmem:[#allocation2 + $0xa] sm:$0xff]  ;;  %939 = vst.msk [vmem:[#allocation2 + $0x50] sm:$0xff] %vm927_vm5, %v786_v9 }
 0x185   :  { %7843 = vst [vmem:[#allocation6_spill] sm:$0xff] %v4818_v13  ;;  %v4821_v14 = vsub.f32 %v1080_v12, %v4813_v11  ;;  %2423 = vrot.lane.b32.xlu0 %v4818_v13, %s4509_s20  ;;  %v2087_v25 = vmul.f32 2.0, %v4818_v13 }
 0x186   :  { %v788_v16 = vpop.permute.xlu1 %787  ;;  %v1081_v18 = vld [vmem:[#allocation2 + $0x12] sm:$0xff] }
 0x187   :  { %7844 = vst [vmem:[#allocation7_spill] sm:$0xff] %v4821_v14  ;;  %2425 = vrot.lane.b32.xlu1 %v4821_v14, %s4509_s20  ;;  %v790_v17 = vpop.permute.xlu0 %789  ;;  %v4829_v19 = vld [vmem:[#allocation2 + $0x18] sm:$0xff]  ;;  %940 = vst.msk [vmem:[#allocation2 + $0x58] sm:$0xff] %vm927_vm5, %v788_v16  ;;  %v4834_v21 = vsub.f32 %v1081_v18, %v4827_v15  ;;  %v2088_v26 = vmul.f32 2.0, %v4821_v14 }
 0x188   :  { %v1082_v20 = vld [vmem:[#allocation2 + $0x1a] sm:$0xff]  ;;  %941 = vst.msk [vmem:[#allocation2 + $0x60] sm:$0xff] %vm927_vm5, %v790_v17 }
 0x189   :  { %7845 = vst [vmem:[#allocation8_spill] sm:$0xff] %v4834_v21  ;;  %v4837_v22 = vsub.f32 %v1082_v20, %v4829_v19  ;;  %2427 = vrot.lane.b32.xlu0 %v4834_v21, %s4509_s20  ;;  %v2089_v33 = vmul.f32 2.0, %v4834_v21 }
 0x18a   :  { %v792_v23 = vpop.permute.xlu1 %791  ;;  %v4847_v27 = vld [vmem:[#allocation2 + $0x48] sm:$0xff] }
 0x18b   :  { %7846 = vst [vmem:[#allocation9_spill] sm:$0xff] %v4837_v22  ;;  %2429 = vrot.lane.b32.xlu1 %v4837_v22, %s4509_s20  ;;  %v820_v24 = vpop.permute.xlu0 %819  ;;  %942 = vst.msk [vmem:[#allocation2 + $0x68] sm:$0xff] %vm927_vm5, %v792_v23  ;;  %v1087_v28 = vld [vmem:[#allocation2 + $0x4a] sm:$0xff]  ;;  %v2090_v34 = vmul.f32 2.0, %v4837_v22 }
 0x18c   :  { %956 = vst.msk [vmem:[#allocation2 + $0xd8] sm:$0xff] %vm927_vm5, %v820_v24  ;;  %v4851_v31 = vld [vmem:[#allocation2 + $0x50] sm:$0xff]  ;;  %v4858_v35 = vsub.f32 %v1087_v28, %v4847_v27 }
 0x18d   :  { %2183 = vrot.lane.b32.xlu0 %v2087_v25, %s4508_s0 }
 0x18e   :  { %v822_v29 = vpop.permute.xlu1 %821  ;;  %v1088_v32 = vld [vmem:[#allocation2 + $0x52] sm:$0xff]  ;;  %7847 = vst [vmem:[#allocation10_spill] sm:$0xff] %v4858_v35  ;;  %v2095_v43 = vmul.f32 2.0, %v4858_v35 }
 0x18f   :  { %2185 = vrot.lane.b32.xlu1 %v2088_v26, %s4508_s0  ;;  %v824_v30 = vpop.permute.xlu0 %823  ;;  %957 = vst.msk [vmem:[#allocation2 + $0xe0] sm:$0xff] %vm927_vm5, %v822_v29  ;;  %v4861_v36 = vsub.f32 %v1088_v32, %v4851_v31  ;;  %v4863_v37 = vld [vmem:[#allocation2 + $0x58] sm:$0xff]  ;;  %v4867_v41 = vld [vmem:[#allocation2 + $0x60] sm:$0xff] }
 0x190   :  { %958 = vst.msk [vmem:[#allocation2 + $0xe8] sm:$0xff] %vm927_vm5, %v824_v30  ;;  %v1089_v38 = vld [vmem:[#allocation2 + $0x5a] sm:$0xff] }
 0x191   :  { %7848 = vst [vmem:[#allocation11_spill] sm:$0xff] %v4861_v36  ;;  %2187 = vrot.lane.b32.xlu0 %v2089_v33, %s4508_s0  ;;  %v2096_v44 = vmul.f32 2.0, %v4861_v36  ;;  %v4874_v45 = vsub.f32 %v1089_v38, %v4863_v37  ;;  %v4939_v29 = vld [vmem:[#allocation2 + $0x20] sm:$0xff] }
 0x192   :  { %v826_v39 = vpop.permute.xlu1 %825  ;;  %v1090_v42 = vld [vmem:[#allocation2 + $0x62] sm:$0xff] }
 0x193   :  { %2189 = vrot.lane.b32.xlu1 %v2090_v34, %s4508_s0  ;;  %v828_v40 = vpop.permute.xlu0 %827  ;;  %959 = vst.msk [vmem:[#allocation2 + $0xf0] sm:$0xff] %vm927_vm5, %v826_v39  ;;  %7849 = vst [vmem:[#allocation12_spill] sm:$0xff] %v4874_v45  ;;  %v4877_v46 = vsub.f32 %v1090_v42, %v4867_v41  ;;  %v4879_v47 = vld [vmem:[#allocation2 + $0xd8] sm:$0xff]  ;;  %v2097_v53 = vmul.f32 2.0, %v4874_v45 }
 0x194   :  { %960 = vst.msk [vmem:[#allocation2 + $0xf8] sm:$0xff] %vm927_vm5, %v828_v40 }
 0x195   :  { %7850 = vst [vmem:[#allocation13_spill] sm:$0xff] %v4877_v46  ;;  %2199 = vrot.lane.b32.xlu0 %v2095_v43, %s4508_s0  ;;  %v2098_v54 = vmul.f32 2.0, %v4877_v46 }
 0x196   :  { %v838_v48 = vpop.permute.xlu1 %837  ;;  %v1103_v50 = vld [vmem:[#allocation2 + $0xda] sm:$0xff] }
 0x197   :  { %2201 = vrot.lane.b32.xlu1 %v2096_v44, %s4508_s0  ;;  %v840_v49 = vpop.permute.xlu0 %839  ;;  %v4883_v51 = vld [vmem:[#allocation2 + $0xe0] sm:$0xff]  ;;  %965 = vst.msk [vmem:[#allocation2 + $0x120] sm:$0xff] %vm927_vm5, %v838_v48  ;;  %v4890_v55 = vsub.f32 %v1103_v50, %v4879_v47  ;;  %v4897_v57 = vld [vmem:[#allocation2 + $0xe8] sm:$0xff] }
 0x198   :  { %v1104_v52 = vld [vmem:[#allocation2 + $0xe2] sm:$0xff]  ;;  %966 = vst.msk [vmem:[#allocation2 + $0x128] sm:$0xff] %vm927_vm5, %v840_v49 }
 0x199   :  { %7851 = vst [vmem:[#allocation14_spill] sm:$0xff] %v4890_v55  ;;  %v4893_v56 = vsub.f32 %v1104_v52, %v4883_v51  ;;  %2203 = vrot.lane.b32.xlu0 %v2097_v53, %s4508_s0  ;;  %v2111_v63 = vmul.f32 2.0, %v4890_v55  ;;  %v4955_v44 = vld [vmem:[#allocation2 + $0x68] sm:$0xff] }
 0x19a   :  { %v842_v58 = vpop.permute.xlu1 %841  ;;  %v1105_v60 = vld [vmem:[#allocation2 + $0xea] sm:$0xff] }
 0x19b   :  { %7852 = vst [vmem:[#allocation15_spill] sm:$0xff] %v4893_v56  ;;  %2205 = vrot.lane.b32.xlu1 %v2098_v54, %s4508_s0  ;;  %v844_v59 = vpop.permute.xlu0 %843  ;;  %v4899_v61 = vld [vmem:[#allocation2 + $0xf0] sm:$0xff]  ;;  %967 = vst.msk [vmem:[#allocation2 + $0x130] sm:$0xff] %vm927_vm5, %v842_v58  ;;  %v2112_v0 = vmul.f32 2.0, %v4893_v56  ;;  %v4906_v1 = vsub.f32 %v1105_v60, %v4897_v57 }
 0x19c   :  { %v1106_v62 = vld [vmem:[#allocation2 + $0xf2] sm:$0xff]  ;;  %968 = vst.msk [vmem:[#allocation2 + $0x138] sm:$0xff] %vm927_vm5, %v844_v59 }
 0x19d   :  { %7853 = vst [vmem:[#allocation16_spill] sm:$0xff] %v4906_v1  ;;  %v4909_v2 = vsub.f32 %v1106_v62, %v4899_v61  ;;  %2231 = vrot.lane.b32.xlu0 %v2111_v63, %s4508_s0  ;;  %v2113_v8 = vmul.f32 2.0, %v4906_v1 }
 0x19e   :  { %v846_v3 = vpop.permute.xlu1 %845  ;;  %v4913_v5 = vld [vmem:[#allocation2 + $0x120] sm:$0xff] }
 0x19f   :  { %7854 = vst [vmem:[#allocation17_spill] sm:$0xff] %v4909_v2  ;;  %2233 = vrot.lane.b32.xlu1 %v2112_v0, %s4508_s0  ;;  %v776_v4 = vpop.permute.xlu0 %775  ;;  %v1111_v6 = vld [vmem:[#allocation2 + $0x122] sm:$0xff]  ;;  %969 = vst.msk [vmem:[#allocation2 + $0x140] sm:$0xff] %vm927_vm5, %v846_v3  ;;  %v2114_v9 = vmul.f32 2.0, %v4909_v2 }
 0x1a0   :  { %933 = vst.msk [vmem:[#allocation2 + $0x28] sm:$0xff] %vm927_vm5, %v776_v4  ;;  %v4920_v10 = vsub.f32 %v1111_v6, %v4913_v5  ;;  %v4924_v12 = vld [vmem:[#allocation2 + $0x128] sm:$0xff] }
 0x1a1   :  { %2235 = vrot.lane.b32.xlu0 %v2113_v8, %s4508_s0 }
 0x1a2   :  { %7855 = vst [vmem:[#allocation18_spill] sm:$0xff] %v4920_v10  ;;  %v778_v16 = vpop.permute.xlu1 %777  ;;  %v1112_v18 = vld [vmem:[#allocation2 + $0x12a] sm:$0xff]  ;;  %v2119_v24 = vmul.f32 2.0, %v4920_v10 }
 0x1a3   :  { %2237 = vrot.lane.b32.xlu1 %v2114_v9, %s4508_s0  ;;  %v794_v17 = vpop.permute.xlu0 %793  ;;  %v4926_v20 = vld [vmem:[#allocation2 + $0x130] sm:$0xff]  ;;  %934 = vst.msk [vmem:[#allocation2 + $0x30] sm:$0xff] %vm927_vm5, %v778_v16  ;;  %v4932_v25 = vsub.f32 %v1112_v18, %v4924_v12  ;;  %v4941_v33 = vld [vmem:[#allocation2 + $0x138] sm:$0xff] }
 0x1a4   :  { %v1113_v23 = vld [vmem:[#allocation2 + $0x132] sm:$0xff]  ;;  %943 = vst.msk [vmem:[#allocation2 + $0x70] sm:$0xff] %vm927_vm5, %v794_v17 }
 0x1a5   :  { %7856 = vst [vmem:[#allocation19_spill] sm:$0xff] %v4932_v25  ;;  %v4935_v26 = vsub.f32 %v1113_v23, %v4926_v20  ;;  %2247 = vrot.lane.b32.xlu0 %v2119_v24, %s4508_s0  ;;  %v2120_v28 = vmul.f32 2.0, %v4932_v25 }
 0x1a6   :  { %v796_v30 = vpop.permute.xlu1 %795  ;;  %v1114_v34 = vld [vmem:[#allocation2 + $0x13a] sm:$0xff] }
 0x1a7   :  { %7857 = vst [vmem:[#allocation20_spill] sm:$0xff] %v4935_v26  ;;  %v802_v32 = vpop.permute.xlu0 %801  ;;  %v1083_v38 = vld [vmem:[#allocation2 + $0x22] sm:$0xff]  ;;  %944 = vst.msk [vmem:[#allocation2 + $0x78] sm:$0xff] %vm927_vm5, %v796_v30  ;;  %2249 = vrot.lane.b32.xlu1 %v2120_v28, %s4508_s0  ;;  %v2121_v39 = vmul.f32 2.0, %v4935_v26  ;;  %v4948_v40 = vsub.f32 %v1114_v34, %v4941_v33 }
 0x1a8   :  { %947 = vst.msk [vmem:[#allocation2 + $0x90] sm:$0xff] %vm927_vm5, %v802_v32  ;;  %v4951_v42 = vsub.f32 %v1083_v38, %v4939_v29  ;;  %v4957_v50 = vld [vmem:[#allocation2 + $0x28] sm:$0xff] }
 0x1a9   :  { %7858 = vst [vmem:[#allocation21_spill] sm:$0xff] %v4948_v40  ;;  %2251 = vrot.lane.b32.xlu0 %v2121_v39, %s4508_s0  ;;  %v2122_v43 = vmul.f32 2.0, %v4948_v40 }
 0x1aa   :  { %7859 = vst [vmem:[#allocation22_spill] sm:$0xff] %v4951_v42  ;;  %v804_v48 = vpop.permute.xlu1 %803  ;;  %v1084_v52 = vld [vmem:[#allocation2 + $0x2a] sm:$0xff]  ;;  %v2091_v54 = vmul.f32 2.0, %v4951_v42 }
 0x1ab   :  { %v806_v49 = vpop.permute.xlu0 %805  ;;  %v1091_v53 = vld [vmem:[#allocation2 + $0x6a] sm:$0xff]  ;;  %948 = vst.msk [vmem:[#allocation2 + $0x98] sm:$0xff] %vm927_vm5, %v804_v48  ;;  %2253 = vrot.lane.b32.xlu1 %v2122_v43, %s4508_s0  ;;  %v4964_v58 = vsub.f32 %v1084_v52, %v4957_v50 }
 0x1ac   :  { %949 = vst.msk [vmem:[#allocation2 + $0xa0] sm:$0xff] %vm927_vm5, %v806_v49  ;;  %v4967_v59 = vsub.f32 %v1091_v53, %v4955_v44  ;;  %v4971_v0 = vld [vmem:[#allocation2 + $0x70] sm:$0xff] }
 0x1ad   :  { %7860 = vst [vmem:[#allocation23_spill] sm:$0xff] %v4964_v58  ;;  %2191 = vrot.lane.b32.xlu0 %v2091_v54, %s4508_s0  ;;  %v2092_v60 = vmul.f32 2.0, %v4964_v58 }
 0x1ae   :  { %7861 = vst [vmem:[#allocation24_spill] sm:$0xff] %v4967_v59  ;;  %v808_v62 = vpop.permute.xlu1 %807  ;;  %v1092_v3 = vld [vmem:[#allocation2 + $0x72] sm:$0xff]  ;;  %v2099_v4 = vmul.f32 2.0, %v4967_v59 }
 0x1af   :  { %v810_v63 = vpop.permute.xlu0 %809  ;;  %950 = vst.msk [vmem:[#allocation2 + $0xa8] sm:$0xff] %vm927_vm5, %v808_v62  ;;  %2193 = vrot.lane.b32.xlu1 %v2092_v60, %s4508_s0  ;;  %v4978_v6 = vsub.f32 %v1092_v3, %v4971_v0  ;;  %v4980_v8 = vld [vmem:[#allocation2 + $0x90] sm:$0xff] }
 0x1b0   :  { %951 = vst.msk [vmem:[#allocation2 + $0xb0] sm:$0xff] %vm927_vm5, %v810_v63  ;;  %v5013_v63 = vld [vmem:[#allocation2 + $0xf8] sm:$0xff] }
 0x1b1   :  { %7862 = vst [vmem:[#allocation25_spill] sm:$0xff] %v4978_v6  ;;  %2207 = vrot.lane.b32.xlu0 %v2099_v4, %s4508_s0  ;;  %v2100_v9 = vmul.f32 2.0, %v4978_v6 }
 0x1b2   :  { %v830_v16 = vpop.permute.xlu1 %829  ;;  %v1095_v18 = vld [vmem:[#allocation2 + $0x92] sm:$0xff] }
 0x1b3   :  { %v832_v17 = vpop.permute.xlu0 %831  ;;  %v4984_v23 = vld [vmem:[#allocation2 + $0x98] sm:$0xff]  ;;  %961 = vst.msk [vmem:[#allocation2 + $0x100] sm:$0xff] %vm927_vm5, %v830_v16  ;;  %2209 = vrot.lane.b32.xlu1 %v2100_v9, %s4508_s0  ;;  %v4990_v28 = vsub.f32 %v1095_v18, %v4980_v8  ;;  %v4997_v38 = vld [vmem:[#allocation2 + $0xa0] sm:$0xff] }
 0x1b4   :  { %v1096_v24 = vld [vmem:[#allocation2 + $0x9a] sm:$0xff]  ;;  %962 = vst.msk [vmem:[#allocation2 + $0x108] sm:$0xff] %vm927_vm5, %v832_v17 }
 0x1b5   :  { %7863 = vst [vmem:[#allocation26_spill] sm:$0xff] %v4990_v28  ;;  %v4993_v30 = vsub.f32 %v1096_v24, %v4984_v23  ;;  %v2103_v32 = vmul.f32 2.0, %v4990_v28 }
 0x1b6   :  { %v848_v39 = vpop.permute.xlu1 %847  ;;  %v1097_v48 = vld [vmem:[#allocation2 + $0xa2] sm:$0xff] }
 0x1b7   :  { %7864 = vst [vmem:[#allocation27_spill] sm:$0xff] %v4993_v30  ;;  %v2104_v34 = vmul.f32 2.0, %v4993_v30  ;;  %v850_v43 = vpop.permute.xlu0 %849  ;;  %v4999_v49 = vld [vmem:[#allocation2 + $0xa8] sm:$0xff]  ;;  %970 = vst.msk [vmem:[#allocation2 + $0x148] sm:$0xff] %vm927_vm5, %v848_v39  ;;  %2215 = vrot.lane.b32.xlu0 %v2103_v32, %s4508_s0  ;;  %v5006_v53 = vsub.f32 %v1097_v48, %v4997_v38  ;;  %v5029_v39 = vld [vmem:[#allocation2 + $0x140] sm:$0xff] }
 0x1b8   :  { %v1098_v52 = vld [vmem:[#allocation2 + $0xaa] sm:$0xff]  ;;  %971 = vst.msk [vmem:[#allocation2 + $0x150] sm:$0xff] %vm927_vm5, %v850_v43  ;;  %7870 = vst [vmem:[#allocation33_spill] sm:$0xff] %v5029_v39 }
 0x1b9   :  { %2217 = vrot.lane.b32.xlu1 %v2104_v34, %s4508_s0  ;;  %7865 = vst [vmem:[#allocation28_spill] sm:$0xff] %v5006_v53  ;;  %v5009_v54 = vsub.f32 %v1098_v52, %v4999_v49  ;;  %v2105_v60 = vmul.f32 2.0, %v5006_v53 }
 0x1ba   :  { %v856_v3 = vpop.permute.xlu1 %855  ;;  %v1107_v9 = vld [vmem:[#allocation2 + $0xfa] sm:$0xff] }
 0x1bb   :  { %7866 = vst [vmem:[#allocation29_spill] sm:$0xff] %v5009_v54  ;;  %v2106_v62 = vmul.f32 2.0, %v5009_v54  ;;  %v858_v4 = vpop.permute.xlu0 %857  ;;  %v5015_v16 = vld [vmem:[#allocation2 + $0x100] sm:$0xff]  ;;  %974 = vst.msk [vmem:[#allocation2 + $0x168] sm:$0xff] %vm927_vm5, %v856_v3  ;;  %2219 = vrot.lane.b32.xlu0 %v2105_v60, %s4508_s0  ;;  %v5022_v18 = vsub.f32 %v1107_v9, %v5013_v63 }
 0x1bc   :  { %7867 = vst [vmem:[#allocation30_spill] sm:$0xff] %v5015_v16  ;;  %v1108_v17 = vld [vmem:[#allocation2 + $0x102] sm:$0xff]  ;;  %975 = vst.msk [vmem:[#allocation2 + $0x170] sm:$0xff] %vm927_vm5, %v858_v4 }
 0x1bd   :  { %2221 = vrot.lane.b32.xlu1 %v2106_v62, %s4508_s0  ;;  %7868 = vst [vmem:[#allocation31_spill] sm:$0xff] %v5022_v18  ;;  %v5025_v24 = vsub.f32 %v1108_v17, %v5015_v16  ;;  %v2115_v32 = vmul.f32 2.0, %v5022_v18 }
 0x1be   :  { %v860_v43 = vpop.permute.xlu1 %859  ;;  %v1115_v52 = vld [vmem:[#allocation2 + $0x142] sm:$0xff] }
 0x1bf   :  { %7869 = vst [vmem:[#allocation32_spill] sm:$0xff] %v5025_v24  ;;  %v2116_v34 = vmul.f32 2.0, %v5025_v24  ;;  %v862_v48 = vpop.permute.xlu0 %861  ;;  %v5031_v3 = vld [vmem:[#allocation2 + $0x148] sm:$0xff]  ;;  %976 = vst.msk [vmem:[#allocation2 + $0x178] sm:$0xff] %vm927_vm5, %v860_v43  ;;  %2239 = vrot.lane.b32.xlu0 %v2115_v32, %s4508_s0  ;;  %v5038_v62 = vsub.f32 %v1115_v52, %v5029_v39 }
 0x1c0   :  { %7871 = vst [vmem:[#allocation34_spill] sm:$0xff] %v5031_v3  ;;  %v1116_v60 = vld [vmem:[#allocation2 + $0x14a] sm:$0xff]  ;;  %977 = vst.msk [vmem:[#allocation2 + $0x180] sm:$0xff] %vm927_vm5, %v862_v48 }
 0x1c1   :  { %2241 = vrot.lane.b32.xlu1 %v2116_v34, %s4508_s0  ;;  %7872 = vst [vmem:[#allocation35_spill] sm:$0xff] %v5038_v62  ;;  %v5041_v4 = vsub.f32 %v1116_v60, %v5031_v3  ;;  %v2123_v9 = vmul.f32 2.0, %v5038_v62 }
 0x1c2   :  { %v864_v21 = vpop.permute.xlu1 %863  ;;  %v5045_v13 = vld [vmem:[#allocation2 + $0x168] sm:$0xff] }
 0x1c3   :  { %7873 = vst [vmem:[#allocation36_spill] sm:$0xff] %v5041_v4  ;;  %v2124_v17 = vmul.f32 2.0, %v5041_v4  ;;  %v780_v22 = vpop.permute.xlu0 %779  ;;  %7874 = vst [vmem:[#allocation37_spill] sm:$0xff] %v5045_v13  ;;  %v5047_v43 = vld [vmem:[#allocation2 + $0x16a] sm:$0xff]  ;;  %2255 = vrot.lane.b32.xlu0 %v2123_v9, %s4508_s0 }
 0x1c4   :  { %7875 = vst [vmem:[#allocation38_spill] sm:$0xff] %v5047_v43  ;;  %978 = vst.msk [vmem:[#allocation2 + $0x188] sm:$0xff] %vm927_vm5, %v864_v21  ;;  %v5055_v32 = vsub.f32 %v5047_v43, %v5045_v13  ;;  %v5058_v48 = vld [vmem:[#allocation2 + $0x170] sm:$0xff] }
 0x1c5   :  { %935 = vst.msk [vmem:[#allocation2 + $0x38] sm:$0xff] %vm927_vm5, %v780_v22  ;;  %2257 = vrot.lane.b32.xlu1 %v2124_v17, %s4508_s0 }
 0x1c6   :  { %7876 = vst [vmem:[#allocation39_spill] sm:$0xff] %v5055_v32  ;;  %v2127_v34 = vmul.f32 2.0, %v5055_v32  ;;  %v782_v52 = vpop.permute.xlu1 %781  ;;  %v5060_v14 = vld [vmem:[#allocation2 + $0x172] sm:$0xff] }
 0x1c7   :  { %v798_v60 = vpop.permute.xlu0 %797  ;;  %7877 = vst [vmem:[#allocation40_spill] sm:$0xff] %v5060_v14  ;;  %v5062_v21 = vld [vmem:[#allocation2 + $0x178] sm:$0xff]  ;;  %937 = vst.msk [vmem:[#allocation2 + $0x40] sm:$0x3] %vm936_vm6, %v782_v52  ;;  %v5071_v9 = vsub.f32 %v5060_v14, %v5058_v48  ;;  %v5079_v16 = vld [vmem:[#allocation2 + $0x180] sm:$0xff] }
 0x1c8   :  { %7878 = vst [vmem:[#allocation41_spill] sm:$0xff] %v5062_v21  ;;  %v5064_v22 = vld [vmem:[#allocation2 + $0x17a] sm:$0xff]  ;;  %945 = vst.msk [vmem:[#allocation2 + $0x80] sm:$0xff] %vm927_vm5, %v798_v60  ;;  %2263 = vrot.lane.b32.xlu0 %v2127_v34, %s4508_s0 }
 0x1c9   :  { %7879 = vst [vmem:[#allocation42_spill] sm:$0xff] %v5064_v22  ;;  %7880 = vst [vmem:[#allocation43_spill] sm:$0xff] %v5071_v9  ;;  %v5075_v17 = vsub.f32 %v5064_v22, %v5062_v21  ;;  %v2128_v43 = vmul.f32 2.0, %v5071_v9 }
 0x1ca   :  { %v800_v3 = vpop.permute.xlu1 %799  ;;  %7882 = vst [vmem:[#allocation45_spill] sm:$0xff] %v5079_v16 }
 0x1cb   :  { %7881 = vst [vmem:[#allocation44_spill] sm:$0xff] %v5075_v17  ;;  %v2129_v13 = vmul.f32 2.0, %v5075_v17  ;;  %v812_v39 = vpop.permute.xlu0 %811  ;;  %v5081_v52 = vld [vmem:[#allocation2 + $0x182] sm:$0xff]  ;;  %946 = vst.msk [vmem:[#allocation2 + $0x88] sm:$0x3] %vm936_vm6, %v800_v3  ;;  %2265 = vrot.lane.b32.xlu1 %v2128_v43, %s4508_s0 }
 0x1cc   :  { %7883 = vst [vmem:[#allocation46_spill] sm:$0xff] %v5081_v52  ;;  %952 = vst.msk [vmem:[#allocation2 + $0xb8] sm:$0xff] %vm927_vm5, %v812_v39  ;;  %v5089_v34 = vsub.f32 %v5081_v52, %v5079_v16 }
 0x1cd   :  { %2267 = vrot.lane.b32.xlu0 %v2129_v13, %s4508_s0 }
 0x1ce   :  { %7884 = vst [vmem:[#allocation47_spill] sm:$0xff] %v5089_v34  ;;  %v2130_v60 = vmul.f32 2.0, %v5089_v34  ;;  %v814_v22 = vpop.permute.xlu1 %813 }
 0x1cf   :  { %v834_v14 = vpop.permute.xlu0 %833  ;;  %953 = vst.msk [vmem:[#allocation2 + $0xc0] sm:$0xff] %vm927_vm5, %v814_v22 }
 0x1d0   :  { %963 = vst.msk [vmem:[#allocation2 + $0x110] sm:$0xff] %vm927_vm5, %v834_v14  ;;  %2269 = vrot.lane.b32.xlu1 %v2130_v60, %s4508_s0 }
 0x1d1   :  { %2439 = vrot.lane.b32.xlu0 %v4858_v35, %s4509_s20 }
 0x1d2   :  { %v836_v39 = vpop.permute.xlu1 %835 }
 0x1d3   :  { %v852_v3 = vpop.permute.xlu0 %851  ;;  %964 = vst.msk [vmem:[#allocation2 + $0x118] sm:$0x3] %vm936_vm6, %v836_v39  ;;  %v5115_v39 = vld [vmem:[#allocation2 + $0x32] sm:$0xff] }
 0x1d4   :  { %972 = vst.msk [vmem:[#allocation2 + $0x158] sm:$0xff] %vm927_vm5, %v852_v3  ;;  %2441 = vrot.lane.b32.xlu1 %v4861_v36, %s4509_s20  ;;  %7885 = vst [vmem:[#allocation48_spill] sm:$0xff] %v5115_v39 }
 0x1d5   :  { %2443 = vrot.lane.b32.xlu0 %v4874_v45, %s4509_s20 }
 0x1d6   :  { %v854_v13 = vpop.permute.xlu1 %853 }
 0x1d7   :  { %v866_v43 = vpop.permute.xlu0 %865  ;;  %973 = vst.msk [vmem:[#allocation2 + $0x160] sm:$0x3] %vm936_vm6, %v854_v13  ;;  %v5123_v13 = vld [vmem:[#allocation2 + $0x30] sm:$0xff] }
 0x1d8   :  { %979 = vst.msk [vmem:[#allocation2 + $0x190] sm:$0xff] %vm927_vm5, %v866_v43  ;;  %2445 = vrot.lane.b32.xlu1 %v4877_v46, %s4509_s20  ;;  %7886 = vst [vmem:[#allocation49_spill] sm:$0xff] %v5123_v13  ;;  %v5127_v43 = vsub.f32 %v5115_v39, %v5123_v13 }
 0x1d9   :  { %2471 = vrot.lane.b32.xlu0 %v4890_v55, %s4509_s20 }
 0x1da   :  { %v868_v14 = vpop.permute.xlu1 %867  ;;  %7887 = vst [vmem:[#allocation50_spill] sm:$0xff] %v5127_v43 }
 0x1db   :  { %v816_v22 = vpop.permute.xlu0 %815  ;;  %980 = vst.msk [vmem:[#allocation2 + $0x198] sm:$0xff] %vm927_vm5, %v868_v14 }
 0x1dc   :  { %2473 = vrot.lane.b32.xlu1 %v4893_v56, %s4509_s20  ;;  %954 = vst.msk [vmem:[#allocation2 + $0xc8] sm:$0xff] %vm927_vm5, %v816_v22  ;;  %v5129_v22 = vld [vmem:[#allocation2 + $0x3a] sm:$0xff]  ;;  %v5153_v56 = vld [vmem:[#allocation2 + $0xb2] sm:$0xff] }
 0x1dd   :  { %2475 = vrot.lane.b32.xlu0 %v4906_v1, %s4509_s20  ;;  %7888 = vst [vmem:[#allocation51_spill] sm:$0xff] %v5129_v22  ;;  %v5131_v1 = vld [vmem:[#allocation2 + $0x7a] sm:$0xff]  ;;  %7895 = vst [vmem:[#allocation58_spill] sm:$0xff] %v5153_v56 }
 0x1de   :  { %v818_v60 = vpop.permute.xlu1 %817  ;;  %7889 = vst [vmem:[#allocation52_spill] sm:$0xff] %v5131_v1 }
 0x1df   :  { %v870_v3 = vpop.permute.xlu0 %869  ;;  %955 = vst.msk [vmem:[#allocation2 + $0xd0] sm:$0x3] %vm936_vm6, %v818_v60  ;;  %v5138_v60 = vld [vmem:[#allocation2 + $0x38] sm:$0xff]  ;;  %v5240_v16 = vld [vmem:[#allocation2 + $0x190] sm:$0xff] }
 0x1e0   :  { %2477 = vrot.lane.b32.xlu1 %v4909_v2, %s4509_s20  ;;  %981 = vst.msk [vmem:[#allocation2 + $0x1a0] sm:$0xff] %vm927_vm5, %v870_v3  ;;  %7890 = vst [vmem:[#allocation53_spill] sm:$0xff] %v5138_v60  ;;  %v5140_v3 = vld [vmem:[#allocation2 + $0x78] sm:$0xff]  ;;  %v5145_v2 = vsub.f32 %v5129_v22, %v5138_v60  ;;  %v5180_v22 = vld [vmem:[#allocation2 + $0x108] sm:$0xff] }
 0x1e1   :  { %2487 = vrot.lane.b32.xlu0 %v4920_v10, %s4509_s20  ;;  %7891 = vst [vmem:[#allocation54_spill] sm:$0xff] %v5140_v3  ;;  %v2093_v10 = vmul.f32 2.0, %v5127_v43  ;;  %v5149_v55 = vsub.f32 %v5131_v1, %v5140_v3  ;;  %v5172_v1 = vld [vmem:[#allocation2 + $0xba] sm:$0xff]  ;;  %7903 = vst [vmem:[#allocation66_spill] sm:$0xff] %v5180_v22  ;;  %v5220_v60 = vld [vmem:[#allocation2 + $0x188] sm:$0xff] }
 0x1e2   :  { %v872_v14 = vpop.permute.xlu1 %871  ;;  %7892 = vst [vmem:[#allocation55_spill] sm:$0xff] %v5145_v2  ;;  %v2094_v45 = vmul.f32 2.0, %v5145_v2  ;;  %7900 = vst [vmem:[#allocation63_spill] sm:$0xff] %v5172_v1 }
 0x1e3   :  { %982 = vst.msk [vmem:[#allocation2 + $0x1a8] sm:$0x3] %vm936_vm6, %v872_v14  ;;  %7893 = vst [vmem:[#allocation56_spill] sm:$0xff] %v5149_v55  ;;  %v5158_v14 = vld [vmem:[#allocation2 + $0x80] sm:$0xff]  ;;  %v2101_v46 = vmul.f32 2.0, %v5149_v55 }
 0x1e4   :  { %2489 = vrot.lane.b32.xlu1 %v4932_v25, %s4509_s20  ;;  %7896 = vst [vmem:[#allocation59_spill] sm:$0xff] %v5158_v14  ;;  %v5160_v25 = vld [vmem:[#allocation2 + $0xb0] sm:$0xff]  ;;  %7914 = vst [vmem:[#allocation77_spill] sm:$0xff] %v5220_v60 }
 0x1e5   :  { %2491 = vrot.lane.b32.xlu0 %v4935_v26, %s4509_s20  ;;  %v5151_v26 = vld [vmem:[#allocation2 + $0x82] sm:$0xff]  ;;  %7897 = vst [vmem:[#allocation60_spill] sm:$0xff] %v5160_v25  ;;  %v5170_v36 = vsub.f32 %v5153_v56, %v5160_v25  ;;  %v5192_v25 = vld [vmem:[#allocation2 + $0x112] sm:$0xff] }
 0x1e6   :  { %7894 = vst [vmem:[#allocation57_spill] sm:$0xff] %v5151_v26  ;;  %v5166_v35 = vsub.f32 %v5151_v26, %v5158_v14  ;;  %7906 = vst [vmem:[#allocation69_spill] sm:$0xff] %v5192_v25  ;;  %v5200_v14 = vld [vmem:[#allocation2 + $0x150] sm:$0xff] }
 0x1e7   :  { %7899 = vst [vmem:[#allocation62_spill] sm:$0xff] %v5170_v36  ;;  %v2107_v26 = vmul.f32 2.0, %v5170_v36  ;;  %7909 = vst [vmem:[#allocation72_spill] sm:$0xff] %v5200_v14 }
 0x1e8   :  { %2493 = vrot.lane.b32.xlu1 %v4948_v40, %s4509_s20  ;;  %7898 = vst [vmem:[#allocation61_spill] sm:$0xff] %v5166_v35  ;;  %v5174_v40 = vld [vmem:[#allocation2 + $0x10a] sm:$0xff]  ;;  %v2102_v39 = vmul.f32 2.0, %v5166_v35 }
 0x1e9   :  { %2195 = vrot.lane.b32.xlu0 %v2093_v10, %s4508_s0  ;;  %7901 = vst [vmem:[#allocation64_spill] sm:$0xff] %v5174_v40  ;;  %v5178_v10 = vld [vmem:[#allocation2 + $0xb8] sm:$0xff]  ;;  %v5190_v52 = vsub.f32 %v5174_v40, %v5180_v22 }
 0x1ea   :  { %7902 = vst [vmem:[#allocation65_spill] sm:$0xff] %v5178_v10  ;;  %v5186_v56 = vsub.f32 %v5172_v1, %v5178_v10  ;;  %v5212_v10 = vld [vmem:[#allocation2 + $0x15a] sm:$0xff] }
 0x1eb   :  { %7905 = vst [vmem:[#allocation68_spill] sm:$0xff] %v5190_v52  ;;  %v2117_v1 = vmul.f32 2.0, %v5190_v52  ;;  %7912 = vst [vmem:[#allocation75_spill] sm:$0xff] %v5212_v10 }
 0x1ec   :  { %2197 = vrot.lane.b32.xlu1 %v2094_v45, %s4508_s0  ;;  %7904 = vst [vmem:[#allocation67_spill] sm:$0xff] %v5186_v56  ;;  %v5194_v45 = vld [vmem:[#allocation2 + $0x152] sm:$0xff]  ;;  %v2108_v3 = vmul.f32 2.0, %v5186_v56 }
 0x1ed   :  { %2211 = vrot.lane.b32.xlu0 %v2101_v46, %s4508_s0  ;;  %7907 = vst [vmem:[#allocation70_spill] sm:$0xff] %v5194_v45  ;;  %v5198_v46 = vld [vmem:[#allocation2 + $0x110] sm:$0xff]  ;;  %v5210_v22 = vsub.f32 %v5194_v45, %v5200_v14 }
 0x1ee   :  { %7908 = vst [vmem:[#allocation71_spill] sm:$0xff] %v5198_v46  ;;  %v5206_v40 = vsub.f32 %v5192_v25, %v5198_v46  ;;  %v5232_v46 = vld [vmem:[#allocation2 + $0x192] sm:$0xff] }
 0x1ef   :  { %7911 = vst [vmem:[#allocation74_spill] sm:$0xff] %v5210_v22  ;;  %v2125_v25 = vmul.f32 2.0, %v5210_v22  ;;  %7917 = vst [vmem:[#allocation80_spill] sm:$0xff] %v5232_v46 }
 0x1f0   :  { %2213 = vrot.lane.b32.xlu1 %v2102_v39, %s4508_s0  ;;  %7910 = vst [vmem:[#allocation73_spill] sm:$0xff] %v5206_v40  ;;  %v5214_v39 = vld [vmem:[#allocation2 + $0x18a] sm:$0xff]  ;;  %v2118_v13 = vmul.f32 2.0, %v5206_v40 }
 0x1f1   :  { %2223 = vrot.lane.b32.xlu0 %v2107_v26, %s4508_s0  ;;  %7913 = vst [vmem:[#allocation76_spill] sm:$0xff] %v5214_v39  ;;  %v5218_v26 = vld [vmem:[#allocation2 + $0x158] sm:$0xff]  ;;  %v5230_v14 = vsub.f32 %v5214_v39, %v5220_v60  ;;  %v5246_v39 = vsub.f32 %v5232_v46, %v5240_v16 }
 0x1f2   :  { %v5226_v45 = vsub.f32 %v5212_v10, %v5218_v26 }
 0x1f3   :  { %7916 = vst [vmem:[#allocation79_spill] sm:$0xff] %v5230_v14  ;;  %v2131_v10 = vmul.f32 2.0, %v5230_v14  ;;  %7920 = vst [vmem:[#allocation83_spill] sm:$0xff] %v5246_v39 }
 0x1f4   :  { %2225 = vrot.lane.b32.xlu1 %v2108_v3, %s4508_s0  ;;  %7915 = vst [vmem:[#allocation78_spill] sm:$0xff] %v5226_v45  ;;  %v2126_v21 = vmul.f32 2.0, %v5226_v45 }
 0x1f5   :  { %2243 = vrot.lane.b32.xlu0 %v2117_v1, %s4508_s0 }
 0x1f7   :  { %v5238_v1 = vpop.permute.xlu0 %2423 }
 0x1f8   :  { %2245 = vrot.lane.b32.xlu1 %v2118_v13, %s4508_s0  ;;  %7919 = vst [vmem:[#allocation82_spill] sm:$0xff] %v5238_v1 }
 0x1f9   :  { %v5234_v3 = vpop.permute.xlu1 %2425  ;;  %2259 = vrot.lane.b32.xlu0 %v2125_v25, %s4508_s0  ;;  %v2132_v25 = vmul.f32 2.0, %v5246_v39 }
 0x1fa   :  { %7918 = vst [vmem:[#allocation81_spill] sm:$0xff] %v5234_v3 }
 0x1fb   :  { %v5252_v13 = vpop.permute.xlu0 %2427 }
 0x1fc   :  { %2261 = vrot.lane.b32.xlu1 %v2126_v21, %s4508_s0 }
 0x1fd   :  { %v5248_v60 = vpop.permute.xlu1 %2429  ;;  %2271 = vrot.lane.b32.xlu0 %v2131_v10, %s4508_s0 }
 0x1ff   :  { %v5260_v3 = vpop.permute.xlu0 %2183 }
 0x200   :  { %2273 = vrot.lane.b32.xlu1 %v2132_v25, %s4508_s0 }
 0x201   :  { %v5255_v1 = vpop.permute.xlu1 %2185  ;;  %2431 = vrot.lane.b32.xlu0 %v4951_v42, %s4509_s20 }
 0x203   :  { %v5268_v21 = vpop.permute.xlu0 %2187 }
 0x204   :  { %2433 = vrot.lane.b32.xlu1 %v4964_v58, %s4509_s20 }
 0x205   :  { %v5262_v46 = vpop.permute.xlu1 %2189  ;;  %2447 = vrot.lane.b32.xlu0 %v4967_v59, %s4509_s20 }
 0x207   :  { %v5276_v25 = vpop.permute.xlu0 %2199 }
 0x208   :  { %2449 = vrot.lane.b32.xlu1 %v4978_v6, %s4509_s20  ;;  %v5302_v6 = vld [vmem:[#allocation2 + $0xc0] sm:$0xff] }
 0x209   :  { %v5270_v10 = vpop.permute.xlu1 %2201  ;;  %2455 = vrot.lane.b32.xlu0 %v4990_v28, %s4509_s20 }
 0x20b   :  { %v5284_v59 = vpop.permute.xlu0 %2203 }
 0x20c   :  { %2457 = vrot.lane.b32.xlu1 %v4993_v30, %s4509_s20  ;;  %7922 = vst [vmem:[#allocation85_spill] sm:$0xff] %v5284_v59  ;;  %v5343_v59 = vld [vmem:[#allocation2 + $0x1a0] sm:$0xff] }
 0x20d   :  { %v5278_v42 = vpop.permute.xlu1 %2205  ;;  %2459 = vrot.lane.b32.xlu0 %v5006_v53, %s4509_s20 }
 0x20e   :  { %7921 = vst [vmem:[#allocation84_spill] sm:$0xff] %v5278_v42 }
 0x20f   :  { %v5292_v28 = vpop.permute.xlu0 %2231 }
 0x210   :  { %2461 = vrot.lane.b32.xlu1 %v5009_v54, %s4509_s20  ;;  %7924 = vst [vmem:[#allocation87_spill] sm:$0xff] %v5292_v28  ;;  %v5318_v54 = vld [vmem:[#allocation2 + $0xc8] sm:$0xff]  ;;  %v5324_v28 = vld [vmem:[#allocation2 + $0x19a] sm:$0xff] }
 0x211   :  { %v5286_v58 = vpop.permute.xlu1 %2233  ;;  %2479 = vrot.lane.b32.xlu0 %v5022_v18, %s4509_s20  ;;  %7932 = vst [vmem:[#allocation95_spill] sm:$0xff] %v5324_v28 }
 0x212   :  { %7923 = vst [vmem:[#allocation86_spill] sm:$0xff] %v5286_v58  ;;  %v5304_v58 = vld [vmem:[#allocation2 + $0xc2] sm:$0xff] }
 0x213   :  { %v5298_v53 = vpop.permute.xlu0 %2235  ;;  %7927 = vst [vmem:[#allocation90_spill] sm:$0xff] %v5304_v58 }
 0x214   :  { %2481 = vrot.lane.b32.xlu1 %v5025_v24, %s4509_s20  ;;  %7925 = vst [vmem:[#allocation88_spill] sm:$0xff] %v5298_v53  ;;  %v5316_v24 = vsub.f32 %v5304_v58, %v5302_v6  ;;  %v5320_v53 = vld [vmem:[#allocation2 + $0xca] sm:$0xff] }
 0x215   :  { %2495 = vrot.lane.b32.xlu0 %v5038_v62, %s4509_s20  ;;  %v5300_v30 = vpop.permute.xlu1 %2237  ;;  %7931 = vst [vmem:[#allocation94_spill] sm:$0xff] %v5320_v53 }
 0x216   :  { %7926 = vst [vmem:[#allocation89_spill] sm:$0xff] %v5300_v30  ;;  %7930 = vst [vmem:[#allocation93_spill] sm:$0xff] %v5316_v24  ;;  %v5322_v30 = vld [vmem:[#allocation2 + $0x198] sm:$0xff]  ;;  %v2109_v58 = vmul.f32 2.0, %v5316_v24 }
 0x217   :  { %v5310_v18 = vpop.permute.xlu0 %2247 }
 0x218   :  { %2497 = vrot.lane.b32.xlu1 %v5041_v4, %s4509_s20  ;;  %7928 = vst [vmem:[#allocation91_spill] sm:$0xff] %v5310_v18  ;;  %v5341_v18 = vsub.f32 %v5324_v28, %v5322_v30 }
 0x219   :  { %2503 = vrot.lane.b32.xlu0 %v5055_v32, %s4509_s20  ;;  %v5312_v62 = vpop.permute.xlu1 %2249 }
 0x21a   :  { %7929 = vst [vmem:[#allocation92_spill] sm:$0xff] %v5312_v62  ;;  %v5337_v62 = vsub.f32 %v5320_v53, %v5318_v54  ;;  %7936 = vst [vmem:[#allocation99_spill] sm:$0xff] %v5341_v18 }
 0x21b   :  { %v5330_v32 = vpop.permute.xlu0 %2251 }
 0x21c   :  { %2505 = vrot.lane.b32.xlu1 %v5071_v9, %s4509_s20  ;;  %7933 = vst [vmem:[#allocation96_spill] sm:$0xff] %v5330_v32  ;;  %7935 = vst [vmem:[#allocation98_spill] sm:$0xff] %v5337_v62  ;;  %v2110_v53 = vmul.f32 2.0, %v5337_v62  ;;  %v2133_v32 = vmul.f32 2.0, %v5341_v18 }
 0x21d   :  { %2507 = vrot.lane.b32.xlu0 %v5075_v17, %s4509_s20  ;;  %v5332_v4 = vpop.permute.xlu1 %2253  ;;  %v5345_v17 = vld [vmem:[#allocation2 + $0x1a2] sm:$0xff] }
 0x21e   :  { %7934 = vst [vmem:[#allocation97_spill] sm:$0xff] %v5332_v4  ;;  %7937 = vst [vmem:[#allocation100_spill] sm:$0xff] %v5345_v17  ;;  %v5358_v28 = vsub.f32 %v5345_v17, %v5343_v59  ;;  %v1039_v17 = vld [vmem:[#allocation2 + $0x49] sm:$0xff] }
 0x21f   :  { %v5350_v9 = vpop.permute.xlu0 %2191 }
 0x220   :  { %2509 = vrot.lane.b32.xlu1 %v5089_v34, %s4509_s20  ;;  %7938 = vst [vmem:[#allocation101_spill] sm:$0xff] %v5350_v9  ;;  %7940 = vst [vmem:[#allocation103_spill] sm:$0xff] %v5358_v28 }
 0x221   :  { %2227 = vrot.lane.b32.xlu0 %v2109_v58, %s4508_s0  ;;  %v5352_v4 = vpop.permute.xlu1 %2193  ;;  %v2134_v58 = vmul.f32 2.0, %v5358_v28 }
 0x222   :  { %7939 = vst [vmem:[#allocation102_spill] sm:$0xff] %v5352_v4 }
 0x223   :  { %v5362_v42 = vpop.permute.xlu0 %2207 }
 0x224   :  { %2229 = vrot.lane.b32.xlu1 %v2110_v53, %s4508_s0 }
 0x225   :  { %2275 = vrot.lane.b32.xlu0 %v2133_v32, %s4508_s0  ;;  %v5364_v34 = vpop.permute.xlu1 %2209 }
 0x228   :  { %2277 = vrot.lane.b32.xlu1 %v2134_v58, %s4508_s0 }
 0x229   :  { %2435 = vrot.lane.b32.xlu0 %v5127_v43, %s4509_s20  ;;  %v5372_v9 = vpop.permute.xlu0 %2215 }
 0x22b   :  { %v5370_v4 = vpop.permute.xlu1 %2217 }
 0x22c   :  { %2437 = vrot.lane.b32.xlu1 %v5145_v2, %s4509_s20  ;;  %v1031_v2 = vld [vmem:[#allocation2 + $0x1] sm:$0xff] }
 0x22d   :  { %2451 = vrot.lane.b32.xlu0 %v5149_v55, %s4509_s20  ;;  %v5380_v32 = vpop.permute.xlu0 %2219 }
 0x22f   :  { %v5378_v53 = vpop.permute.xlu1 %2221 }
 0x230   :  { %2453 = vrot.lane.b32.xlu1 %v5166_v35, %s4509_s20 }
 0x231   :  { %2463 = vrot.lane.b32.xlu0 %v5170_v36, %s4509_s20  ;;  %v5386_v58 = vpop.permute.xlu0 %2239 }
 0x232   :  { %7941 = vst [vmem:[#allocation104_spill] sm:$0xff] %v5386_v58  ;;  %v1055_v58 = vld [vmem:[#allocation2 + $0xd9] sm:$0xff] }
 0x233   :  { %v5388_v43 = vpop.permute.xlu1 %2241 }
 0x234   :  { %2465 = vrot.lane.b32.xlu1 %v5186_v56, %s4509_s20 }
 0x235   :  { %2483 = vrot.lane.b32.xlu0 %v5190_v52, %s4509_s20  ;;  %v5394_v55 = vpop.permute.xlu0 %2255 }
 0x236   :  { %7942 = vst [vmem:[#allocation105_spill] sm:$0xff] %v5394_v55  ;;  %v1041_v55 = vld [vmem:[#allocation2 + $0x59] sm:$0xff] }
 0x237   :  { %v5400_v36 = vpop.permute.xlu1 %2257 }
 0x238   :  { %2485 = vrot.lane.b32.xlu1 %v5206_v40, %s4509_s20  ;;  %7943 = vst [vmem:[#allocation106_spill] sm:$0xff] %v5400_v36  ;;  %v1042_v36 = vld [vmem:[#allocation2 + $0x61] sm:$0xff] }
 0x239   :  { %2499 = vrot.lane.b32.xlu0 %v5210_v22, %s4509_s20 }
 0x23a   :  { %v5402_v35 = vpop.permute.xlu0 %2263 }
 0x23b   :  { %7944 = vst [vmem:[#allocation107_spill] sm:$0xff] %v5402_v35  ;;  %v1040_v35 = vld [vmem:[#allocation2 + $0x51] sm:$0xff] }
 0x23c   :  { %2501 = vrot.lane.b32.xlu1 %v5226_v45, %s4509_s20 }
 0x23d   :  { %2511 = vrot.lane.b32.xlu0 %v5230_v14, %s4509_s20  ;;  %v5408_v52 = vpop.permute.xlu1 %2265 }
 0x23e   :  { %7945 = vst [vmem:[#allocation108_spill] sm:$0xff] %v5408_v52  ;;  %v1034_v52 = vld [vmem:[#allocation2 + $0x19] sm:$0xff] }
 0x23f   :  { %v5410_v56 = vpop.permute.xlu0 %2267 }
 0x240   :  { %7946 = vst [vmem:[#allocation109_spill] sm:$0xff] %v5410_v56  ;;  %2513 = vrot.lane.b32.xlu1 %v5246_v39, %s4509_s20 }
 0x241   :  { %2467 = vrot.lane.b32.xlu0 %v5316_v24, %s4509_s20 }
 0x242   :  { %v5416_v22 = vpop.permute.xlu1 %2269 }
 0x243   :  { %7947 = vst [vmem:[#allocation110_spill] sm:$0xff] %v5416_v22  ;;  %v5418_v40 = vpop.permute.xlu0 %2439  ;;  %v1032_v22 = vld [vmem:[#allocation2 + $0x9] sm:$0xff] }
 0x244   :  { %2469 = vrot.lane.b32.xlu1 %v5337_v62, %s4509_s20 }
 0x245   :  { %2515 = vrot.lane.b32.xlu0 %v5341_v18, %s4509_s20  ;;  %v1033_v18 = vld [vmem:[#allocation2 + $0x11] sm:$0xff] }
 0x246   :  { %v5424_v14 = vpop.permute.xlu1 %2441 }
 0x247   :  { %v5426_v45 = vpop.permute.xlu0 %2443 }
 0x248   :  { %2517 = vrot.lane.b32.xlu1 %v5358_v28, %s4509_s20 }
 0x249   :  { %1415 = vrot.lane.b32.xlu0 %v1031_v2, %s4510_s21 }
 0x24a   :  { %v5431_v24 = vpop.permute.xlu1 %2445 }
 0x24b   :  { %v5433_v39 = vpop.permute.xlu0 %2471 }
 0x24c   :  { %1417 = vrot.lane.b32.xlu1 %v1032_v22, %s4510_s21 }
 0x24d   :  { %1419 = vrot.lane.b32.xlu0 %v1033_v18, %s4510_s21 }
 0x24e   :  { %v5437_v62 = vpop.permute.xlu1 %2473 }
 0x24f   :  { %v5439_v56 = vpop.permute.xlu0 %2475 }
 0x250   :  { %1421 = vrot.lane.b32.xlu1 %v1034_v52, %s4510_s21 }
 0x251   :  { %1431 = vrot.lane.b32.xlu0 %v1039_v17, %s4510_s21 }
 0x252   :  { %v5443_v2 = vpop.permute.xlu1 %2477 }
 0x253   :  { %7948 = vst [vmem:[#allocation111_spill] sm:$0xff] %v5443_v2  ;;  %v5445_v28 = vpop.permute.xlu0 %2487  ;;  %v1057_v2 = vld [vmem:[#allocation2 + $0xe9] sm:$0xff] }
 0x254   :  { %7949 = vst [vmem:[#allocation112_spill] sm:$0xff] %v5445_v28  ;;  %1433 = vrot.lane.b32.xlu1 %v1040_v35, %s4510_s21  ;;  %v1056_v28 = vld [vmem:[#allocation2 + $0xe1] sm:$0xff] }
 0x255   :  { %1435 = vrot.lane.b32.xlu0 %v1041_v55, %s4510_s21 }
 0x256   :  { %v5449_v18 = vpop.permute.xlu1 %2489 }
 0x257   :  { %7950 = vst [vmem:[#allocation113_spill] sm:$0xff] %v5449_v18  ;;  %v5451_v22 = vpop.permute.xlu0 %2491  ;;  %v1063_v18 = vld [vmem:[#allocation2 + $0x121] sm:$0xff] }
 0x258   :  { %7951 = vst [vmem:[#allocation114_spill] sm:$0xff] %v5451_v22  ;;  %1437 = vrot.lane.b32.xlu1 %v1042_v36, %s4510_s21  ;;  %v1058_v22 = vld [vmem:[#allocation2 + $0xf1] sm:$0xff] }
 0x259   :  { %1463 = vrot.lane.b32.xlu0 %v1055_v58, %s4510_s21 }
 0x25a   :  { %v5455_v17 = vpop.permute.xlu1 %2493 }
 0x25b   :  { %7952 = vst [vmem:[#allocation115_spill] sm:$0xff] %v5455_v17  ;;  %v5457_v52 = vpop.permute.xlu0 %2195  ;;  %v1065_v17 = vld [vmem:[#allocation2 + $0x131] sm:$0xff] }
 0x25c   :  { %7953 = vst [vmem:[#allocation116_spill] sm:$0xff] %v5457_v52  ;;  %1465 = vrot.lane.b32.xlu1 %v1056_v28, %s4510_s21  ;;  %v1064_v52 = vld [vmem:[#allocation2 + $0x129] sm:$0xff] }
 0x25d   :  { %1467 = vrot.lane.b32.xlu0 %v1057_v2, %s4510_s21 }
 0x25e   :  { %v5461_v35 = vpop.permute.xlu1 %2197 }
 0x25f   :  { %v5463_v55 = vpop.permute.xlu0 %2211 }
 0x260   :  { %7954 = vst [vmem:[#allocation117_spill] sm:$0xff] %v5463_v55  ;;  %1469 = vrot.lane.b32.xlu1 %v1058_v22, %s4510_s21  ;;  %v1066_v55 = vld [vmem:[#allocation2 + $0x139] sm:$0xff] }
 0x261   :  { %1479 = vrot.lane.b32.xlu0 %v1063_v18, %s4510_s21 }
 0x262   :  { %v5467_v36 = vpop.permute.xlu1 %2213 }
 0x263   :  { %v5469_v58 = vpop.permute.xlu0 %2223 }
 0x264   :  { %1481 = vrot.lane.b32.xlu1 %v1064_v52, %s4510_s21 }
 0x265   :  { %1483 = vrot.lane.b32.xlu0 %v1065_v17, %s4510_s21 }
 0x266   :  { %v5473_v28 = vpop.permute.xlu1 %2225 }
 0x267   :  { %v5475_v2 = vpop.permute.xlu0 %2243 }
 0x268   :  { %1485 = vrot.lane.b32.xlu1 %v1066_v55, %s4510_s21 }
 0x269   :  { %1175 = vrot.lane.b32.xlu0 %v4811_v7, %s4510_s21 }
 0x26a   :  { %v5480_v18 = vpop.permute.xlu1 %2245 }
 0x26b   :  { %v5482_v22 = vpop.permute.xlu0 %2259 }
 0x26c   :  { %1177 = vrot.lane.b32.xlu1 %v4813_v11, %s4510_s21 }
 0x26d   :  { %1179 = vrot.lane.b32.xlu0 %v4827_v15, %s4510_s21 }
 0x26e   :  { %v5488_v17 = vpop.permute.xlu1 %2261 }
 0x26f   :  { %v5490_v52 = vpop.permute.xlu0 %2271 }
 0x270   :  { %1181 = vrot.lane.b32.xlu1 %v4829_v19, %s4510_s21 }
 0x271   :  { %1191 = vrot.lane.b32.xlu0 %v4847_v27, %s4510_s21 }
 0x272   :  { %v5496_v7 = vpop.permute.xlu1 %2273 }
 0x273   :  { %v5498_v55 = vpop.permute.xlu0 %2431 }
 0x274   :  { %1193 = vrot.lane.b32.xlu1 %v4851_v31, %s4510_s21 }
 0x275   :  { %1195 = vrot.lane.b32.xlu0 %v4863_v37, %s4510_s21 }
 0x276   :  { %v5504_v11 = vpop.permute.xlu1 %2433 }
 0x277   :  { %v5506_v15 = vpop.permute.xlu0 %2447 }
 0x278   :  { %1197 = vrot.lane.b32.xlu1 %v4867_v41, %s4510_s21 }
 0x279   :  { %1223 = vrot.lane.b32.xlu0 %v4879_v47, %s4510_s21 }
 0x27a   :  { %v5512_v19 = vpop.permute.xlu1 %2449 }
 0x27b   :  { %v5514_v27 = vpop.permute.xlu0 %2455 }
 0x27c   :  { %1225 = vrot.lane.b32.xlu1 %v4883_v51, %s4510_s21 }
 0x27d   :  { %1227 = vrot.lane.b32.xlu0 %v4897_v57, %s4510_s21 }
 0x27e   :  { %v5520_v31 = vpop.permute.xlu1 %2457 }
 0x27f   :  { %v5522_v37 = vpop.permute.xlu0 %2459 }
 0x280   :  { %7955 = vst [vmem:[#allocation118_spill] sm:$0xff] %v5522_v37  ;;  %1229 = vrot.lane.b32.xlu1 %v4899_v61, %s4510_s21  ;;  %v1035_v37 = vld [vmem:[#allocation2 + $0x21] sm:$0xff] }
 0x281   :  { %1239 = vrot.lane.b32.xlu0 %v4913_v5, %s4510_s21 }
 0x282   :  { %v5528_v41 = vpop.permute.xlu1 %2461 }
 0x283   :  { %7956 = vst [vmem:[#allocation119_spill] sm:$0xff] %v5528_v41  ;;  %v5530_v47 = vpop.permute.xlu0 %2479  ;;  %v1043_v41 = vld [vmem:[#allocation2 + $0x69] sm:$0xff] }
 0x284   :  { %7957 = vst [vmem:[#allocation120_spill] sm:$0xff] %v5530_v47  ;;  %1241 = vrot.lane.b32.xlu1 %v4924_v12, %s4510_s21  ;;  %v1036_v47 = vld [vmem:[#allocation2 + $0x29] sm:$0xff] }
 0x285   :  { %1243 = vrot.lane.b32.xlu0 %v4926_v20, %s4510_s21 }
 0x286   :  { %v5536_v51 = vpop.permute.xlu1 %2481 }
 0x287   :  { %7958 = vst [vmem:[#allocation121_spill] sm:$0xff] %v5536_v51  ;;  %v5538_v57 = vpop.permute.xlu0 %2495  ;;  %v1047_v51 = vld [vmem:[#allocation2 + $0x91] sm:$0xff] }
 0x288   :  { %7959 = vst [vmem:[#allocation122_spill] sm:$0xff] %v5538_v57  ;;  %1245 = vrot.lane.b32.xlu1 %v4941_v33, %s4510_s21  ;;  %v1044_v57 = vld [vmem:[#allocation2 + $0x71] sm:$0xff] }
 0x289   :  { %1423 = vrot.lane.b32.xlu0 %v1035_v37, %s4510_s21 }
 0x28a   :  { %v5543_v61 = vpop.permute.xlu1 %2497 }
 0x28b   :  { %7960 = vst [vmem:[#allocation123_spill] sm:$0xff] %v5543_v61  ;;  %v5545_v5 = vpop.permute.xlu0 %2503  ;;  %v1049_v61 = vld [vmem:[#allocation2 + $0xa1] sm:$0xff] }
 0x28c   :  { %7961 = vst [vmem:[#allocation124_spill] sm:$0xff] %v5545_v5  ;;  %1425 = vrot.lane.b32.xlu1 %v1036_v47, %s4510_s21  ;;  %v1048_v5 = vld [vmem:[#allocation2 + $0x99] sm:$0xff] }
 0x28d   :  { %1439 = vrot.lane.b32.xlu0 %v1043_v41, %s4510_s21 }
 0x28e   :  { %v5549_v12 = vpop.permute.xlu1 %2505 }
 0x28f   :  { %7962 = vst [vmem:[#allocation125_spill] sm:$0xff] %v5549_v12  ;;  %v5551_v20 = vpop.permute.xlu0 %2507  ;;  %v1059_v12 = vld [vmem:[#allocation2 + $0xf9] sm:$0xff] }
 0x290   :  { %7963 = vst [vmem:[#allocation126_spill] sm:$0xff] %v5551_v20  ;;  %1441 = vrot.lane.b32.xlu1 %v1044_v57, %s4510_s21  ;;  %v1050_v20 = vld [vmem:[#allocation2 + $0xa9] sm:$0xff] }
 0x291   :  { %1447 = vrot.lane.b32.xlu0 %v1047_v51, %s4510_s21 }
 0x292   :  { %v5555_v33 = vpop.permute.xlu1 %2509 }
 0x293   :  { %7964 = vst [vmem:[#allocation127_spill] sm:$0xff] %v5555_v33  ;;  %v5557_v37 = vpop.permute.xlu0 %2227  ;;  %v1067_v33 = vld [vmem:[#allocation2 + $0x141] sm:$0xff] }
 0x294   :  { %7965 = vst [vmem:[#allocation128_spill] sm:$0xff] %v5557_v37  ;;  %1449 = vrot.lane.b32.xlu1 %v1048_v5, %s4510_s21  ;;  %v1060_v37 = vld [vmem:[#allocation2 + $0x101] sm:$0xff] }
 0x295   :  { %1451 = vrot.lane.b32.xlu0 %v1049_v61, %s4510_s21 }
 0x296   :  { %v5561_v41 = vpop.permute.xlu1 %2229 }
 0x297   :  { %7966 = vst [vmem:[#allocation129_spill] sm:$0xff] %v5561_v41  ;;  %v5563_v47 = vpop.permute.xlu0 %2275  ;;  %v1071_v41 = vld [vmem:[#allocation2 + $0x169] sm:$0xff] }
 0x298   :  { %7967 = vst [vmem:[#allocation130_spill] sm:$0xff] %v5563_v47  ;;  %1453 = vrot.lane.b32.xlu1 %v1050_v20, %s4510_s21  ;;  %v1068_v47 = vld [vmem:[#allocation2 + $0x149] sm:$0xff] }
 0x299   :  { %1471 = vrot.lane.b32.xlu0 %v1059_v12, %s4510_s21 }
 0x29a   :  { %v5567_v51 = vpop.permute.xlu1 %2277 }
 0x29b   :  { %7968 = vst [vmem:[#allocation131_spill] sm:$0xff] %v5567_v51  ;;  %v5569_v57 = vpop.permute.xlu0 %2435  ;;  %v1072_v51 = vld [vmem:[#allocation2 + $0x171] sm:$0xff] }
 0x29c   :  { %7969 = vst [vmem:[#allocation132_spill] sm:$0xff] %v5569_v57  ;;  %1473 = vrot.lane.b32.xlu1 %v1060_v37, %s4510_s21  ;;  %v1073_v57 = vld [vmem:[#allocation2 + $0x179] sm:$0xff] }
 0x29d   :  { %1487 = vrot.lane.b32.xlu0 %v1067_v33, %s4510_s21 }
 0x29e   :  { %v5573_v61 = vpop.permute.xlu1 %2437 }
 0x29f   :  { %v5575_v5 = vpop.permute.xlu0 %2451 }
 0x2a0   :  { %7970 = vst [vmem:[#allocation133_spill] sm:$0xff] %v5575_v5  ;;  %1489 = vrot.lane.b32.xlu1 %v1068_v47, %s4510_s21  ;;  %v1074_v5 = vld [vmem:[#allocation2 + $0x181] sm:$0xff] }
 0x2a1   :  { %1495 = vrot.lane.b32.xlu0 %v1071_v41, %s4510_s21 }
 0x2a2   :  { %v5579_v12 = vpop.permute.xlu1 %2453 }
 0x2a3   :  { %v5581_v20 = vpop.permute.xlu0 %2463 }
 0x2a4   :  { %7971 = vst [vmem:[#allocation134_spill] sm:$0xff] %v5581_v20  ;;  %1497 = vrot.lane.b32.xlu1 %v1072_v51, %s4510_s21 }
 0x2a5   :  { %1499 = vrot.lane.b32.xlu0 %v1073_v57, %s4510_s21 }
 0x2a6   :  { %v5585_v33 = vpop.permute.xlu1 %2465 }
 0x2a7   :  { %7972 = vst [vmem:[#allocation135_spill] sm:$0xff] %v5585_v33  ;;  %v5587_v37 = vpop.permute.xlu0 %2483 }
 0x2a8   :  { %7973 = vst [vmem:[#allocation136_spill] sm:$0xff] %v5587_v37  ;;  %1501 = vrot.lane.b32.xlu1 %v1074_v5, %s4510_s21 }
 0x2a9   :  { %1183 = vrot.lane.b32.xlu0 %v4939_v29, %s4510_s21 }
 0x2aa   :  { %v5592_v41 = vpop.permute.xlu1 %2485 }
 0x2ab   :  { %7974 = vst [vmem:[#allocation137_spill] sm:$0xff] %v5592_v41  ;;  %v5594_v47 = vpop.permute.xlu0 %2499 }
 0x2ac   :  { %7975 = vst [vmem:[#allocation138_spill] sm:$0xff] %v5594_v47  ;;  %1185 = vrot.lane.b32.xlu1 %v4957_v50, %s4510_s21  ;;  %v8117_v47 = vld [vmem:[#allocation19_spill] sm:$0xff] }
 0x2ad   :  { %1199 = vrot.lane.b32.xlu0 %v4955_v44, %s4510_s21 }
 0x2ae   :  { %v5600_v51 = vpop.permute.xlu1 %2501 }
 0x2af   :  { %7976 = vst [vmem:[#allocation139_spill] sm:$0xff] %v5600_v51  ;;  %v5602_v57 = vpop.permute.xlu0 %2511 }
 0x2b0   :  { %7977 = vst [vmem:[#allocation140_spill] sm:$0xff] %v5602_v57  ;;  %1201 = vrot.lane.b32.xlu1 %v4971_v0, %s4510_s21  ;;  %v8115_v57 = vld [vmem:[#allocation18_spill] sm:$0xff] }
 0x2b1   :  { %1207 = vrot.lane.b32.xlu0 %v4980_v8, %s4510_s21 }
 0x2b2   :  { %v5608_v29 = vpop.permute.xlu1 %2513 }
 0x2b3   :  { %7978 = vst [vmem:[#allocation141_spill] sm:$0xff] %v5608_v29  ;;  %v5610_v5 = vpop.permute.xlu0 %2467 }
 0x2b4   :  { %7979 = vst [vmem:[#allocation142_spill] sm:$0xff] %v5610_v5  ;;  %1209 = vrot.lane.b32.xlu1 %v4984_v23, %s4510_s21  ;;  %v7984_v5 = vld [vmem:[#allocation30_spill] sm:$0xff]  ;;  %v7985_v23 = vld [vmem:[#allocation33_spill] sm:$0xff] }
 0x2b5   :  { %1211 = vrot.lane.b32.xlu0 %v4997_v38, %s4510_s21 }
 0x2b6   :  { %v5616_v44 = vpop.permute.xlu1 %2469 }
 0x2b7   :  { %7980 = vst [vmem:[#allocation143_spill] sm:$0xff] %v5616_v44  ;;  %v5618_v50 = vpop.permute.xlu0 %2515 }
 0x2b8   :  { %7981 = vst [vmem:[#allocation144_spill] sm:$0xff] %v5618_v50  ;;  %1213 = vrot.lane.b32.xlu1 %v4999_v49, %s4510_s21  ;;  %v7988_v50 = vld [vmem:[#allocation34_spill] sm:$0xff]  ;;  %v7989_v49 = vld [vmem:[#allocation37_spill] sm:$0xff] }
 0x2b9   :  { %1231 = vrot.lane.b32.xlu0 %v5013_v63, %s4510_s21 }
 0x2ba   :  { %v5624_v0 = vpop.permute.xlu1 %2517 }
 0x2bb   :  { %7982 = vst [vmem:[#allocation145_spill] sm:$0xff] %v5624_v0  ;;  %v5626_v8 = vpop.permute.xlu0 %1415 }
 0x2bc   :  { %7983 = vst [vmem:[#allocation146_spill] sm:$0xff] %v5626_v8  ;;  %1233 = vrot.lane.b32.xlu1 %v7984_v5, %s4510_s21  ;;  %v7992_v5 = vld [vmem:[#allocation41_spill] sm:$0xff]  ;;  %v1045_v8 = vld [vmem:[#allocation2 + $0x79] sm:$0xff] }
 0x2bd   :  { %1247 = vrot.lane.b32.xlu0 %v7985_v23, %s4510_s21 }
 0x2be   :  { %v5632_v38 = vpop.permute.xlu1 %1417 }
 0x2bf   :  { %7986 = vst [vmem:[#allocation30_spill] sm:$0xff] %v5632_v38  ;;  %v5634_v44 = vpop.permute.xlu0 %1419 }
 0x2c0   :  { %7987 = vst [vmem:[#allocation33_spill] sm:$0xff] %v5634_v44  ;;  %1249 = vrot.lane.b32.xlu1 %v7988_v50, %s4510_s21  ;;  %v1037_v44 = vld [vmem:[#allocation2 + $0x31] sm:$0xff]  ;;  %v7995_v50 = vld [vmem:[#allocation45_spill] sm:$0xff] }
 0x2c1   :  { %1255 = vrot.lane.b32.xlu0 %v7989_v49, %s4510_s21 }
 0x2c2   :  { %v5640_v63 = vpop.permute.xlu1 %1421 }
 0x2c3   :  { %7990 = vst [vmem:[#allocation34_spill] sm:$0xff] %v5640_v63  ;;  %v5642_v0 = vpop.permute.xlu0 %1431 }
 0x2c4   :  { %7991 = vst [vmem:[#allocation37_spill] sm:$0xff] %v5642_v0  ;;  %1257 = vrot.lane.b32.xlu1 %v5058_v48, %s4510_s21  ;;  %v1038_v0 = vld [vmem:[#allocation2 + $0x39] sm:$0xff] }
 0x2c5   :  { %1259 = vrot.lane.b32.xlu0 %v7992_v5, %s4510_s21 }
 0x2c6   :  { %v5648_v23 = vpop.permute.xlu1 %1433 }
 0x2c7   :  { %7993 = vst [vmem:[#allocation41_spill] sm:$0xff] %v5648_v23  ;;  %v5650_v38 = vpop.permute.xlu0 %1435  ;;  %v1051_v23 = vld [vmem:[#allocation2 + $0xb1] sm:$0xff] }
 0x2c8   :  { %7994 = vst [vmem:[#allocation147_spill] sm:$0xff] %v5650_v38  ;;  %1261 = vrot.lane.b32.xlu1 %v7995_v50, %s4510_s21  ;;  %v1046_v38 = vld [vmem:[#allocation2 + $0x81] sm:$0xff] }
 0x2c9   :  { %1427 = vrot.lane.b32.xlu0 %v1037_v44, %s4510_s21 }
 0x2ca   :  { %v5655_v49 = vpop.permute.xlu1 %1437 }
 0x2cb   :  { %7996 = vst [vmem:[#allocation45_spill] sm:$0xff] %v5655_v49  ;;  %v5657_v63 = vpop.permute.xlu0 %1463  ;;  %v1061_v49 = vld [vmem:[#allocation2 + $0x109] sm:$0xff] }
 0x2cc   :  { %7997 = vst [vmem:[#allocation148_spill] sm:$0xff] %v5657_v63  ;;  %1429 = vrot.lane.b32.xlu1 %v1038_v0, %s4510_s21  ;;  %v1052_v63 = vld [vmem:[#allocation2 + $0xb9] sm:$0xff] }
 0x2cd   :  { %1443 = vrot.lane.b32.xlu0 %v1045_v8, %s4510_s21 }
 0x2ce   :  { %v5661_v48 = vpop.permute.xlu1 %1465 }
 0x2cf   :  { %7998 = vst [vmem:[#allocation149_spill] sm:$0xff] %v5661_v48  ;;  %v5663_v5 = vpop.permute.xlu0 %1467  ;;  %v1069_v48 = vld [vmem:[#allocation2 + $0x151] sm:$0xff] }
 0x2d0   :  { %7999 = vst [vmem:[#allocation150_spill] sm:$0xff] %v5663_v5  ;;  %1445 = vrot.lane.b32.xlu1 %v1046_v38, %s4510_s21  ;;  %v1062_v5 = vld [vmem:[#allocation2 + $0x111] sm:$0xff] }
 0x2d1   :  { %1455 = vrot.lane.b32.xlu0 %v1051_v23, %s4510_s21 }
 0x2d2   :  { %v5667_v44 = vpop.permute.xlu1 %1469 }
 0x2d3   :  { %8000 = vst [vmem:[#allocation151_spill] sm:$0xff] %v5667_v44  ;;  %v5669_v50 = vpop.permute.xlu0 %1479  ;;  %v1075_v44 = vld [vmem:[#allocation2 + $0x189] sm:$0xff] }
 0x2d4   :  { %8001 = vst [vmem:[#allocation152_spill] sm:$0xff] %v5669_v50  ;;  %1457 = vrot.lane.b32.xlu1 %v1052_v63, %s4510_s21  ;;  %v1070_v50 = vld [vmem:[#allocation2 + $0x159] sm:$0xff] }
 0x2d5   :  { %1475 = vrot.lane.b32.xlu0 %v1061_v49, %s4510_s21 }
 0x2d6   :  { %v5673_v0 = vpop.permute.xlu1 %1481 }
 0x2d7   :  { %8002 = vst [vmem:[#allocation153_spill] sm:$0xff] %v5673_v0  ;;  %v5675_v8 = vpop.permute.xlu0 %1483  ;;  %v8113_v0 = vld [vmem:[#allocation16_spill] sm:$0xff] }
 0x2d8   :  { %8003 = vst [vmem:[#allocation154_spill] sm:$0xff] %v5675_v8  ;;  %1477 = vrot.lane.b32.xlu1 %v1062_v5, %s4510_s21  ;;  %v1076_v8 = vld [vmem:[#allocation2 + $0x191] sm:$0xff]  ;;  %v4310_v5 = vld [vmem:[#allocation2 + $0x2] sm:$0xff] }
 0x2d9   :  { %1491 = vrot.lane.b32.xlu0 %v1069_v48, %s4510_s21 }
 0x2da   :  { %v5679_v38 = vpop.permute.xlu1 %1485 }
 0x2db   :  { %8004 = vst [vmem:[#allocation155_spill] sm:$0xff] %v5679_v38  ;;  %v5681_v23 = vpop.permute.xlu0 %1175 }
 0x2dc   :  { %8005 = vst [vmem:[#allocation156_spill] sm:$0xff] %v5681_v23  ;;  %1493 = vrot.lane.b32.xlu1 %v1070_v50, %s4510_s21  ;;  %v4311_v23 = vld [vmem:[#allocation2 + $0xa] sm:$0xff]  ;;  %v4312_v50 = vld [vmem:[#allocation2 + $0x12] sm:$0xff] }
 0x2dd   :  { %1503 = vrot.lane.b32.xlu0 %v1075_v44, %s4510_s21 }
 0x2de   :  { %v5685_v63 = vpop.permute.xlu1 %1177 }
 0x2df   :  { %8006 = vst [vmem:[#allocation157_spill] sm:$0xff] %v5685_v63  ;;  %v5687_v49 = vpop.permute.xlu0 %1179 }
 0x2e0   :  { %8007 = vst [vmem:[#allocation158_spill] sm:$0xff] %v5687_v49  ;;  %1505 = vrot.lane.b32.xlu1 %v1076_v8, %s4510_s21  ;;  %v4313_v49 = vld [vmem:[#allocation2 + $0x1a] sm:$0xff]  ;;  %v4314_v8 = vld [vmem:[#allocation2 + $0x4a] sm:$0xff] }
 0x2e1   :  { %1751 = vrot.lane.b32.xlu0 %v4310_v5, %s4510_s21 }
 0x2e2   :  { %v5691_v48 = vpop.permute.xlu1 %1181 }
 0x2e3   :  { %8008 = vst [vmem:[#allocation159_spill] sm:$0xff] %v5691_v48  ;;  %v5693_v38 = vpop.permute.xlu0 %1191 }
 0x2e4   :  { %8009 = vst [vmem:[#allocation160_spill] sm:$0xff] %v5693_v38  ;;  %1753 = vrot.lane.b32.xlu1 %v4311_v23, %s4510_s21  ;;  %v4315_v38 = vld [vmem:[#allocation2 + $0x52] sm:$0xff]  ;;  %v4316_v23 = vld [vmem:[#allocation2 + $0x5a] sm:$0xff] }
 0x2e5   :  { %1755 = vrot.lane.b32.xlu0 %v4312_v50, %s4510_s21 }
 0x2e6   :  { %v5697_v44 = vpop.permute.xlu1 %1193 }
 0x2e7   :  { %8010 = vst [vmem:[#allocation161_spill] sm:$0xff] %v5697_v44  ;;  %v5699_v63 = vpop.permute.xlu0 %1195 }
 0x2e8   :  { %8011 = vst [vmem:[#allocation162_spill] sm:$0xff] %v5699_v63  ;;  %1757 = vrot.lane.b32.xlu1 %v4313_v49, %s4510_s21  ;;  %v4317_v63 = vld [vmem:[#allocation2 + $0x62] sm:$0xff]  ;;  %v4318_v49 = vld [vmem:[#allocation2 + $0xda] sm:$0xff] }
 0x2e9   :  { %1767 = vrot.lane.b32.xlu0 %v4314_v8, %s4510_s21 }
 0x2ea   :  { %v5703_v5 = vpop.permute.xlu1 %1197 }
 0x2eb   :  { %8012 = vst [vmem:[#allocation163_spill] sm:$0xff] %v5703_v5  ;;  %v5705_v48 = vpop.permute.xlu0 %1223 }
 0x2ec   :  { %8013 = vst [vmem:[#allocation164_spill] sm:$0xff] %v5705_v48  ;;  %1769 = vrot.lane.b32.xlu1 %v4315_v38, %s4510_s21  ;;  %v4319_v48 = vld [vmem:[#allocation2 + $0xe2] sm:$0xff]  ;;  %v4320_v38 = vld [vmem:[#allocation2 + $0xea] sm:$0xff] }
 0x2ed   :  { %1771 = vrot.lane.b32.xlu0 %v4316_v23, %s4510_s21 }
 0x2ee   :  { %v5709_v50 = vpop.permute.xlu1 %1225 }
 0x2ef   :  { %8014 = vst [vmem:[#allocation165_spill] sm:$0xff] %v5709_v50  ;;  %v5711_v44 = vpop.permute.xlu0 %1227 }
 0x2f0   :  { %8015 = vst [vmem:[#allocation166_spill] sm:$0xff] %v5711_v44  ;;  %1773 = vrot.lane.b32.xlu1 %v4317_v63, %s4510_s21  ;;  %v4321_v44 = vld [vmem:[#allocation2 + $0xf2] sm:$0xff]  ;;  %v4322_v63 = vld [vmem:[#allocation2 + $0x122] sm:$0xff] }
 0x2f1   :  { %1799 = vrot.lane.b32.xlu0 %v4318_v49, %s4510_s21 }
 0x2f2   :  { %v5715_v8 = vpop.permute.xlu1 %1229 }
 0x2f3   :  { %8016 = vst [vmem:[#allocation167_spill] sm:$0xff] %v5715_v8  ;;  %v5717_v5 = vpop.permute.xlu0 %1239 }
 0x2f4   :  { %8017 = vst [vmem:[#allocation168_spill] sm:$0xff] %v5717_v5  ;;  %1801 = vrot.lane.b32.xlu1 %v4319_v48, %s4510_s21  ;;  %v4323_v5 = vld [vmem:[#allocation2 + $0x12a] sm:$0xff]  ;;  %v4324_v48 = vld [vmem:[#allocation2 + $0x132] sm:$0xff] }
 0x2f5   :  { %1803 = vrot.lane.b32.xlu0 %v4320_v38, %s4510_s21 }
 0x2f6   :  { %v5721_v23 = vpop.permute.xlu1 %1241 }
 0x2f7   :  { %8018 = vst [vmem:[#allocation169_spill] sm:$0xff] %v5721_v23  ;;  %v5723_v50 = vpop.permute.xlu0 %1243 }
 0x2f8   :  { %8019 = vst [vmem:[#allocation170_spill] sm:$0xff] %v5723_v50  ;;  %1805 = vrot.lane.b32.xlu1 %v4321_v44, %s4510_s21  ;;  %v4325_v50 = vld [vmem:[#allocation2 + $0x13a] sm:$0xff]  ;;  %v8024_v44 = vld [vmem:[#allocation49_spill] sm:$0xff] }
 0x2f9   :  { %1815 = vrot.lane.b32.xlu0 %v4322_v63, %s4510_s21 }
 0x2fa   :  { %v5727_v49 = vpop.permute.xlu1 %1245 }
 0x2fb   :  { %8020 = vst [vmem:[#allocation171_spill] sm:$0xff] %v5727_v49  ;;  %v5729_v8 = vpop.permute.xlu0 %1423 }
 0x2fc   :  { %8021 = vst [vmem:[#allocation172_spill] sm:$0xff] %v5729_v8  ;;  %1817 = vrot.lane.b32.xlu1 %v4323_v5, %s4510_s21  ;;  %v8027_v8 = vld [vmem:[#allocation53_spill] sm:$0xff]  ;;  %v8028_v5 = vld [vmem:[#allocation54_spill] sm:$0xff] }
 0x2fd   :  { %1819 = vrot.lane.b32.xlu0 %v4324_v48, %s4510_s21 }
 0x2fe   :  { %v5733_v38 = vpop.permute.xlu1 %1425 }
 0x2ff   :  { %8022 = vst [vmem:[#allocation173_spill] sm:$0xff] %v5733_v38  ;;  %v5735_v23 = vpop.permute.xlu0 %1439 }
 0x300   :  { %8023 = vst [vmem:[#allocation174_spill] sm:$0xff] %v5735_v23  ;;  %1821 = vrot.lane.b32.xlu1 %v4325_v50, %s4510_s21  ;;  %v8031_v23 = vld [vmem:[#allocation59_spill] sm:$0xff]  ;;  %v8032_v50 = vld [vmem:[#allocation60_spill] sm:$0xff] }
 0x301   :  { %1187 = vrot.lane.b32.xlu0 %v8024_v44, %s4510_s21 }
 0x302   :  { %v5740_v63 = vpop.permute.xlu1 %1441 }
 0x303   :  { %8025 = vst [vmem:[#allocation49_spill] sm:$0xff] %v5740_v63  ;;  %v5742_v49 = vpop.permute.xlu0 %1447 }
 0x304   :  { %8026 = vst [vmem:[#allocation175_spill] sm:$0xff] %v5742_v49  ;;  %1189 = vrot.lane.b32.xlu1 %v8027_v8, %s4510_s21  ;;  %v8035_v49 = vld [vmem:[#allocation65_spill] sm:$0xff]  ;;  %v8036_v8 = vld [vmem:[#allocation66_spill] sm:$0xff] }
 0x305   :  { %1203 = vrot.lane.b32.xlu0 %v8028_v5, %s4510_s21 }
 0x306   :  { %v5748_v48 = vpop.permute.xlu1 %1449 }
 0x307   :  { %8029 = vst [vmem:[#allocation53_spill] sm:$0xff] %v5748_v48  ;;  %v5750_v38 = vpop.permute.xlu0 %1451 }
 0x308   :  { %8030 = vst [vmem:[#allocation54_spill] sm:$0xff] %v5750_v38  ;;  %1205 = vrot.lane.b32.xlu1 %v8031_v23, %s4510_s21  ;;  %v8039_v38 = vld [vmem:[#allocation71_spill] sm:$0xff]  ;;  %v8040_v23 = vld [vmem:[#allocation72_spill] sm:$0xff] }
 0x309   :  { %1215 = vrot.lane.b32.xlu0 %v8032_v50, %s4510_s21 }
 0x30a   :  { %v5756_v44 = vpop.permute.xlu1 %1453 }
 0x30b   :  { %8033 = vst [vmem:[#allocation59_spill] sm:$0xff] %v5756_v44  ;;  %v5758_v63 = vpop.permute.xlu0 %1471 }
 0x30c   :  { %8034 = vst [vmem:[#allocation60_spill] sm:$0xff] %v5758_v63  ;;  %1217 = vrot.lane.b32.xlu1 %v8035_v49, %s4510_s21  ;;  %v8043_v49 = vld [vmem:[#allocation77_spill] sm:$0xff] }
 0x30d   :  { %1235 = vrot.lane.b32.xlu0 %v8036_v8, %s4510_s21  ;;  %v8111_v63 = vld [vmem:[#allocation17_spill] sm:$0xff] }
 0x30e   :  { %v5764_v5 = vpop.permute.xlu1 %1473 }
 0x30f   :  { %8037 = vst [vmem:[#allocation65_spill] sm:$0xff] %v5764_v5  ;;  %v5766_v48 = vpop.permute.xlu0 %1487 }
 0x310   :  { %8038 = vst [vmem:[#allocation66_spill] sm:$0xff] %v5766_v48  ;;  %1237 = vrot.lane.b32.xlu1 %v8039_v38, %s4510_s21  ;;  %v1053_v48 = vld [vmem:[#allocation2 + $0xc1] sm:$0xff] }
 0x311   :  { %1251 = vrot.lane.b32.xlu0 %v8040_v23, %s4510_s21 }
 0x312   :  { %v5772_v50 = vpop.permute.xlu1 %1489 }
 0x313   :  { %8041 = vst [vmem:[#allocation71_spill] sm:$0xff] %v5772_v50  ;;  %v5774_v44 = vpop.permute.xlu0 %1495  ;;  %v1077_v50 = vld [vmem:[#allocation2 + $0x199] sm:$0xff] }
 0x314   :  { %8042 = vst [vmem:[#allocation72_spill] sm:$0xff] %v5774_v44  ;;  %1253 = vrot.lane.b32.xlu1 %v5218_v26, %s4510_s21  ;;  %v1054_v44 = vld [vmem:[#allocation2 + $0xc9] sm:$0xff] }
 0x315   :  { %1263 = vrot.lane.b32.xlu0 %v8043_v49, %s4510_s21 }
 0x316   :  { %v5780_v8 = vpop.permute.xlu1 %1497 }
 0x317   :  { %8044 = vst [vmem:[#allocation77_spill] sm:$0xff] %v5780_v8  ;;  %v5782_v5 = vpop.permute.xlu0 %1499 }
 0x318   :  { %8045 = vst [vmem:[#allocation176_spill] sm:$0xff] %v5782_v5  ;;  %1265 = vrot.lane.b32.xlu1 %v5240_v16, %s4510_s21  ;;  %v1078_v5 = vld [vmem:[#allocation2 + $0x1a1] sm:$0xff] }
 0x319   :  { %1459 = vrot.lane.b32.xlu0 %v1053_v48, %s4510_s21  ;;  %v4326_v16 = vld [vmem:[#allocation2 + $0x22] sm:$0xff] }
 0x31a   :  { %v5787_v38 = vpop.permute.xlu1 %1501 }
 0x31b   :  { %8046 = vst [vmem:[#allocation177_spill] sm:$0xff] %v5787_v38  ;;  %v5789_v23 = vpop.permute.xlu0 %1183 }
 0x31c   :  { %8047 = vst [vmem:[#allocation178_spill] sm:$0xff] %v5789_v23  ;;  %1461 = vrot.lane.b32.xlu1 %v1054_v44, %s4510_s21  ;;  %v4327_v23 = vld [vmem:[#allocation2 + $0x2a] sm:$0xff] }
 0x31d   :  { %1507 = vrot.lane.b32.xlu0 %v1077_v50, %s4510_s21  ;;  %v4328_v44 = vld [vmem:[#allocation2 + $0x6a] sm:$0xff] }
 0x31e   :  { %v5793_v26 = vpop.permute.xlu1 %1185 }
 0x31f   :  { %8048 = vst [vmem:[#allocation179_spill] sm:$0xff] %v5793_v26  ;;  %v5795_v49 = vpop.permute.xlu0 %1199 }
 0x320   :  { %8049 = vst [vmem:[#allocation180_spill] sm:$0xff] %v5795_v49  ;;  %1509 = vrot.lane.b32.xlu1 %v1078_v5, %s4510_s21  ;;  %v4329_v49 = vld [vmem:[#allocation2 + $0x72] sm:$0xff] }
 0x321   :  { %1759 = vrot.lane.b32.xlu0 %v4326_v16, %s4510_s21  ;;  %v4330_v5 = vld [vmem:[#allocation2 + $0x92] sm:$0xff] }
 0x322   :  { %v5799_v48 = vpop.permute.xlu1 %1201 }
 0x323   :  { %8050 = vst [vmem:[#allocation181_spill] sm:$0xff] %v5799_v48  ;;  %v5801_v38 = vpop.permute.xlu0 %1207 }
 0x324   :  { %8051 = vst [vmem:[#allocation182_spill] sm:$0xff] %v5801_v38  ;;  %1761 = vrot.lane.b32.xlu1 %v4327_v23, %s4510_s21  ;;  %v4331_v38 = vld [vmem:[#allocation2 + $0x9a] sm:$0xff]  ;;  %v4332_v23 = vld [vmem:[#allocation2 + $0xa2] sm:$0xff] }
 0x325   :  { %1775 = vrot.lane.b32.xlu0 %v4328_v44, %s4510_s21 }
 0x326   :  { %v5805_v50 = vpop.permute.xlu1 %1209 }
 0x327   :  { %8052 = vst [vmem:[#allocation183_spill] sm:$0xff] %v5805_v50  ;;  %v5807_v26 = vpop.permute.xlu0 %1211 }
 0x328   :  { %8053 = vst [vmem:[#allocation184_spill] sm:$0xff] %v5807_v26  ;;  %1777 = vrot.lane.b32.xlu1 %v4329_v49, %s4510_s21  ;;  %v4333_v26 = vld [vmem:[#allocation2 + $0xaa] sm:$0xff]  ;;  %v4334_v49 = vld [vmem:[#allocation2 + $0xfa] sm:$0xff] }
 0x329   :  { %1783 = vrot.lane.b32.xlu0 %v4330_v5, %s4510_s21 }
 0x32a   :  { %v5811_v16 = vpop.permute.xlu1 %1213 }
 0x32b   :  { %8054 = vst [vmem:[#allocation185_spill] sm:$0xff] %v5811_v16  ;;  %v5813_v48 = vpop.permute.xlu0 %1231 }
 0x32c   :  { %8055 = vst [vmem:[#allocation186_spill] sm:$0xff] %v5813_v48  ;;  %1785 = vrot.lane.b32.xlu1 %v4331_v38, %s4510_s21  ;;  %v4335_v48 = vld [vmem:[#allocation2 + $0x102] sm:$0xff] }
 0x32d   :  { %1787 = vrot.lane.b32.xlu0 %v4332_v23, %s4510_s21  ;;  %v4336_v38 = vld [vmem:[#allocation2 + $0x142] sm:$0xff] }
 0x32e   :  { %v5817_v44 = vpop.permute.xlu1 %1233 }
 0x32f   :  { %8056 = vst [vmem:[#allocation187_spill] sm:$0xff] %v5817_v44  ;;  %v5819_v50 = vpop.permute.xlu0 %1247 }
 0x330   :  { %8057 = vst [vmem:[#allocation188_spill] sm:$0xff] %v5819_v50  ;;  %1789 = vrot.lane.b32.xlu1 %v4333_v26, %s4510_s21  ;;  %v4337_v50 = vld [vmem:[#allocation2 + $0x14a] sm:$0xff] }
 0x331   :  { %1807 = vrot.lane.b32.xlu0 %v4334_v49, %s4510_s21  ;;  %v8062_v26 = vld [vmem:[#allocation38_spill] sm:$0xff] }
 0x332   :  { %v5823_v5 = vpop.permute.xlu1 %1249 }
 0x333   :  { %8058 = vst [vmem:[#allocation189_spill] sm:$0xff] %v5823_v5  ;;  %v5825_v16 = vpop.permute.xlu0 %1255 }
 0x334   :  { %8059 = vst [vmem:[#allocation190_spill] sm:$0xff] %v5825_v16  ;;  %1809 = vrot.lane.b32.xlu1 %v4335_v48, %s4510_s21  ;;  %v8065_v16 = vld [vmem:[#allocation40_spill] sm:$0xff]  ;;  %v8066_v48 = vld [vmem:[#allocation42_spill] sm:$0xff] }
 0x335   :  { %1823 = vrot.lane.b32.xlu0 %v4336_v38, %s4510_s21 }
 0x336   :  { %v5829_v23 = vpop.permute.xlu1 %1257 }
 0x337   :  { %8060 = vst [vmem:[#allocation191_spill] sm:$0xff] %v5829_v23  ;;  %v5831_v44 = vpop.permute.xlu0 %1259 }
 0x338   :  { %8061 = vst [vmem:[#allocation192_spill] sm:$0xff] %v5831_v44  ;;  %1825 = vrot.lane.b32.xlu1 %v4337_v50, %s4510_s21  ;;  %v8069_v44 = vld [vmem:[#allocation46_spill] sm:$0xff] }
 0x339   :  { %1831 = vrot.lane.b32.xlu0 %v8062_v26, %s4510_s21 }
 0x33a   :  { %v5836_v49 = vpop.permute.xlu1 %1261 }
 0x33b   :  { %8063 = vst [vmem:[#allocation38_spill] sm:$0xff] %v5836_v49  ;;  %v5838_v5 = vpop.permute.xlu0 %1427  ;;  %v8090_v49 = vld [vmem:[#allocation82_spill] sm:$0xff] }
 0x33c   :  { %8064 = vst [vmem:[#allocation193_spill] sm:$0xff] %v5838_v5  ;;  %1833 = vrot.lane.b32.xlu1 %v8065_v16, %s4510_s21 }
 0x33d   :  { %1835 = vrot.lane.b32.xlu0 %v8066_v48, %s4510_s21 }
 0x33e   :  { %v5844_v38 = vpop.permute.xlu1 %1429 }
 0x33f   :  { %8067 = vst [vmem:[#allocation40_spill] sm:$0xff] %v5844_v38  ;;  %v5846_v23 = vpop.permute.xlu0 %1443  ;;  %v8083_v38 = vld [vmem:[#allocation9_spill] sm:$0xff] }
 0x340   :  { %8068 = vst [vmem:[#allocation42_spill] sm:$0xff] %v5846_v23  ;;  %1837 = vrot.lane.b32.xlu1 %v8069_v44, %s4510_s21  ;;  %v8074_v44 = vld [vmem:[#allocation48_spill] sm:$0xff]  ;;  %v8082_v23 = vld [vmem:[#allocation6_spill] sm:$0xff] }
 0x341   :  { %1219 = vrot.lane.b32.xlu0 %v5302_v6, %s4510_s21 }
 0x342   :  { %v5852_v50 = vpop.permute.xlu1 %1445 }
 0x343   :  { %8070 = vst [vmem:[#allocation46_spill] sm:$0xff] %v5852_v50  ;;  %v5854_v26 = vpop.permute.xlu0 %1455 }
 0x344   :  { %8071 = vst [vmem:[#allocation194_spill] sm:$0xff] %v5854_v26  ;;  %1221 = vrot.lane.b32.xlu1 %v5318_v54, %s4510_s21  ;;  %v8077_v26 = vld [vmem:[#allocation51_spill] sm:$0xff]  ;;  %v8078_v54 = vld [vmem:[#allocation52_spill] sm:$0xff] }
 0x345   :  { %1267 = vrot.lane.b32.xlu0 %v5322_v30, %s4510_s21 }
 0x346   :  { %v5860_v16 = vpop.permute.xlu1 %1457 }
 0x347   :  { %8072 = vst [vmem:[#allocation195_spill] sm:$0xff] %v5860_v16  ;;  %v5862_v48 = vpop.permute.xlu0 %1475 }
 0x348   :  { %8073 = vst [vmem:[#allocation196_spill] sm:$0xff] %v5862_v48  ;;  %1269 = vrot.lane.b32.xlu1 %v5343_v59, %s4510_s21  ;;  %v8081_v48 = vld [vmem:[#allocation7_spill] sm:$0xff] }
 0x349   :  { %1763 = vrot.lane.b32.xlu0 %v8074_v44, %s4510_s21  ;;  %v2328_v59 = vadd.f32 %v5255_v1, %v8081_v48  ;;  %v2327_v44 = vadd.f32 %v5260_v3, %v8082_v23  ;;  %v8089_v1 = vld [vmem:[#allocation81_spill] sm:$0xff] }
 0x34a   :  { %v5868_v6 = vpop.permute.xlu1 %1477 }
 0x34b   :  { %8075 = vst [vmem:[#allocation48_spill] sm:$0xff] %v5868_v6  ;;  %v5870_v50 = vpop.permute.xlu0 %1491  ;;  %v2330_v6 = vadd.f32 %v5262_v46, %v8083_v38  ;;  %v2568_v48 = vadd.f32 %v8089_v1, %v2328_v59  ;;  %v2567_v3 = vadd.f32 %v8090_v49, %v2327_v44  ;;  %v8092_v38 = vld [vmem:[#allocation64_spill] sm:$0xff]  ;;  %v8095_v49 = vld [vmem:[#allocation69_spill] sm:$0xff]  ;;  %v8099_v1 = vld [vmem:[#allocation11_spill] sm:$0xff] }
 0x34c   :  { %8076 = vst [vmem:[#allocation197_spill] sm:$0xff] %v5870_v50  ;;  %1765 = vrot.lane.b32.xlu1 %v8077_v26, %s4510_s21  ;;  %v8084_v50 = vld [vmem:[#allocation8_spill] sm:$0xff]  ;;  %v8085_v26 = vld [vmem:[#allocation57_spill] sm:$0xff] }
 0x34d   :  { %1779 = vrot.lane.b32.xlu0 %v8078_v54, %s4510_s21  ;;  %v2329_v5 = vadd.f32 %v5268_v21, %v8084_v50  ;;  %v8086_v54 = vld [vmem:[#allocation58_spill] sm:$0xff]  ;;  %v2570_v23 = vadd.f32 %v5248_v60, %v2330_v6  ;;  %v8091_v21 = vld [vmem:[#allocation63_spill] sm:$0xff] }
 0x34e   :  { %v5876_v30 = vpop.permute.xlu1 %1493  ;;  %v8096_v60 = vld [vmem:[#allocation70_spill] sm:$0xff] }
 0x34f   :  { %8079 = vst [vmem:[#allocation51_spill] sm:$0xff] %v5876_v30  ;;  %v5878_v16 = vpop.permute.xlu0 %1503  ;;  %v2569_v46 = vadd.f32 %v5252_v13, %v2329_v5 }
 0x350   :  { %8080 = vst [vmem:[#allocation52_spill] sm:$0xff] %v5878_v16  ;;  %1781 = vrot.lane.b32.xlu1 %v8085_v26, %s4510_s21 }
 0x351   :  { %1791 = vrot.lane.b32.xlu0 %v8086_v54, %s4510_s21  ;;  %v2616_v54 = vmul.f32 0.125, %v2568_v48  ;;  %v2617_v59 = vmul.f32 0.125, %v2569_v46  ;;  %v2336_v48 = vadd.f32 %v5270_v10, %v8099_v1  ;;  %v8100_v46 = vld [vmem:[#allocation10_spill] sm:$0xff]  ;;  %v8107_v10 = vld [vmem:[#allocation15_spill] sm:$0xff] }
 0x352   :  { %v5892_v30 = vpop.permute.xlu1 %1505 }
 0x353   :  { %8087 = vst [vmem:[#allocation7_spill] sm:$0xff] %v5892_v30  ;;  %v5894_v16 = vpop.permute.xlu0 %1751  ;;  %v2615_v30 = vmul.f32 0.125, %v2567_v3  ;;  %v5916_v6 = vmul.f32 %v2616_v54, %v2616_v54  ;;  %v8103_v54 = vld [vmem:[#allocation13_spill] sm:$0xff] }
 0x354   :  { %8088 = vst [vmem:[#allocation6_spill] sm:$0xff] %v5894_v16  ;;  %1793 = vrot.lane.b32.xlu1 %v8091_v21, %s4510_s21  ;;  %v2618_v16 = vmul.f32 0.125, %v2570_v23  ;;  %v5924_v23 = vmul.f32 %v2617_v59, %v2617_v59  ;;  %v2335_v21 = vadd.f32 %v5276_v25, %v8100_v46  ;;  %v8109_v59 = vld [vmem:[#allocation14_spill] sm:$0xff]  ;;  %v8112_v25 = vld [vmem:[#allocation89_spill] sm:$0xff] }
 0x355   :  { %1811 = vrot.lane.b32.xlu0 %v8092_v38, %s4510_s21  ;;  %v5918_v44 = vmul.f32 %v2615_v30, %v2615_v30  ;;  %v8101_v38 = vld [vmem:[#allocation75_spill] sm:$0xff]  ;;  %v2354_v46 = vadd.f32 %v8112_v25, %v8111_v63  ;;  %v8125_v63 = vld [vmem:[#allocation22_spill] sm:$0xff]  ;;  %v8126_v25 = vld [vmem:[#allocation101_spill] sm:$0xff] }
 0x356   :  { %v5904_v50 = vpop.permute.xlu1 %1753  ;;  %v5922_v3 = vmul.f32 %v2618_v16, %v2618_v16  ;;  %v8108_v16 = vld [vmem:[#allocation86_spill] sm:$0xff]  ;;  %v5958_v33 = vadd.f32 %v8126_v25, %v8125_v63 }
 0x357   :  { %8093 = vst [vmem:[#allocation9_spill] sm:$0xff] %v5904_v50  ;;  %v5906_v26 = vpop.permute.xlu0 %1755  ;;  %v2352_v1 = vadd.f32 %v8108_v16, %v8107_v10  ;;  %v8110_v50 = vld [vmem:[#allocation87_spill] sm:$0xff]  ;;  %v8122_v10 = vld [vmem:[#allocation96_spill] sm:$0xff]  ;;  %v8134_v63 = vld [vmem:[#allocation26_spill] sm:$0xff] }
 0x358   :  { %8094 = vst [vmem:[#allocation8_spill] sm:$0xff] %v5906_v26  ;;  %1813 = vrot.lane.b32.xlu1 %v8095_v49, %s4510_s21  ;;  %v8102_v49 = vld [vmem:[#allocation76_spill] sm:$0xff]  ;;  %v2351_v8 = vadd.f32 %v8110_v50, %v8109_v59  ;;  %v8123_v50 = vld [vmem:[#allocation21_spill] sm:$0xff]  ;;  %v5982_v25 = vadd.f32 %v5372_v9, %v8134_v63 }
 0x359   :  { %1827 = vrot.lane.b32.xlu0 %v8096_v60, %s4510_s21  ;;  %v8104_v60 = vld [vmem:[#allocation84_spill] sm:$0xff]  ;;  %v8124_v59 = vld [vmem:[#allocation97_spill] sm:$0xff] }
 0x35a   :  { %v5912_v13 = vpop.permute.xlu1 %1757  ;;  %v2338_v30 = vadd.f32 %v8104_v60, %v8103_v54  ;;  %v8118_v54 = vld [vmem:[#allocation92_spill] sm:$0xff]  ;;  %v2362_v37 = vadd.f32 %v8124_v59, %v8123_v50  ;;  %v8133_v59 = vld [vmem:[#allocation90_spill] sm:$0xff]  ;;  %v2591_v63 = vadd.f32 %v5433_v39, %v2351_v8 }
 0x35b   :  { %8097 = vst [vmem:[#allocation57_spill] sm:$0xff] %v5912_v13  ;;  %v5914_v5 = vpop.permute.xlu0 %1767  ;;  %v8106_v13 = vld [vmem:[#allocation85_spill] sm:$0xff]  ;;  %v2360_v60 = vadd.f32 %v8118_v54, %v8117_v47  ;;  %v8132_v50 = vld [vmem:[#allocation80_spill] sm:$0xff] }
 0x35c   :  { %8098 = vst [vmem:[#allocation58_spill] sm:$0xff] %v5914_v5  ;;  %1829 = vrot.lane.b32.xlu1 %v8101_v38, %s4510_s21  ;;  %v8105_v5 = vld [vmem:[#allocation12_spill] sm:$0xff]  ;;  %v8130_v54 = vld [vmem:[#allocation25_spill] sm:$0xff]  ;;  %v2578_v9 = vadd.f32 %v5431_v24, %v2338_v30  ;;  %v8144_v24 = vld [vmem:[#allocation94_spill] sm:$0xff] }
 0x35d   :  { %1839 = vrot.lane.b32.xlu0 %v8102_v49, %s4510_s21  ;;  %v2337_v26 = vadd.f32 %v8106_v13, %v8105_v5  ;;  %v8114_v38 = vld [vmem:[#allocation88_spill] sm:$0xff]  ;;  %v8116_v49 = vld [vmem:[#allocation91_spill] sm:$0xff] }
 0x35e   :  { %v2353_v29 = vadd.f32 %v8114_v38, %v8113_v0  ;;  %v2359_v51 = vadd.f32 %v8116_v49, %v8115_v57  ;;  %v5948_v41 = vpop.permute.xlu1 %1769  ;;  %v8121_v5 = vld [vmem:[#allocation20_spill] sm:$0xff]  ;;  %v8127_v0 = vld [vmem:[#allocation23_spill] sm:$0xff]  ;;  %v8128_v38 = vld [vmem:[#allocation102_spill] sm:$0xff] }
 0x35f   :  { %8119 = vst [vmem:[#allocation81_spill] sm:$0xff] %v5948_v41  ;;  %v5950_v13 = vpop.permute.xlu0 %1771  ;;  %v2361_v16 = vadd.f32 %v8122_v10, %v8121_v5  ;;  %v5962_v57 = vadd.f32 %v8128_v38, %v8127_v0  ;;  %v8129_v49 = vld [vmem:[#allocation24_spill] sm:$0xff]  ;;  %v8131_v5 = vld [vmem:[#allocation27_spill] sm:$0xff] }
 0x360   :  { %8120 = vst [vmem:[#allocation82_spill] sm:$0xff] %v5950_v13  ;;  %v5966_v47 = vadd.f32 %v5362_v42, %v8129_v49  ;;  %v5970_v13 = vadd.f32 %v5364_v34, %v8130_v54  ;;  %v5974_v10 = vadd.f32 %v5370_v4, %v8131_v5  ;;  %1841 = vrot.lane.b32.xlu1 %v8132_v50, %s4510_s21  ;;  %v8135_v42 = vld [vmem:[#allocation29_spill] sm:$0xff]  ;;  %v8136_v34 = vld [vmem:[#allocation28_spill] sm:$0xff]  ;;  %v8146_v30 = vld [vmem:[#allocation31_spill] sm:$0xff] }
 0x361   :  { %1795 = vrot.lane.b32.xlu0 %v8133_v59, %s4510_s21  ;;  %v5986_v0 = vadd.f32 %v5378_v53, %v8135_v42  ;;  %v5990_v38 = vadd.f32 %v5380_v32, %v8136_v34  ;;  %v8137_v4 = vld [vmem:[#allocation32_spill] sm:$0xff]  ;;  %v2575_v54 = vadd.f32 %v5418_v40, %v2335_v21  ;;  %v2576_v5 = vadd.f32 %v5424_v14, %v2336_v48  ;;  %v8142_v21 = vld [vmem:[#allocation113_spill] sm:$0xff]  ;;  %v8143_v48 = vld [vmem:[#allocation114_spill] sm:$0xff] }
 0x362   :  { %v5994_v49 = vadd.f32 %v5388_v43, %v8137_v4  ;;  %v2577_v50 = vadd.f32 %v5426_v45, %v2337_v26  ;;  %v6000_v59 = vpop.permute.xlu1 %1773  ;;  %v2592_v32 = vadd.f32 %v5437_v62, %v2352_v1  ;;  %v2593_v42 = vadd.f32 %v5439_v56, %v2353_v29  ;;  %v8140_v43 = vld [vmem:[#allocation111_spill] sm:$0xff]  ;;  %v8141_v4 = vld [vmem:[#allocation112_spill] sm:$0xff]  ;;  %v8149_v56 = vld [vmem:[#allocation106_spill] sm:$0xff] }
 0x363   :  { %8138 = vst [vmem:[#allocation63_spill] sm:$0xff] %v6000_v59  ;;  %v6002_v53 = vpop.permute.xlu0 %1799  ;;  %v2594_v34 = vadd.f32 %v8140_v43, %v2354_v46  ;;  %v2599_v40 = vadd.f32 %v8141_v4, %v2359_v51  ;;  %v2600_v14 = vadd.f32 %v8142_v21, %v2360_v60  ;;  %v2601_v45 = vadd.f32 %v8143_v48, %v2361_v16  ;;  %v8145_v26 = vld [vmem:[#allocation95_spill] sm:$0xff]  ;;  %v8147_v39 = vld [vmem:[#allocation104_spill] sm:$0xff]  ;;  %v8151_v51 = vld [vmem:[#allocation105_spill] sm:$0xff] }
 0x364   :  { %8139 = vst [vmem:[#allocation64_spill] sm:$0xff] %v6002_v53  ;;  %1797 = vrot.lane.b32.xlu1 %v8144_v24, %s4510_s21  ;;  %v6017_v8 = vadd.f32 %v8147_v39, %v8146_v30  ;;  %v8148_v62 = vld [vmem:[#allocation36_spill] sm:$0xff]  ;;  %v8150_v1 = vld [vmem:[#allocation35_spill] sm:$0xff]  ;;  %v2623_v43 = vmul.f32 0.125, %v2575_v54  ;;  %v2624_v4 = vmul.f32 0.125, %v2576_v5  ;;  %v2625_v21 = vmul.f32 0.125, %v2577_v50 }
 0x365   :  { %1843 = vrot.lane.b32.xlu0 %v8145_v26, %s4510_s21  ;;  %v6021_v29 = vadd.f32 %v8149_v56, %v8148_v62  ;;  %v6025_v46 = vadd.f32 %v8151_v51, %v8150_v1  ;;  %v8152_v60 = vld [vmem:[#allocation115_spill] sm:$0xff]  ;;  %v2626_v48 = vmul.f32 0.125, %v2578_v9  ;;  %v2639_v30 = vmul.f32 0.125, %v2591_v63  ;;  %v8159_v5 = vld [vmem:[#allocation108_spill] sm:$0xff]  ;;  %v8161_v63 = vld [vmem:[#allocation109_spill] sm:$0xff] }
 0x366   :  { %v2602_v16 = vadd.f32 %v8152_v60, %v2362_v37  ;;  %v6028_v24 = vpop.permute.xlu1 %1801  ;;  %v2640_v39 = vmul.f32 0.125, %v2592_v32  ;;  %v2641_v53 = vmul.f32 0.125, %v2593_v42  ;;  %v2642_v59 = vmul.f32 0.125, %v2594_v34  ;;  %v8155_v62 = vld [vmem:[#allocation39_spill] sm:$0xff]  ;;  %v8157_v37 = vld [vmem:[#allocation100_spill] sm:$0xff]  ;;  %v8163_v34 = vld [vmem:[#allocation110_spill] sm:$0xff] }
 0x367   :  { %8153 = vst [vmem:[#allocation69_spill] sm:$0xff] %v6028_v24  ;;  %v6030_v26 = vpop.permute.xlu0 %1803  ;;  %v8156_v56 = vld [vmem:[#allocation107_spill] sm:$0xff]  ;;  %v2647_v20 = vmul.f32 0.125, %v2599_v40  ;;  %v2648_v1 = vmul.f32 0.125, %v2600_v14  ;;  %v2649_v51 = vmul.f32 0.125, %v2601_v45  ;;  %v8160_v9 = vld [vmem:[#allocation44_spill] sm:$0xff]  ;;  %v2720_v40 = vmul.f32 %v2624_v4, %v2624_v4 }
 0x368   :  { %8154 = vst [vmem:[#allocation70_spill] sm:$0xff] %v6030_v26  ;;  %v2367_v41 = vadd.f32 %v8156_v56, %v8155_v62  ;;  %1845 = vrot.lane.b32.xlu1 %v8157_v37, %s4510_s21  ;;  %v8158_v54 = vld [vmem:[#allocation43_spill] sm:$0xff]  ;;  %v2369_v32 = vadd.f32 %v8161_v63, %v8160_v9  ;;  %v2650_v26 = vmul.f32 0.125, %v2602_v16  ;;  %v2719_v62 = vmul.f32 %v2623_v43, %v2623_v43  ;;  %v8170_v63 = vld [vmem:[#allocation62_spill] sm:$0xff] }
 0x369   :  { %2807 = vrot.lane.b32.xlu0 %v5918_v44, %s4510_s21  ;;  %v2368_v50 = vadd.f32 %v8159_v5, %v8158_v54  ;;  %v8162_v42 = vld [vmem:[#allocation47_spill] sm:$0xff]  ;;  %v2721_v14 = vmul.f32 %v2625_v21, %v2625_v21  ;;  %v6044_v45 = vmul.f32 %v2626_v48, %v2626_v48  ;;  %v6050_v44 = vmul.f32 %v2639_v30, %v2639_v30  ;;  %v8164_v21 = vld [vmem:[#allocation50_spill] sm:$0xff]  ;;  %v8165_v48 = vld [vmem:[#allocation116_spill] sm:$0xff] }
 0x36a   :  { %v2370_v60 = vadd.f32 %v8163_v34, %v8162_v42  ;;  %v6046_v56 = vpop.permute.xlu1 %1805  ;;  %v6052_v24 = vmul.f32 %v2640_v39, %v2640_v39  ;;  %v6054_v54 = vmul.f32 %v2641_v53, %v2641_v53  ;;  %v6056_v5 = vmul.f32 %v2642_v59, %v2642_v59  ;;  %v8166_v59 = vld [vmem:[#allocation55_spill] sm:$0xff]  ;;  %v8167_v30 = vld [vmem:[#allocation56_spill] sm:$0xff]  ;;  %v8168_v39 = vld [vmem:[#allocation117_spill] sm:$0xff] }
 0x36b   :  { %v6048_v37 = vpop.permute.xlu0 %1815  ;;  %v6058_v9 = vmul.f32 %v2647_v20, %v2647_v20  ;;  %v6060_v16 = vmul.f32 %v2648_v1, %v2648_v1  ;;  %v6062_v43 = vmul.f32 %v2649_v51, %v2649_v51  ;;  %v6068_v4 = vmul.f32 %v2650_v26, %v2650_v26  ;;  %v8169_v51 = vld [vmem:[#allocation61_spill] sm:$0xff]  ;;  %v8171_v26 = vld [vmem:[#allocation67_spill] sm:$0xff]  ;;  %v8172_v34 = vld [vmem:[#allocation68_spill] sm:$0xff] }
 0x36c   :  { %2809 = vrot.lane.b32.xlu1 %v5916_v6, %s4510_s21  ;;  %v6072_v53 = vadd.f32 %v8165_v48, %v8164_v21  ;;  %v6076_v20 = vadd.f32 %v5461_v35, %v8166_v59  ;;  %v6080_v1 = vadd.f32 %v8168_v39, %v8167_v30  ;;  %v6084_v6 = vadd.f32 %v5467_v36, %v8169_v51  ;;  %v8173_v59 = vld [vmem:[#allocation73_spill] sm:$0xff]  ;;  %v8174_v30 = vld [vmem:[#allocation74_spill] sm:$0xff]  ;;  %v8176_v51 = vld [vmem:[#allocation79_spill] sm:$0xff] }
 0x36d   :  { %2811 = vrot.lane.b32.xlu0 %v5924_v23, %s4510_s21  ;;  %v6088_v23 = vadd.f32 %v5469_v58, %v8170_v63  ;;  %v6092_v42 = vadd.f32 %v5473_v28, %v8171_v26  ;;  %v6096_v35 = vadd.f32 %v5475_v2, %v8172_v34  ;;  %v6104_v36 = vadd.f32 %v5480_v18, %v8173_v59  ;;  %v8175_v39 = vld [vmem:[#allocation78_spill] sm:$0xff] }
 0x36e   :  { %v6098_v21 = vpop.permute.xlu1 %1817  ;;  %v6108_v58 = vadd.f32 %v5482_v22, %v8174_v30  ;;  %v6112_v28 = vadd.f32 %v5488_v17, %v8175_v39  ;;  %v6116_v2 = vadd.f32 %v5490_v52, %v8176_v51  ;;  %v2571_v63 = vadd.f32 %v5498_v55, %v5958_v33  ;;  %v8177_v22 = vld [vmem:[#allocation83_spill] sm:$0xff]  ;;  %v8187_v30 = vld [vmem:[#allocation125_spill] sm:$0xff] }
 0x36f   :  { %v6100_v48 = vpop.permute.xlu0 %1819  ;;  %v2572_v26 = vadd.f32 %v5504_v11, %v5962_v57  ;;  %v2579_v18 = vadd.f32 %v5506_v15, %v5966_v47  ;;  %v6129_v17 = vadd.f32 %v5496_v7, %v8177_v22  ;;  %v2580_v52 = vadd.f32 %v5512_v19, %v5970_v13  ;;  %v8178_v15 = vld [vmem:[#allocation118_spill] sm:$0xff]  ;;  %v8180_v47 = vld [vmem:[#allocation120_spill] sm:$0xff]  ;;  %v8181_v7 = vld [vmem:[#allocation121_spill] sm:$0xff] }
 0x370   :  { %2813 = vrot.lane.b32.xlu1 %v5922_v3, %s4510_s21  ;;  %v2583_v55 = vadd.f32 %v5514_v27, %v5982_v25  ;;  %v2584_v11 = vadd.f32 %v5520_v31, %v5974_v10  ;;  %v2585_v33 = vadd.f32 %v8178_v15, %v5990_v38  ;;  %v8179_v3 = vld [vmem:[#allocation119_spill] sm:$0xff]  ;;  %v2596_v34 = vadd.f32 %v8181_v7, %v5994_v49  ;;  %v8184_v27 = vld [vmem:[#allocation122_spill] sm:$0xff]  ;;  %v8186_v25 = vld [vmem:[#allocation124_spill] sm:$0xff] }
 0x371   :  { %2823 = vrot.lane.b32.xlu0 %v2719_v62, %s4510_s21  ;;  %v2586_v57 = vadd.f32 %v8179_v3, %v5986_v0  ;;  %v2595_v62 = vadd.f32 %v8180_v47, %v6017_v8  ;;  %v2603_v13 = vadd.f32 %v8184_v27, %v6025_v46  ;;  %v8185_v31 = vld [vmem:[#allocation123_spill] sm:$0xff]  ;;  %v2607_v38 = vadd.f32 %v8186_v25, %v2367_v41  ;;  %v8188_v22 = vld [vmem:[#allocation126_spill] sm:$0xff] }
 0x372   :  { %v6145_v59 = vpop.permute.xlu1 %1821  ;;  %v2604_v10 = vadd.f32 %v8185_v31, %v6021_v29  ;;  %v2608_v0 = vadd.f32 %v8187_v30, %v2368_v50  ;;  %v2619_v39 = vmul.f32 0.125, %v2571_v63  ;;  %v2620_v51 = vmul.f32 0.125, %v2572_v26  ;;  %v8189_v46 = vld [vmem:[#allocation127_spill] sm:$0xff] }
 0x373   :  { %8182 = vst [vmem:[#allocation11_spill] sm:$0xff] %v6145_v59  ;;  %v6147_v19 = vpop.permute.xlu0 %1187  ;;  %v2627_v8 = vmul.f32 0.125, %v2579_v18  ;;  %v2609_v15 = vadd.f32 %v8188_v22, %v2369_v32  ;;  %v2628_v49 = vmul.f32 0.125, %v2580_v52  ;;  %v2631_v3 = vmul.f32 0.125, %v2583_v55  ;;  %v8195_v22 = vld [vmem:[#allocation128_spill] sm:$0xff] }
 0x374   :  { %8183 = vst [vmem:[#allocation10_spill] sm:$0xff] %v6147_v19  ;;  %2825 = vrot.lane.b32.xlu1 %v2720_v40, %s4510_s21  ;;  %v2632_v47 = vmul.f32 0.125, %v2584_v11  ;;  %v2610_v7 = vadd.f32 %v8189_v46, %v2370_v60  ;;  %v2633_v27 = vmul.f32 0.125, %v2585_v33  ;;  %v2634_v29 = vmul.f32 0.125, %v2586_v57  ;;  %v8197_v46 = vld [vmem:[#allocation98_spill] sm:$0xff]  ;;  %v4366_v59 = vld [vmem:[#allocation2 + $0x120] sm:$0xff] }
 0x375   :  { %2827 = vrot.lane.b32.xlu0 %v2721_v14, %s4510_s21  ;;  %v2643_v31 = vmul.f32 0.125, %v2595_v62  ;;  %v2644_v41 = vmul.f32 0.125, %v2596_v34  ;;  %v2651_v63 = vmul.f32 0.125, %v2603_v13  ;;  %v2652_v26 = vmul.f32 0.125, %v2604_v10 }
 0x376   :  { %v6159_v25 = vpop.permute.xlu1 %1189  ;;  %v2655_v32 = vmul.f32 0.125, %v2607_v38  ;;  %v2656_v18 = vmul.f32 0.125, %v2608_v0  ;;  %v6163_v40 = vmul.f32 %v2619_v39, %v2619_v39  ;;  %v6165_v14 = vmul.f32 %v2620_v51, %v2620_v51 }
 0x377   :  { %8190 = vst [vmem:[#allocation75_spill] sm:$0xff] %v6159_v25  ;;  %v6161_v50 = vpop.permute.xlu0 %1203  ;;  %v6167_v52 = vmul.f32 %v2627_v8, %v2627_v8  ;;  %v2657_v55 = vmul.f32 0.125, %v2609_v15  ;;  %v6173_v60 = vmul.f32 %v2628_v49, %v2628_v49  ;;  %v6175_v11 = vmul.f32 %v2631_v3, %v2631_v3  ;;  %v8194_v8 = vld [vmem:[#allocation93_spill] sm:$0xff]  ;;  %v8196_v49 = vld [vmem:[#allocation132_spill] sm:$0xff] }
 0x378   :  { %8191 = vst [vmem:[#allocation76_spill] sm:$0xff] %v6161_v50  ;;  %2829 = vrot.lane.b32.xlu1 %v6044_v45, %s4510_s21  ;;  %v6177_v33 = vmul.f32 %v2632_v47, %v2632_v47  ;;  %v2658_v57 = vmul.f32 0.125, %v2610_v7  ;;  %v6179_v62 = vmul.f32 %v2633_v27, %v2633_v27  ;;  %v6181_v34 = vmul.f32 %v2634_v29, %v2634_v29  ;;  %v8198_v7 = vld [vmem:[#allocation129_spill] sm:$0xff]  ;;  %v8251_v50 = vld [vmem:[#allocation156_spill] sm:$0xff] }
 0x379   :  { %2855 = vrot.lane.b32.xlu0 %v6050_v44, %s4510_s21  ;;  %v6183_v13 = vmul.f32 %v2643_v31, %v2643_v31  ;;  %v6185_v10 = vmul.f32 %v2644_v41, %v2644_v41  ;;  %v6191_v44 = vmul.f32 %v2651_v63, %v2651_v63  ;;  %v6193_v30 = vmul.f32 %v2652_v26, %v2652_v26  ;;  %v8199_v31 = vld [vmem:[#allocation133_spill] sm:$0xff]  ;;  %v8200_v63 = vld [vmem:[#allocation134_spill] sm:$0xff]  ;;  %v8201_v26 = vld [vmem:[#allocation135_spill] sm:$0xff] }
 0x37a   :  { %v6187_v38 = vpop.permute.xlu1 %1205  ;;  %v6195_v0 = vmul.f32 %v2655_v32, %v2655_v32  ;;  %v6197_v39 = vmul.f32 %v2656_v18, %v2656_v18  ;;  %v6199_v51 = vmul.f32 %v2657_v55, %v2657_v55  ;;  %v2349_v15 = vadd.f32 %v8195_v22, %v8194_v8  ;;  %v8202_v32 = vld [vmem:[#allocation136_spill] sm:$0xff] }
 0x37b   :  { %8192 = vst [vmem:[#allocation13_spill] sm:$0xff] %v6187_v38  ;;  %v6189_v45 = vpop.permute.xlu0 %1215  ;;  %v2573_v3 = vadd.f32 %v8196_v49, %v6072_v53  ;;  %v6209_v47 = vmul.f32 %v2658_v57, %v2658_v57  ;;  %v2350_v27 = vadd.f32 %v8198_v7, %v8197_v46  ;;  %v2574_v29 = vadd.f32 %v5573_v61, %v6076_v20  ;;  %v8205_v61 = vld [vmem:[#allocation137_spill] sm:$0xff]  ;;  %v8210_v49 = vld [vmem:[#allocation130_spill] sm:$0xff]  ;;  %v4353_v38 = vld [vmem:[#allocation2] sm:$0xff] }
 0x37c   :  { %8193 = vst [vmem:[#allocation84_spill] sm:$0xff] %v6189_v45  ;;  %2857 = vrot.lane.b32.xlu1 %v6052_v24, %s4510_s21  ;;  %v2581_v41 = vadd.f32 %v8199_v31, %v6080_v1  ;;  %v2582_v53 = vadd.f32 %v5579_v12, %v6084_v6  ;;  %v2587_v24 = vadd.f32 %v8200_v63, %v6088_v23  ;;  %v8206_v1 = vld [vmem:[#allocation138_spill] sm:$0xff]  ;;  %v8207_v12 = vld [vmem:[#allocation139_spill] sm:$0xff]  ;;  %v8208_v23 = vld [vmem:[#allocation140_spill] sm:$0xff] }
 0x37d   :  { %2859 = vrot.lane.b32.xlu0 %v6054_v54, %s4510_s21  ;;  %v2588_v54 = vadd.f32 %v8201_v26, %v6092_v42  ;;  %v2597_v18 = vadd.f32 %v8202_v32, %v6096_v35  ;;  %v2598_v20 = vadd.f32 %v8205_v61, %v6104_v36  ;;  %v2605_v8 = vadd.f32 %v8206_v1, %v6108_v58  ;;  %v8209_v42 = vld [vmem:[#allocation99_spill] sm:$0xff]  ;;  %v8211_v7 = vld [vmem:[#allocation141_spill] sm:$0xff]  ;;  %v8212_v63 = vld [vmem:[#allocation142_spill] sm:$0xff] }
 0x37e   :  { %v6225_v55 = vpop.permute.xlu1 %1217  ;;  %v2606_v6 = vadd.f32 %v8207_v12, %v6112_v28  ;;  %v2611_v22 = vadd.f32 %v8208_v23, %v6116_v2  ;;  %v2373_v46 = vadd.f32 %v8210_v49, %v8209_v42  ;;  %v2621_v35 = vmul.f32 0.125, %v2573_v3  ;;  %v8213_v36 = vld [vmem:[#allocation103_spill] sm:$0xff] }
 0x37f   :  { %8203 = vst [vmem:[#allocation12_spill] sm:$0xff] %v6225_v55  ;;  %v6227_v57 = vpop.permute.xlu0 %1235  ;;  %v2612_v31 = vadd.f32 %v8211_v7, %v6129_v17  ;;  %v2589_v26 = vadd.f32 %v8212_v63, %v2349_v15  ;;  %v8214_v58 = vld [vmem:[#allocation131_spill] sm:$0xff]  ;;  %v2622_v32 = vmul.f32 0.125, %v2574_v29  ;;  %v2629_v2 = vmul.f32 0.125, %v2581_v41  ;;  %v8218_v29 = vld [vmem:[#allocation144_spill] sm:$0xff] }
 0x380   :  { %8204 = vst [vmem:[#allocation85_spill] sm:$0xff] %v6227_v57  ;;  %2861 = vrot.lane.b32.xlu1 %v6056_v5, %s4510_s21  ;;  %v2374_v28 = vadd.f32 %v8214_v58, %v8213_v36  ;;  %v8215_v61 = vld [vmem:[#allocation143_spill] sm:$0xff]  ;;  %v2630_v12 = vmul.f32 0.125, %v2582_v53  ;;  %v2635_v3 = vmul.f32 0.125, %v2587_v24  ;;  %v2636_v23 = vmul.f32 0.125, %v2588_v54  ;;  %v8219_v54 = vld [vmem:[#allocation145_spill] sm:$0xff] }
 0x381   :  { %2871 = vrot.lane.b32.xlu0 %v6058_v9, %s4510_s21  ;;  %v2590_v1 = vadd.f32 %v8215_v61, %v2350_v27  ;;  %v2645_v42 = vmul.f32 0.125, %v2597_v18  ;;  %v2646_v49 = vmul.f32 0.125, %v2598_v20  ;;  %v2653_v5 = vmul.f32 0.125, %v2605_v8  ;;  %v8229_v61 = vld [vmem:[#allocation146_spill] sm:$0xff] }
 0x382   :  { %v6249_v17 = vpop.permute.xlu1 %1237  ;;  %v2654_v7 = vmul.f32 0.125, %v2606_v6  ;;  %v2659_v63 = vmul.f32 0.125, %v2611_v22  ;;  %v6253_v9 = vmul.f32 %v2621_v35, %v2621_v35  ;;  %v2660_v57 = vmul.f32 0.125, %v2612_v31 }
 0x383   :  { %8216 = vst [vmem:[#allocation15_spill] sm:$0xff] %v6249_v17  ;;  %v6251_v15 = vpop.permute.xlu0 %1251  ;;  %v2637_v36 = vmul.f32 0.125, %v2589_v26  ;;  %v2613_v41 = vadd.f32 %v8218_v29, %v2373_v46  ;;  %v6260_v27 = vmul.f32 %v2622_v32, %v2622_v32  ;;  %v6262_v53 = vmul.f32 %v2629_v2, %v2629_v2  ;;  %v4338_v2 = vld [vmem:[#allocation2 + $0x1] sm:$0xff] }
 0x384   :  { %8217 = vst [vmem:[#allocation86_spill] sm:$0xff] %v6251_v15  ;;  %2873 = vrot.lane.b32.xlu1 %v6060_v16, %s4510_s21  ;;  %v2638_v24 = vmul.f32 0.125, %v2590_v1  ;;  %v2614_v18 = vadd.f32 %v8219_v54, %v2374_v28  ;;  %v6265_v20 = vmul.f32 %v2630_v12, %v2630_v12  ;;  %v6267_v8 = vmul.f32 %v2635_v3, %v2635_v3  ;;  %v8234_v54 = vld [vmem:[#allocation37_spill] sm:$0xff] }
 0x385   :  { %2875 = vrot.lane.b32.xlu0 %v6062_v43, %s4510_s21  ;;  %v6269_v6 = vmul.f32 %v2636_v23, %v2636_v23  ;;  %v6271_v22 = vmul.f32 %v2645_v42, %v2645_v42  ;;  %v6277_v43 = vmul.f32 %v2646_v49, %v2646_v49  ;;  %v6279_v35 = vmul.f32 %v2653_v5, %v2653_v5  ;;  %v4339_v23 = vld [vmem:[#allocation2 + $0x9] sm:$0xff] }
 0x386   :  { %v6273_v46 = vpop.permute.xlu1 %1253  ;;  %v6281_v31 = vmul.f32 %v2654_v7, %v2654_v7  ;;  %v6283_v26 = vmul.f32 %v2659_v63, %v2659_v63  ;;  %v6285_v58 = vmul.f32 %v2660_v57, %v2660_v57  ;;  %v6287_v28 = vmul.f32 %v2637_v36, %v2637_v36  ;;  %v8231_v42 = vld [vmem:[#allocation30_spill] sm:$0xff]  ;;  %v8232_v5 = vld [vmem:[#allocation33_spill] sm:$0xff]  ;;  %v4341_v63 = vld [vmem:[#allocation2 + $0x19] sm:$0xff] }
 0x387   :  { %8220 = vst [vmem:[#allocation14_spill] sm:$0xff] %v6271_v22  ;;  %8221 = vst [vmem:[#allocation87_spill] sm:$0xff] %v6273_v46  ;;  %v6275_v16 = vpop.permute.xlu0 %1263  ;;  %v2661_v32 = vmul.f32 0.125, %v2613_v41  ;;  %v1559_v1 = vsub.f32 %v4338_v2, %v8229_v61  ;;  %v6294_v12 = vmul.f32 %v2638_v24, %v2638_v24  ;;  %v2662_v3 = vmul.f32 0.125, %v2614_v18  ;;  %v4340_v57 = vld [vmem:[#allocation2 + $0x11] sm:$0xff]  ;;  %v4342_v41 = vld [vmem:[#allocation2 + $0x49] sm:$0xff] }
 0x388   :  { %8222 = vst [vmem:[#allocation17_spill] sm:$0xff] %v6275_v16  ;;  %8223 = vst [vmem:[#allocation89_spill] sm:$0xff] %v6277_v43  ;;  %2877 = vrot.lane.b32.xlu1 %v6068_v4, %s4510_s21  ;;  %v1560_v49 = vsub.f32 %v4339_v23, %v8231_v42  ;;  %v1561_v7 = vsub.f32 %v4340_v57, %v8232_v5  ;;  %v8233_v36 = vld [vmem:[#allocation34_spill] sm:$0xff]  ;;  %v1567_v2 = vsub.f32 %v4342_v41, %v8234_v54  ;;  %v8235_v4 = vld [vmem:[#allocation41_spill] sm:$0xff] }
 0x389   :  { %8224 = vst [vmem:[#allocation16_spill] sm:$0xff] %v6279_v35  ;;  %8225 = vst [vmem:[#allocation88_spill] sm:$0xff] %v6281_v31  ;;  %2815 = vrot.lane.b32.xlu0 %v6163_v40, %s4510_s21  ;;  %v1562_v29 = vsub.f32 %v4341_v63, %v8233_v36  ;;  %v4343_v61 = vld [vmem:[#allocation2 + $0x51] sm:$0xff]  ;;  %v4344_v46 = vld [vmem:[#allocation2 + $0x59] sm:$0xff] }
 0x38a   :  { %8226 = vst [vmem:[#allocation18_spill] sm:$0xff] %v6283_v26  ;;  %8227 = vst [vmem:[#allocation91_spill] sm:$0xff] %v6285_v58  ;;  %v1568_v16 = vsub.f32 %v4343_v61, %v8235_v4  ;;  %v8236_v40 = vld [vmem:[#allocation147_spill] sm:$0xff]  ;;  %v4345_v23 = vld [vmem:[#allocation2 + $0x61] sm:$0xff]  ;;  %v6310_v61 = vmul.f32 %v2661_v32, %v2661_v32  ;;  %v1607_v4 = vmul.f32 2.0, %v1559_v1 }
 0x38b   :  { %8228 = vst [vmem:[#allocation19_spill] sm:$0xff] %v6287_v28  ;;  %8230 = vst [vmem:[#allocation92_spill] sm:$0xff] %v6294_v12  ;;  %v1569_v24 = vsub.f32 %v4344_v46, %v8236_v40  ;;  %v6302_v12 = vpop.permute.xlu1 %1265  ;;  %v6304_v18 = vpop.permute.xlu0 %1459  ;;  %v8239_v42 = vld [vmem:[#allocation45_spill] sm:$0xff]  ;;  %v4346_v57 = vld [vmem:[#allocation2 + $0xd9] sm:$0xff]  ;;  %v1610_v1 = vmul.f32 2.0, %v1562_v29 }
 0x38c   :  { %8237 = vst [vmem:[#allocation20_spill] sm:$0xff] %v6302_v12  ;;  %8238 = vst [vmem:[#allocation96_spill] sm:$0xff] %v6304_v18  ;;  %v1570_v15 = vsub.f32 %v4345_v23, %v8239_v42  ;;  %v8240_v5 = vld [vmem:[#allocation148_spill] sm:$0xff]  ;;  %v8241_v36 = vld [vmem:[#allocation149_spill] sm:$0xff]  ;;  %2817 = vrot.lane.b32.xlu1 %v6165_v14, %s4510_s21  ;;  %v6318_v23 = vmul.f32 %v2662_v3, %v2662_v3  ;;  %v1608_v42 = vmul.f32 2.0, %v1560_v49 }
 0x38d   :  { %v1583_v17 = vsub.f32 %v4346_v57, %v8240_v5  ;;  %v4347_v63 = vld [vmem:[#allocation2 + $0xe1] sm:$0xff]  ;;  %v4348_v41 = vld [vmem:[#allocation2 + $0xe9] sm:$0xff]  ;;  %8243 = vst [vmem:[#allocation21_spill] sm:$0xff] %v6310_v61  ;;  %v4349_v46 = vld [vmem:[#allocation2 + $0xf1] sm:$0xff]  ;;  %2831 = vrot.lane.b32.xlu0 %v6167_v52, %s4510_s21  ;;  %v1609_v57 = vmul.f32 2.0, %v1561_v7 }
 0x38e   :  { %v1584_v55 = vsub.f32 %v4347_v63, %v8241_v36  ;;  %v8242_v54 = vld [vmem:[#allocation150_spill] sm:$0xff]  ;;  %v8244_v40 = vld [vmem:[#allocation151_spill] sm:$0xff]  ;;  %v4350_v28 = vld [vmem:[#allocation2 + $0x121] sm:$0xff]  ;;  %8246 = vst [vmem:[#allocation97_spill] sm:$0xff] %v6318_v23  ;;  %v1615_v36 = vmul.f32 2.0, %v1567_v2 }
 0x38f   :  { %v1585_v45 = vsub.f32 %v4348_v41, %v8242_v54  ;;  %v1586_v12 = vsub.f32 %v4349_v46, %v8244_v40  ;;  %v8245_v18 = vld [vmem:[#allocation152_spill] sm:$0xff]  ;;  %v4351_v5 = vld [vmem:[#allocation2 + $0x129] sm:$0xff]  ;;  %v1616_v41 = vmul.f32 2.0, %v1568_v16  ;;  %v1617_v54 = vmul.f32 2.0, %v1569_v24  ;;  %v6321_v46 = vpop.permute.xlu1 %1461  ;;  %v4352_v23 = vld [vmem:[#allocation2 + $0x131] sm:$0xff] }
 0x390   :  { %v1591_v58 = vsub.f32 %v4350_v28, %v8245_v18  ;;  %v8247_v32 = vld [vmem:[#allocation153_spill] sm:$0xff]  ;;  %8248 = vst [vmem:[#allocation22_spill] sm:$0xff] %v6321_v46  ;;  %v6323_v28 = vpop.permute.xlu0 %1507  ;;  %v1618_v18 = vmul.f32 2.0, %v1570_v15  ;;  %v1631_v14 = vmul.f32 2.0, %v1583_v17  ;;  %v1632_v40 = vmul.f32 2.0, %v1584_v55  ;;  %v8250_v49 = vld [vmem:[#allocation154_spill] sm:$0xff]  ;;  %2833 = vrot.lane.b32.xlu1 %v6173_v60, %s4510_s21 }
 0x391   :  { %v1592_v63 = vsub.f32 %v4351_v5, %v8247_v32  ;;  %8249 = vst [vmem:[#allocation101_spill] sm:$0xff] %v6323_v28  ;;  %v1633_v61 = vmul.f32 2.0, %v1585_v45  ;;  %v1634_v52 = vmul.f32 2.0, %v1586_v12  ;;  %v1593_v7 = vsub.f32 %v4352_v23, %v8250_v49  ;;  %2839 = vrot.lane.b32.xlu0 %v6175_v11, %s4510_s21  ;;  %v4354_v29 = vld [vmem:[#allocation2 + $0x139] sm:$0xff]  ;;  %v4355_v55 = vld [vmem:[#allocation2 + $0x8] sm:$0xff]  ;;  %v8254_v2 = vld [vmem:[#allocation158_spill] sm:$0xff] }
 0x392   :  { %v1639_v3 = vmul.f32 2.0, %v1591_v58  ;;  %v1319_v5 = vsub.f32 %v4353_v38, %v8251_v50  ;;  %v8252_v15 = vld [vmem:[#allocation155_spill] sm:$0xff]  ;;  %v8253_v45 = vld [vmem:[#allocation157_spill] sm:$0xff]  ;;  %v4356_v58 = vld [vmem:[#allocation2 + $0x10] sm:$0xff] }
 0x393   :  { %v1640_v16 = vmul.f32 2.0, %v1592_v63  ;;  %v1594_v17 = vsub.f32 %v4354_v29, %v8252_v15  ;;  %v1320_v12 = vsub.f32 %v4355_v55, %v8253_v45  ;;  %v1321_v24 = vsub.f32 %v4356_v58, %v8254_v2  ;;  %v4357_v23 = vld [vmem:[#allocation2 + $0x18] sm:$0xff]  ;;  %v4358_v50 = vld [vmem:[#allocation2 + $0x48] sm:$0xff]  ;;  %v8256_v38 = vld [vmem:[#allocation160_spill] sm:$0xff]  ;;  %v6338_v31 = vpop.permute.xlu1 %1509 }
 0x394   :  { %v8255_v32 = vld [vmem:[#allocation159_spill] sm:$0xff]  ;;  %v1327_v28 = vsub.f32 %v4358_v50, %v8256_v38  ;;  %v4359_v60 = vld [vmem:[#allocation2 + $0x50] sm:$0xff]  ;;  %v8257_v46 = vld [vmem:[#allocation161_spill] sm:$0xff]  ;;  %8259 = vst [vmem:[#allocation23_spill] sm:$0xff] %v6338_v31  ;;  %v6340_v29 = vpop.permute.xlu0 %1759  ;;  %2841 = vrot.lane.b32.xlu1 %v6177_v33, %s4510_s21 }
 0x395   :  { %v1322_v49 = vsub.f32 %v4357_v23, %v8255_v32  ;;  %v1328_v25 = vsub.f32 %v4359_v60, %v8257_v46  ;;  %v4360_v11 = vld [vmem:[#allocation2 + $0x58] sm:$0xff]  ;;  %v8258_v63 = vld [vmem:[#allocation162_spill] sm:$0xff]  ;;  %8260 = vst [vmem:[#allocation102_spill] sm:$0xff] %v6340_v29  ;;  %v4361_v15 = vld [vmem:[#allocation2 + $0x60] sm:$0xff]  ;;  %v1641_v46 = vmul.f32 2.0, %v1593_v7  ;;  %v6346_v60 = vadd.f32 %v1607_v4, %v1319_v5  ;;  %2843 = vrot.lane.b32.xlu0 %v6179_v62, %s4510_s21 }
 0x396   :  { %v1329_v26 = vsub.f32 %v4360_v11, %v8258_v63  ;;  %v8261_v55 = vld [vmem:[#allocation163_spill] sm:$0xff]  ;;  %v8262_v2 = vld [vmem:[#allocation164_spill] sm:$0xff]  ;;  %v8263_v32 = vld [vmem:[#allocation165_spill] sm:$0xff] }
 0x397   :  { %v1330_v45 = vsub.f32 %v4361_v15, %v8261_v55  ;;  %v4362_v58 = vld [vmem:[#allocation2 + $0xd8] sm:$0xff]  ;;  %v4363_v23 = vld [vmem:[#allocation2 + $0xe0] sm:$0xff]  ;;  %v4364_v50 = vld [vmem:[#allocation2 + $0xe8] sm:$0xff]  ;;  %v6354_v15 = vadd.f32 %v1608_v42, %v1320_v12  ;;  %v6356_v55 = vadd.f32 %v1609_v57, %v1321_v24 }
 0x398   :  { %v1343_v19 = vsub.f32 %v4362_v58, %v8262_v2  ;;  %v1344_v35 = vsub.f32 %v4363_v23, %v8263_v32  ;;  %v8264_v38 = vld [vmem:[#allocation166_spill] sm:$0xff]  ;;  %v8265_v63 = vld [vmem:[#allocation167_spill] sm:$0xff]  ;;  %v8266_v29 = vld [vmem:[#allocation168_spill] sm:$0xff]  ;;  %v6360_v32 = vadd.f32 %v1610_v1, %v1322_v49  ;;  %v6366_v33 = vadd.f32 %v1617_v54, %v1329_v26  ;;  %v6370_v62 = vpop.permute.xlu0 %1775  ;;  %2845 = vrot.lane.b32.xlu1 %v6181_v34, %s4510_s21 }
 0x399   :  { %v1345_v43 = vsub.f32 %v4364_v50, %v8264_v38  ;;  %v4365_v11 = vld [vmem:[#allocation2 + $0xf0] sm:$0xff]  ;;  %v1351_v22 = vsub.f32 %v4366_v59, %v8266_v29  ;;  %v4367_v58 = vld [vmem:[#allocation2 + $0x128] sm:$0xff]  ;;  %v6362_v50 = vadd.f32 %v1615_v36, %v1327_v28  ;;  %v6364_v59 = vadd.f32 %v1616_v41, %v1328_v25  ;;  %v6368_v29 = vpop.permute.xlu1 %1761  ;;  %8270 = vst [vmem:[#allocation25_spill] sm:$0xff] %v6370_v62  ;;  %v4369_v25 = vld [vmem:[#allocation2 + $0x138] sm:$0xff] }
 0x39a   :  { %v1346_v31 = vsub.f32 %v4365_v11, %v8265_v63  ;;  %v8267_v7 = vld [vmem:[#allocation169_spill] sm:$0xff]  ;;  %v4368_v5 = vld [vmem:[#allocation2 + $0x130] sm:$0xff]  ;;  %8269 = vst [vmem:[#allocation24_spill] sm:$0xff] %v6368_v29  ;;  %v6372_v42 = vadd.f32 %v1618_v18, %v1330_v45  ;;  %v6374_v57 = vadd.f32 %v1631_v14, %v1343_v19  ;;  %v6376_v12 = vadd.f32 %v1632_v40, %v1344_v35  ;;  %v8275_v26 = vld [vmem:[#allocation171_spill] sm:$0xff] }
 0x39b   :  { %v1352_v4 = vsub.f32 %v4367_v58, %v8267_v7  ;;  %v8268_v2 = vld [vmem:[#allocation170_spill] sm:$0xff]  ;;  %v6378_v24 = vadd.f32 %v1633_v61, %v1345_v43  ;;  %v1642_v1 = vmul.f32 2.0, %v1594_v17  ;;  %v6382_v36 = vadd.f32 %v1639_v3, %v1351_v22  ;;  %2863 = vrot.lane.b32.xlu0 %v6183_v13, %s4510_s21  ;;  %v4370_v43 = vld [vmem:[#allocation2 + $0x21] sm:$0xff]  ;;  %v8282_v45 = vld [vmem:[#allocation175_spill] sm:$0xff] }
 0x39c   :  { %v1353_v23 = vsub.f32 %v4368_v5, %v8268_v2  ;;  %8271 = vst [vmem:[#allocation27_spill] sm:$0xff] %v6376_v12  ;;  %v6380_v49 = vadd.f32 %v1634_v52, %v1346_v31  ;;  %v1354_v41 = vsub.f32 %v4369_v25, %v8275_v26  ;;  %v8278_v61 = vld [vmem:[#allocation172_spill] sm:$0xff]  ;;  %v4371_v31 = vld [vmem:[#allocation2 + $0x29] sm:$0xff]  ;;  %v4373_v52 = vld [vmem:[#allocation2 + $0x71] sm:$0xff]  ;;  %v6401_v63 = vpop.permute.xlu0 %1783  ;;  %2865 = vrot.lane.b32.xlu1 %v6185_v10, %s4510_s21 }
 0x39d   :  { %8272 = vst [vmem:[#allocation80_spill] sm:$0xff] %v6378_v24  ;;  %8274 = vst [vmem:[#allocation26_spill] sm:$0xff] %v6382_v36  ;;  %v6389_v19 = vadd.f32 %v1640_v16, %v1352_v4  ;;  %v1563_v54 = vsub.f32 %v4370_v43, %v8278_v61  ;;  %v8279_v28 = vld [vmem:[#allocation173_spill] sm:$0xff]  ;;  %v8280_v14 = vld [vmem:[#allocation174_spill] sm:$0xff] }
 0x39e   :  { %8273 = vst [vmem:[#allocation90_spill] sm:$0xff] %v6380_v49  ;;  %v6391_v35 = vadd.f32 %v1641_v46, %v1353_v23  ;;  %v1564_v22 = vsub.f32 %v4371_v31, %v8279_v28  ;;  %v4372_v18 = vld [vmem:[#allocation2 + $0x69] sm:$0xff]  ;;  %v4374_v34 = vld [vmem:[#allocation2 + $0x91] sm:$0xff]  ;;  %v4375_v13 = vld [vmem:[#allocation2 + $0x99] sm:$0xff]  ;;  %v6399_v46 = vpop.permute.xlu1 %1777 }
 0x39f   :  { %8276 = vst [vmem:[#allocation29_spill] sm:$0xff] %v6389_v19  ;;  %v1571_v40 = vsub.f32 %v4372_v18, %v8280_v14  ;;  %v8281_v3 = vld [vmem:[#allocation49_spill] sm:$0xff]  ;;  %v1575_v38 = vsub.f32 %v4374_v34, %v8282_v45  ;;  %8284 = vst [vmem:[#allocation32_spill] sm:$0xff] %v6399_v46  ;;  %v8286_v7 = vld [vmem:[#allocation54_spill] sm:$0xff]  ;;  %v6407_v18 = vadd.f32 %v1642_v1, %v1354_v41  ;;  %2879 = vrot.lane.b32.xlu0 %v6191_v44, %s4510_s21 }
 0x3a0   :  { %8277 = vst [vmem:[#allocation28_spill] sm:$0xff] %v6391_v35  ;;  %v1572_v17 = vsub.f32 %v4373_v52, %v8281_v3  ;;  %v8283_v16 = vld [vmem:[#allocation53_spill] sm:$0xff]  ;;  %8285 = vst [vmem:[#allocation111_spill] sm:$0xff] %v6401_v63  ;;  %v8287_v2 = vld [vmem:[#allocation59_spill] sm:$0xff]  ;;  %2881 = vrot.lane.b32.xlu1 %v6193_v30, %s4510_s21 }
 0x3a1   :  { %v1576_v11 = vsub.f32 %v4375_v13, %v8283_v16  ;;  %v4376_v58 = vld [vmem:[#allocation2 + $0xa1] sm:$0xff]  ;;  %v4377_v5 = vld [vmem:[#allocation2 + $0xa9] sm:$0xff]  ;;  %v4378_v25 = vld [vmem:[#allocation2 + $0xf9] sm:$0xff]  ;;  %8290 = vst [vmem:[#allocation112_spill] sm:$0xff] %v6407_v18  ;;  %v1611_v16 = vmul.f32 2.0, %v1563_v54 }
 0x3a2   :  { %v1577_v4 = vsub.f32 %v4376_v58, %v8286_v7  ;;  %v1578_v23 = vsub.f32 %v4377_v5, %v8287_v2  ;;  %v8288_v26 = vld [vmem:[#allocation60_spill] sm:$0xff]  ;;  %v8289_v31 = vld [vmem:[#allocation65_spill] sm:$0xff]  ;;  %v8291_v52 = vld [vmem:[#allocation66_spill] sm:$0xff]  ;;  %v1612_v58 = vmul.f32 2.0, %v1564_v22 }
 0x3a3   :  { %v1587_v43 = vsub.f32 %v4378_v25, %v8288_v26  ;;  %v4379_v61 = vld [vmem:[#allocation2 + $0x101] sm:$0xff]  ;;  %v4381_v34 = vld [vmem:[#allocation2 + $0x149] sm:$0xff]  ;;  %v8292_v45 = vld [vmem:[#allocation71_spill] sm:$0xff]  ;;  %v1619_v26 = vmul.f32 2.0, %v1571_v40  ;;  %2887 = vrot.lane.b32.xlu0 %v6195_v0, %s4510_s21 }
 0x3a4   :  { %v1588_v28 = vsub.f32 %v4379_v61, %v8289_v31  ;;  %v4380_v14 = vld [vmem:[#allocation2 + $0x141] sm:$0xff]  ;;  %v1596_v13 = vsub.f32 %v4381_v34, %v8292_v45  ;;  %v4382_v7 = vld [vmem:[#allocation2 + $0x169] sm:$0xff]  ;;  %v4383_v25 = vld [vmem:[#allocation2 + $0x171] sm:$0xff]  ;;  %v1620_v61 = vmul.f32 2.0, %v1572_v17  ;;  %v1623_v31 = vmul.f32 2.0, %v1575_v38  ;;  %v6419_v34 = vpop.permute.xlu0 %1787  ;;  %2889 = vrot.lane.b32.xlu1 %v6197_v39, %s4510_s21 }
 0x3a5   :  { %v1595_v3 = vsub.f32 %v4380_v14, %v8291_v52  ;;  %v8293_v5 = vld [vmem:[#allocation72_spill] sm:$0xff]  ;;  %v8294_v1 = vld [vmem:[#allocation77_spill] sm:$0xff]  ;;  %v1624_v14 = vmul.f32 2.0, %v1576_v11  ;;  %v6417_v52 = vpop.permute.xlu1 %1785  ;;  %8296 = vst [vmem:[#allocation114_spill] sm:$0xff] %v6419_v34  ;;  %v1625_v10 = vmul.f32 2.0, %v1577_v4  ;;  %v1626_v45 = vmul.f32 2.0, %v1578_v23 }
 0x3a6   :  { %v1599_v2 = vsub.f32 %v4382_v7, %v8293_v5  ;;  %v1600_v41 = vsub.f32 %v4383_v25, %v8294_v1  ;;  %8295 = vst [vmem:[#allocation113_spill] sm:$0xff] %v6417_v52  ;;  %v1635_v63 = vmul.f32 2.0, %v1587_v43  ;;  %v1636_v44 = vmul.f32 2.0, %v1588_v28  ;;  %v4384_v46 = vld [vmem:[#allocation2 + $0x179] sm:$0xff]  ;;  %v8298_v29 = vld [vmem:[#allocation178_spill] sm:$0xff]  ;;  %v4386_v38 = vld [vmem:[#allocation2 + $0x28] sm:$0xff] }
 0x3a7   :  { %v1643_v54 = vmul.f32 2.0, %v1595_v3  ;;  %v1644_v22 = vmul.f32 2.0, %v1596_v13  ;;  %v8297_v62 = vld [vmem:[#allocation176_spill] sm:$0xff]  ;;  %v8299_v11 = vld [vmem:[#allocation179_spill] sm:$0xff]  ;;  %v4387_v23 = vld [vmem:[#allocation2 + $0x68] sm:$0xff]  ;;  %2891 = vrot.lane.b32.xlu0 %v6199_v51, %s4510_s21 }
 0x3a8   :  { %v1601_v7 = vsub.f32 %v4384_v46, %v8297_v62  ;;  %v4385_v5 = vld [vmem:[#allocation2 + $0x20] sm:$0xff]  ;;  %v1647_v40 = vmul.f32 2.0, %v1599_v2  ;;  %v1648_v17 = vmul.f32 2.0, %v1600_v41  ;;  %v1324_v4 = vsub.f32 %v4386_v38, %v8299_v11  ;;  %v8301_v13 = vld [vmem:[#allocation177_spill] sm:$0xff]  ;;  %v4389_v46 = vld [vmem:[#allocation2 + $0x70] sm:$0xff]  ;;  %v6435_v41 = vpop.permute.xlu0 %1807  ;;  %2893 = vrot.lane.b32.xlu1 %v6209_v47, %s4510_s21 }
 0x3a9   :  { %v1323_v25 = vsub.f32 %v4385_v5, %v8298_v29  ;;  %v8300_v43 = vld [vmem:[#allocation180_spill] sm:$0xff]  ;;  %v8302_v1 = vld [vmem:[#allocation181_spill] sm:$0xff]  ;;  %v4390_v5 = vld [vmem:[#allocation2 + $0x90] sm:$0xff]  ;;  %v6433_v2 = vpop.permute.xlu1 %1789  ;;  %8306 = vst [vmem:[#allocation95_spill] sm:$0xff] %v6435_v41 }
 0x3aa   :  { %v1331_v28 = vsub.f32 %v4387_v23, %v8300_v43  ;;  %v4388_v3 = vld [vmem:[#allocation2 + $0x181] sm:$0xff]  ;;  %v1332_v29 = vsub.f32 %v4389_v46, %v8302_v1  ;;  %v8303_v34 = vld [vmem:[#allocation182_spill] sm:$0xff]  ;;  %v4391_v52 = vld [vmem:[#allocation2 + $0x98] sm:$0xff]  ;;  %8305 = vst [vmem:[#allocation94_spill] sm:$0xff] %v6433_v2 }
 0x3ab   :  { %v1602_v62 = vsub.f32 %v4388_v3, %v8301_v13  ;;  %v1335_v30 = vsub.f32 %v4390_v5, %v8303_v34  ;;  %v8304_v18 = vld [vmem:[#allocation183_spill] sm:$0xff]  ;;  %v4392_v38 = vld [vmem:[#allocation2 + $0xa0] sm:$0xff]  ;;  %v4393_v23 = vld [vmem:[#allocation2 + $0xa8] sm:$0xff]  ;;  %v1649_v34 = vmul.f32 2.0, %v1601_v7  ;;  %v6441_v5 = vadd.f32 %v1611_v16, %v1323_v25  ;;  %2819 = vrot.lane.b32.xlu0 %v6253_v9, %s4510_s21 }
 0x3ac   :  { %v1336_v0 = vsub.f32 %v4391_v52, %v8304_v18  ;;  %v8307_v11 = vld [vmem:[#allocation184_spill] sm:$0xff]  ;;  %v8308_v43 = vld [vmem:[#allocation185_spill] sm:$0xff]  ;;  %v4394_v3 = vld [vmem:[#allocation2 + $0xf8] sm:$0xff]  ;;  %2821 = vrot.lane.b32.xlu1 %v6260_v27, %s4510_s21 }
 0x3ad   :  { %v1337_v35 = vsub.f32 %v4392_v38, %v8307_v11  ;;  %v1338_v19 = vsub.f32 %v4393_v23, %v8308_v43  ;;  %v8309_v13 = vld [vmem:[#allocation186_spill] sm:$0xff]  ;;  %v4395_v46 = vld [vmem:[#allocation2 + $0x100] sm:$0xff]  ;;  %v8310_v1 = vld [vmem:[#allocation187_spill] sm:$0xff]  ;;  %v6449_v38 = vadd.f32 %v1612_v58, %v1324_v4  ;;  %v6451_v11 = vadd.f32 %v1619_v26, %v1331_v28  ;;  %v6462_v51 = vpop.permute.xlu1 %1809  ;;  %v6464_v58 = vpop.permute.xlu0 %1823 }
 0x3ae   :  { %v1347_v36 = vsub.f32 %v4394_v3, %v8309_v13  ;;  %v1348_v49 = vsub.f32 %v4395_v46, %v8310_v1  ;;  %v4396_v18 = vld [vmem:[#allocation2 + $0x140] sm:$0xff]  ;;  %v4397_v24 = vld [vmem:[#allocation2 + $0x148] sm:$0xff]  ;;  %v8313_v7 = vld [vmem:[#allocation190_spill] sm:$0xff]  ;;  %v6455_v13 = vadd.f32 %v1620_v61, %v1332_v29  ;;  %v6457_v46 = vadd.f32 %v1623_v31, %v1335_v30 }
 0x3af   :  { %v8311_v52 = vld [vmem:[#allocation188_spill] sm:$0xff]  ;;  %v8312_v41 = vld [vmem:[#allocation189_spill] sm:$0xff]  ;;  %v4399_v25 = vld [vmem:[#allocation2 + $0x170] sm:$0xff]  ;;  %v6466_v26 = vadd.f32 %v1625_v10, %v1337_v35  ;;  %v6468_v4 = vadd.f32 %v1626_v45, %v1338_v19  ;;  %v1650_v61 = vmul.f32 2.0, %v1602_v62  ;;  %2835 = vrot.lane.b32.xlu0 %v6262_v53, %s4510_s21 }
 0x3b0   :  { %v1355_v2 = vsub.f32 %v4396_v18, %v8311_v52  ;;  %v1356_v12 = vsub.f32 %v4397_v24, %v8312_v41  ;;  %v4398_v23 = vld [vmem:[#allocation2 + $0x168] sm:$0xff]  ;;  %v8314_v43 = vld [vmem:[#allocation191_spill] sm:$0xff]  ;;  %v6459_v24 = vadd.f32 %v1624_v14, %v1336_v0  ;;  %v8315_v41 = vld [vmem:[#allocation192_spill] sm:$0xff]  ;;  %v6470_v28 = vadd.f32 %v1635_v63, %v1347_v36  ;;  %2837 = vrot.lane.b32.xlu1 %v6265_v20, %s4510_s21 }
 0x3b1   :  { %v1359_v16 = vsub.f32 %v4398_v23, %v8313_v7  ;;  %v1360_v3 = vsub.f32 %v4399_v25, %v8314_v43  ;;  %v4400_v39 = vld [vmem:[#allocation2 + $0x178] sm:$0xff]  ;;  %v6472_v18 = vadd.f32 %v1636_v44, %v1348_v49  ;;  %v4401_v29 = vld [vmem:[#allocation2 + $0x180] sm:$0xff]  ;;  %v8318_v30 = vld [vmem:[#allocation38_spill] sm:$0xff]  ;;  %v6494_v7 = vpop.permute.xlu1 %1825 }
 0x3b2   :  { %v1361_v1 = vsub.f32 %v4400_v39, %v8315_v41  ;;  %v6474_v31 = vadd.f32 %v1643_v54, %v1355_v2  ;;  %v6476_v14 = vadd.f32 %v1644_v22, %v1356_v12  ;;  %v1362_v0 = vsub.f32 %v4401_v29, %v8318_v30  ;;  %v4402_v49 = vld [vmem:[#allocation2 + $0x31] sm:$0xff]  ;;  %v8321_v35 = vld [vmem:[#allocation193_spill] sm:$0xff]  ;;  %v4403_v10 = vld [vmem:[#allocation2 + $0x39] sm:$0xff] }
 0x3b3   :  { %v6483_v19 = vadd.f32 %v1647_v40, %v1359_v16  ;;  %v6485_v36 = vadd.f32 %v1648_v17, %v1360_v3  ;;  %v1565_v63 = vsub.f32 %v4402_v49, %v8321_v35  ;;  %v8322_v45 = vld [vmem:[#allocation40_spill] sm:$0xff]  ;;  %v8324_v22 = vld [vmem:[#allocation42_spill] sm:$0xff]  ;;  %v6496_v17 = vpop.permute.xlu0 %1831  ;;  %v8327_v25 = vld [vmem:[#allocation195_spill] sm:$0xff]  ;;  %2847 = vrot.lane.b32.xlu0 %v6267_v8, %s4510_s21 }
 0x3b4   :  { %8316 = vst [vmem:[#allocation31_spill] sm:$0xff] %v6474_v31  ;;  %8317 = vst [vmem:[#allocation104_spill] sm:$0xff] %v6476_v14  ;;  %v1566_v12 = vsub.f32 %v4403_v10, %v8322_v45  ;;  %v6489_v44 = vadd.f32 %v1649_v34, %v1361_v1  ;;  %v4404_v54 = vld [vmem:[#allocation2 + $0x79] sm:$0xff]  ;;  %v4405_v2 = vld [vmem:[#allocation2 + $0x81] sm:$0xff]  ;;  %v6502_v10 = vadd.f32 %v1650_v61, %v1362_v0  ;;  %2849 = vrot.lane.b32.xlu1 %v6269_v6, %s4510_s21 }
 0x3b5   :  { %8319 = vst [vmem:[#allocation36_spill] sm:$0xff] %v6483_v19  ;;  %8320 = vst [vmem:[#allocation106_spill] sm:$0xff] %v6485_v36  ;;  %v1573_v62 = vsub.f32 %v4404_v54, %v8324_v22  ;;  %v8325_v47 = vld [vmem:[#allocation46_spill] sm:$0xff]  ;;  %v4407_v16 = vld [vmem:[#allocation2 + $0xb9] sm:$0xff]  ;;  %v6523_v53 = vpop.permute.xlu1 %1833 }
 0x3b6   :  { %8323 = vst [vmem:[#allocation35_spill] sm:$0xff] %v6489_v44  ;;  %v1574_v52 = vsub.f32 %v4405_v2, %v8325_v47  ;;  %v4406_v23 = vld [vmem:[#allocation2 + $0xb1] sm:$0xff]  ;;  %v1580_v43 = vsub.f32 %v4407_v16, %v8327_v25  ;;  %v4408_v3 = vld [vmem:[#allocation2 + $0x109] sm:$0xff]  ;;  %v8328_v39 = vld [vmem:[#allocation196_spill] sm:$0xff]  ;;  %v6512_v16 = vmul.f32 2.0, %v1566_v12 }
 0x3b7   :  { %v8326_v9 = vld [vmem:[#allocation194_spill] sm:$0xff]  ;;  %v1589_v34 = vsub.f32 %v4408_v3, %v8328_v39  ;;  %v8329_v1 = vld [vmem:[#allocation48_spill] sm:$0xff]  ;;  %v8330_v49 = vld [vmem:[#allocation197_spill] sm:$0xff]  ;;  %8331 = vst [vmem:[#allocation105_spill] sm:$0xff] %v6502_v10 }
 0x3b8   :  { %v1579_v40 = vsub.f32 %v4406_v23, %v8326_v9  ;;  %v4409_v41 = vld [vmem:[#allocation2 + $0x111] sm:$0xff]  ;;  %v4411_v45 = vld [vmem:[#allocation2 + $0x159] sm:$0xff]  ;;  %v4412_v2 = vld [vmem:[#allocation2 + $0x2] sm:$0xff]  ;;  %v6510_v9 = vmul.f32 2.0, %v1565_v63  ;;  %8337 = vst [vmem:[#allocation115_spill] sm:$0xff] %v6523_v53  ;;  %v6525_v63 = vpop.permute.xlu0 %1835  ;;  %v6527_v12 = vmul.f32 2.0, %v1580_v43 }
 0x3b9   :  { %v1590_v29 = vsub.f32 %v4409_v41, %v8329_v1  ;;  %v4410_v30 = vld [vmem:[#allocation2 + $0x151] sm:$0xff]  ;;  %v8334_v3 = vld [vmem:[#allocation9_spill] sm:$0xff]  ;;  %v8335_v39 = vld [vmem:[#allocation8_spill] sm:$0xff]  ;;  %v6516_v1 = vmul.f32 2.0, %v1573_v62  ;;  %8338 = vst [vmem:[#allocation39_spill] sm:$0xff] %v6525_v63 }
 0x3ba   :  { %v1597_v35 = vsub.f32 %v4410_v30, %v8330_v49  ;;  %v8332_v54 = vld [vmem:[#allocation51_spill] sm:$0xff]  ;;  %v8333_v47 = vld [vmem:[#allocation6_spill] sm:$0xff]  ;;  %v6518_v30 = vmul.f32 2.0, %v1574_v52  ;;  %v6520_v49 = vmul.f32 2.0, %v1579_v40  ;;  %v8339_v40 = vld [vmem:[#allocation52_spill] sm:$0xff] }
 0x3bb   :  { %v1598_v22 = vsub.f32 %v4411_v45, %v8332_v54  ;;  %v1895_v23 = vsub.f32 %v4412_v2, %v8333_v47  ;;  %v4413_v25 = vld [vmem:[#allocation2 + $0xa] sm:$0xff]  ;;  %v4414_v0 = vld [vmem:[#allocation2 + $0x12] sm:$0xff]  ;;  %v4415_v27 = vld [vmem:[#allocation2 + $0x1a] sm:$0xff]  ;;  %v6529_v2 = vmul.f32 2.0, %v1589_v34  ;;  %v6531_v47 = vmul.f32 2.0, %v1590_v29 }
 0x3bc   :  { %v1896_v61 = vsub.f32 %v4413_v25, %v8334_v3  ;;  %v1897_v41 = vsub.f32 %v4414_v0, %v8335_v39  ;;  %v8336_v45 = vld [vmem:[#allocation57_spill] sm:$0xff]  ;;  %v6533_v25 = vmul.f32 2.0, %v1597_v35  ;;  %v4418_v34 = vld [vmem:[#allocation2 + $0x52] sm:$0xff]  ;;  %v4422_v19 = vld [vmem:[#allocation2 + $0xda] sm:$0xff] }
 0x3bd   :  { %v1898_v54 = vsub.f32 %v4415_v27, %v8336_v45  ;;  %v6535_v62 = vmul.f32 2.0, %v1598_v22  ;;  %v6537_v52 = vld [vmem:[#allocation2 + $0x189] sm:$0xff]  ;;  %v1943_v0 = vadd.f32 %v1895_v23, %v6346_v60  ;;  %v4419_v22 = vld [vmem:[#allocation2 + $0x5a] sm:$0xff]  ;;  %v6551_v60 = vld [vmem:[#allocation2 + $0x191] sm:$0xff] }
 0x3be   :  { %v4417_v39 = vld [vmem:[#allocation2 + $0x4a] sm:$0xff]  ;;  %v1945_v43 = vadd.f32 %v1897_v41, %v6356_v55  ;;  %v1944_v3 = vadd.f32 %v1896_v61, %v6354_v15  ;;  %v8343_v23 = vld [vmem:[#allocation7_spill] sm:$0xff]  ;;  %v8345_v8 = vld [vmem:[#allocation64_spill] sm:$0xff]  ;;  %v6557_v55 = vpop.permute.xlu1 %1837  ;;  %v6559_v41 = vpop.permute.xlu0 %1219 }
 0x3bf   :  { %v8340_v27 = vld [vmem:[#allocation58_spill] sm:$0xff]  ;;  %v8341_v29 = vld [vmem:[#allocation81_spill] sm:$0xff]  ;;  %v8344_v20 = vld [vmem:[#allocation63_spill] sm:$0xff]  ;;  %v1919_v63 = vsub.f32 %v4422_v19, %v8345_v8  ;;  %8346 = vst [vmem:[#allocation107_spill] sm:$0xff] %v6559_v41 }
 0x3c0   :  { %v1903_v45 = vsub.f32 %v4417_v39, %v8340_v27  ;;  %v1904_v35 = vsub.f32 %v4418_v34, %v8341_v29  ;;  %v8342_v10 = vld [vmem:[#allocation82_spill] sm:$0xff]  ;;  %v4421_v27 = vld [vmem:[#allocation2 + $0x62] sm:$0xff]  ;;  %v1946_v34 = vadd.f32 %v1898_v54, %v6360_v32  ;;  %v1991_v54 = vmul.f32 0.125, %v1943_v0 }
 0x3c1   :  { %v1905_v44 = vsub.f32 %v4419_v22, %v8342_v10  ;;  %v1906_v36 = vsub.f32 %v4421_v27, %v8344_v20  ;;  %v4423_v10 = vld [vmem:[#allocation2 + $0xe2] sm:$0xff]  ;;  %v4424_v61 = vld [vmem:[#allocation2 + $0xea] sm:$0xff]  ;;  %v4425_v14 = vld [vmem:[#allocation2 + $0xf2] sm:$0xff]  ;;  %v1967_v0 = vadd.f32 %v1919_v63, %v6374_v57 }
 0x3c2   :  { %v8347_v29 = vld [vmem:[#allocation69_spill] sm:$0xff]  ;;  %v8348_v22 = vld [vmem:[#allocation70_spill] sm:$0xff]  ;;  %v1922_v39 = vsub.f32 %v4425_v14, %v6046_v56  ;;  %v1993_v56 = vmul.f32 0.125, %v1945_v43  ;;  %v1952_v14 = vadd.f32 %v1904_v35, %v6364_v59  ;;  %v1994_v6 = vmul.f32 0.125, %v1946_v34  ;;  %v8358_v57 = vld [vmem:[#allocation28_spill] sm:$0xff] }
 0x3c3   :  { %v1920_v15 = vsub.f32 %v4423_v10, %v8347_v29  ;;  %v1921_v53 = vsub.f32 %v4424_v61, %v8348_v22  ;;  %v4426_v31 = vld [vmem:[#allocation2 + $0x122] sm:$0xff]  ;;  %v4427_v20 = vld [vmem:[#allocation2 + $0x12a] sm:$0xff]  ;;  %v4428_v8 = vld [vmem:[#allocation2 + $0x132] sm:$0xff]  ;;  %v1951_v10 = vadd.f32 %v1903_v45, %v6362_v50  ;;  %v1992_v29 = vmul.f32 0.125, %v1944_v3  ;;  %v6576_v22 = vpop.permute.xlu1 %1221 }
 0x3c4   :  { %v1927_v27 = vsub.f32 %v4426_v31, %v6048_v37  ;;  %v1928_v19 = vsub.f32 %v4427_v20, %v6098_v21  ;;  %v1929_v41 = vsub.f32 %v4428_v8, %v6100_v48  ;;  %v8349_v32 = vld [vmem:[#allocation14_spill] sm:$0xff]  ;;  %v1953_v37 = vadd.f32 %v1905_v44, %v6366_v33  ;;  %v4429_v31 = vld [vmem:[#allocation2 + $0x13a] sm:$0xff]  ;;  %v6578_v48 = vpop.permute.xlu0 %1267  ;;  %v8355_v44 = vld [vmem:[#allocation89_spill] sm:$0xff] }
 0x3c5   :  { %2867 = vrot.lane.b32.xlu0 %v8349_v32, %s4510_s21  ;;  %v8350_v21 = vld [vmem:[#allocation11_spill] sm:$0xff]  ;;  %v1954_v20 = vadd.f32 %v1906_v36, %v6372_v42  ;;  %v8352_v3 = vld [vmem:[#allocation80_spill] sm:$0xff]  ;;  %v8353_v43 = vld [vmem:[#allocation90_spill] sm:$0xff]  ;;  %2869 = vrot.lane.b32.xlu1 %v8355_v44, %s4510_s21  ;;  %v1999_v34 = vmul.f32 0.125, %v1951_v10 }
 0x3c6   :  { %v1930_v61 = vsub.f32 %v4429_v31, %v8350_v21  ;;  %v8351_v8 = vld [vmem:[#allocation27_spill] sm:$0xff]  ;;  %v1969_v45 = vadd.f32 %v1921_v53, %v8352_v3  ;;  %v1970_v59 = vadd.f32 %v1922_v39, %v8353_v43  ;;  %v8354_v35 = vld [vmem:[#allocation26_spill] sm:$0xff]  ;;  %v8356_v32 = vld [vmem:[#allocation16_spill] sm:$0xff]  ;;  %v6590_v31 = vmul.f32 %v1991_v54, %v1991_v54 }
 0x3c7   :  { %v1968_v50 = vadd.f32 %v1920_v15, %v8351_v8  ;;  %v1975_v33 = vadd.f32 %v1927_v27, %v8354_v35  ;;  %v8357_v42 = vld [vmem:[#allocation29_spill] sm:$0xff]  ;;  %v1977_v63 = vadd.f32 %v1929_v41, %v8358_v57  ;;  %v6594_v15 = vmul.f32 %v1992_v29, %v1992_v29  ;;  %v6598_v27 = vpop.permute.xlu1 %1269  ;;  %v8361_v35 = vld [vmem:[#allocation112_spill] sm:$0xff]  ;;  %v4430_v29 = vld [vmem:[#allocation2 + $0x30] sm:$0xff] }
 0x3c8   :  { %v1976_v36 = vadd.f32 %v1928_v19, %v8357_v42  ;;  %v6596_v53 = vmul.f32 %v1993_v56, %v1993_v56  ;;  %v2000_v39 = vmul.f32 0.125, %v1952_v14  ;;  %v2001_v21 = vmul.f32 0.125, %v1953_v37  ;;  %v6600_v8 = vpop.permute.xlu0 %1763  ;;  %v8362_v42 = vld [vmem:[#allocation10_spill] sm:$0xff]  ;;  %v8363_v14 = vld [vmem:[#allocation88_spill] sm:$0xff] }
 0x3c9   :  { %2883 = vrot.lane.b32.xlu0 %v8356_v32, %s4510_s21  ;;  %v6602_v3 = vmul.f32 %v1994_v6, %v1994_v6  ;;  %v2002_v43 = vmul.f32 0.125, %v1954_v20  ;;  %v2015_v54 = vmul.f32 0.125, %v1967_v0  ;;  %v1978_v10 = vadd.f32 %v1930_v61, %v8361_v35  ;;  %2885 = vrot.lane.b32.xlu1 %v8363_v14, %s4510_s21  ;;  %v8364_v37 = vld [vmem:[#allocation18_spill] sm:$0xff]  ;;  %v4431_v0 = vld [vmem:[#allocation2 + $0x38] sm:$0xff] }
 0x3ca   :  { %8359 = vst [vmem:[#allocation100_spill] sm:$0xff] %v6596_v53  ;;  %v2016_v44 = vmul.f32 0.125, %v1968_v50  ;;  %v2017_v19 = vmul.f32 0.125, %v1969_v45  ;;  %v2018_v32 = vmul.f32 0.125, %v1970_v59  ;;  %v2023_v41 = vmul.f32 0.125, %v1975_v33  ;;  %v4432_v50 = vld [vmem:[#allocation2 + $0x78] sm:$0xff] }
 0x3cb   :  { %8360 = vst [vmem:[#allocation43_spill] sm:$0xff] %v6602_v3  ;;  %v1325_v56 = vsub.f32 %v4430_v29, %v8362_v42  ;;  %v6610_v57 = vmul.f32 %v1999_v34, %v1999_v34  ;;  %v2024_v6 = vmul.f32 0.125, %v1976_v36  ;;  %v2025_v20 = vmul.f32 0.125, %v1977_v63  ;;  %v8365_v3 = vld [vmem:[#allocation75_spill] sm:$0xff]  ;;  %v8366_v45 = vld [vmem:[#allocation76_spill] sm:$0xff]  ;;  %v8369_v42 = vld [vmem:[#allocation13_spill] sm:$0xff]  ;;  %v6619_v53 = vpop.permute.xlu1 %1765 }
 0x3cc   :  { %v1326_v61 = vsub.f32 %v4431_v0, %v8365_v3  ;;  %v1333_v59 = vsub.f32 %v4432_v50, %v8366_v45  ;;  %v6614_v33 = vmul.f32 %v2000_v39, %v2000_v39  ;;  %v6616_v35 = vmul.f32 %v2001_v21, %v2001_v21  ;;  %v4433_v29 = vld [vmem:[#allocation2 + $0x80] sm:$0xff] }
 0x3cd   :  { %2895 = vrot.lane.b32.xlu0 %v8364_v37, %s4510_s21  ;;  %v1334_v14 = vsub.f32 %v4433_v29, %v8369_v42  ;;  %v6621_v37 = vpop.permute.xlu0 %1779  ;;  %v6623_v34 = vmul.f32 %v2002_v43, %v2002_v43  ;;  %v6625_v36 = vmul.f32 %v2015_v54, %v2015_v54  ;;  %v2026_v63 = vmul.f32 0.125, %v1978_v10  ;;  %v8377_v43 = vld [vmem:[#allocation91_spill] sm:$0xff] }
 0x3ce   :  { %8367 = vst [vmem:[#allocation108_spill] sm:$0xff] %v6614_v33  ;;  %8368 = vst [vmem:[#allocation44_spill] sm:$0xff] %v6616_v35  ;;  %v6627_v3 = vmul.f32 %v2016_v44, %v2016_v44  ;;  %v6629_v0 = vmul.f32 %v2017_v19, %v2017_v19  ;;  %v6631_v39 = vmul.f32 %v2018_v32, %v2018_v32  ;;  %2897 = vrot.lane.b32.xlu1 %v8377_v43, %s4510_s21  ;;  %v8378_v54 = vld [vmem:[#allocation19_spill] sm:$0xff]  ;;  %v4436_v43 = vld [vmem:[#allocation2 + $0x108] sm:$0xff] }
 0x3cf   :  { %8370 = vst [vmem:[#allocation109_spill] sm:$0xff] %v6623_v34  ;;  %8371 = vst [vmem:[#allocation47_spill] sm:$0xff] %v6625_v36  ;;  %v6633_v21 = vmul.f32 %v2023_v41, %v2023_v41  ;;  %v8376_v50 = vsub.f32 %v6537_v52, %v8339_v40  ;;  %v6639_v29 = vadd.f32 %v6510_v9, %v1325_v56  ;;  %v4434_v52 = vld [vmem:[#allocation2 + $0xb0] sm:$0xff]  ;;  %v8381_v40 = vld [vmem:[#allocation84_spill] sm:$0xff] }
 0x3d0   :  { %8372 = vst [vmem:[#allocation110_spill] sm:$0xff] %v6627_v3  ;;  %8373 = vst [vmem:[#allocation50_spill] sm:$0xff] %v6629_v0  ;;  %v6645_v10 = vmul.f32 %v2024_v6, %v2024_v6  ;;  %v6647_v44 = vmul.f32 %v2025_v20, %v2025_v20  ;;  %v6650_v19 = vadd.f32 %v6512_v16, %v1326_v61  ;;  %v4435_v41 = vld [vmem:[#allocation2 + $0xb8] sm:$0xff]  ;;  %v8382_v56 = vld [vmem:[#allocation12_spill] sm:$0xff]  ;;  %v6662_v16 = vpop.permute.xlu1 %1781 }
 0x3d1   :  { %8374 = vst [vmem:[#allocation116_spill] sm:$0xff] %v6631_v39  ;;  %8375 = vst [vmem:[#allocation55_spill] sm:$0xff] %v6633_v21  ;;  %v1651_v45 = vmul.f32 2.0, %v8376_v50  ;;  %2851 = vrot.lane.b32.xlu0 %v8378_v54, %s4510_s21  ;;  %v6653_v32 = vadd.f32 %v6516_v1, %v1333_v59  ;;  %v1339_v9 = vsub.f32 %v4434_v52, %v8381_v40  ;;  %v8383_v6 = vld [vmem:[#allocation85_spill] sm:$0xff]  ;;  %v4437_v20 = vld [vmem:[#allocation2 + $0x110] sm:$0xff]  ;;  %v6664_v61 = vpop.permute.xlu0 %1791 }
 0x3d2   :  { %8379 = vst [vmem:[#allocation56_spill] sm:$0xff] %v6645_v10  ;;  %8380 = vst [vmem:[#allocation117_spill] sm:$0xff] %v6647_v44  ;;  %v1340_v42 = vsub.f32 %v4435_v41, %v8382_v56  ;;  %v6658_v50 = vadd.f32 %v6518_v30, %v1334_v14  ;;  %v1349_v54 = vsub.f32 %v4436_v43, %v8383_v6  ;;  %v8384_v44 = vld [vmem:[#allocation15_spill] sm:$0xff]  ;;  %v4438_v59 = vld [vmem:[#allocation2 + $0x150] sm:$0xff] }
 0x3d3   :  { %v1350_v10 = vsub.f32 %v4437_v20, %v8384_v44  ;;  %v6666_v1 = vmul.f32 %v2026_v63, %v2026_v63  ;;  %v8386_v52 = vld [vmem:[#allocation86_spill] sm:$0xff]  ;;  %v4439_v21 = vld [vmem:[#allocation2 + $0x158] sm:$0xff]  ;;  %v4440_v30 = vld [vmem:[#allocation2 + $0x188] sm:$0xff]  ;;  %v8390_v44 = vsub.f32 %v6551_v60, %v8343_v23 }
 0x3d4   :  { %v1357_v40 = vsub.f32 %v4438_v59, %v8386_v52  ;;  %v8387_v41 = vld [vmem:[#allocation87_spill] sm:$0xff]  ;;  %v8388_v14 = vld [vmem:[#allocation17_spill] sm:$0xff]  ;;  %v4441_v0 = vld [vmem:[#allocation2 + $0x190] sm:$0xff]  ;;  %v6686_v60 = vadd.f32 %v6527_v12, %v1340_v42  ;;  %v6698_v12 = vpop.permute.xlu1 %1793 }
 0x3d5   :  { %8385 = vst [vmem:[#allocation61_spill] sm:$0xff] %v6666_v1  ;;  %v1358_v56 = vsub.f32 %v4439_v21, %v8387_v41  ;;  %v1363_v39 = vsub.f32 %v4440_v30, %v8388_v14  ;;  %v8389_v43 = vld [vmem:[#allocation20_spill] sm:$0xff]  ;;  %v1652_v20 = vmul.f32 2.0, %v8390_v44  ;;  %v8391_v36 = vld [vmem:[#allocation102_spill] sm:$0xff]  ;;  %v8393_v52 = vld [vmem:[#allocation25_spill] sm:$0xff]  ;;  %v6691_v14 = vadd.f32 %v6529_v2, %v1349_v54  ;;  %v6700_v42 = vpop.permute.xlu0 %1811 }
 0x3d6   :  { %v1364_v6 = vsub.f32 %v4441_v0, %v8389_v43  ;;  %v4442_v3 = vld [vmem:[#allocation2 + $0x22] sm:$0xff]  ;;  %v4443_v1 = vld [vmem:[#allocation2 + $0x2a] sm:$0xff]  ;;  %v6683_v0 = vadd.f32 %v6520_v49, %v1339_v9  ;;  %v4445_v23 = vld [vmem:[#allocation2 + $0x72] sm:$0xff]  ;;  %v6694_v43 = vadd.f32 %v6531_v47, %v1350_v10 }
 0x3d7   :  { %v1899_v63 = vsub.f32 %v4442_v3, %v8391_v36  ;;  %v8392_v34 = vld [vmem:[#allocation24_spill] sm:$0xff]  ;;  %v4444_v59 = vld [vmem:[#allocation2 + $0x6a] sm:$0xff]  ;;  %v4446_v30 = vld [vmem:[#allocation2 + $0x92] sm:$0xff]  ;;  %v6708_v2 = vadd.f32 %v1651_v45, %v1363_v39 }
 0x3d8   :  { %v1900_v35 = vsub.f32 %v4443_v1, %v8392_v34  ;;  %v1907_v33 = vsub.f32 %v4444_v59, %v8393_v52  ;;  %v8394_v21 = vld [vmem:[#allocation92_spill] sm:$0xff]  ;;  %v8395_v41 = vld [vmem:[#allocation21_spill] sm:$0xff]  ;;  %v8397_v34 = vld [vmem:[#allocation111_spill] sm:$0xff]  ;;  %v6710_v47 = vadd.f32 %v1652_v20, %v1364_v6 }
 0x3d9   :  { %2853 = vrot.lane.b32.xlu1 %v8394_v21, %s4510_s21  ;;  %2899 = vrot.lane.b32.xlu0 %v8395_v41, %s4510_s21  ;;  %v8396_v36 = vld [vmem:[#allocation32_spill] sm:$0xff]  ;;  %v1911_v1 = vsub.f32 %v4446_v30, %v8397_v34  ;;  %v8399_v9 = vld [vmem:[#allocation113_spill] sm:$0xff]  ;;  %v6703_v41 = vadd.f32 %v6533_v25, %v1357_v40  ;;  %v8400_v54 = vld [vmem:[#allocation22_spill] sm:$0xff]  ;;  %v1947_v34 = vadd.f32 %v1899_v63, %v6441_v5 }
 0x3da   :  { %v1908_v3 = vsub.f32 %v4445_v23, %v8396_v36  ;;  %v4447_v44 = vld [vmem:[#allocation2 + $0xc1] sm:$0xff]  ;;  %v6706_v23 = vadd.f32 %v6535_v62, %v1358_v56  ;;  %v4449_v10 = vld [vmem:[#allocation2 + $0xc9] sm:$0xff]  ;;  %v1955_v25 = vadd.f32 %v1907_v33, %v6451_v11  ;;  %v4450_v40 = vld [vmem:[#allocation2 + $0x199] sm:$0xff]  ;;  %v6728_v11 = vpop.permute.xlu0 %1827 }
 0x3db   :  { %v8398_v59 = vld [vmem:[#allocation96_spill] sm:$0xff]  ;;  %v1582_v36 = vsub.f32 %v4449_v10, %v8400_v54  ;;  %v8401_v30 = vld [vmem:[#allocation97_spill] sm:$0xff]  ;;  %v8403_v39 = vld [vmem:[#allocation114_spill] sm:$0xff]  ;;  %v1959_v20 = vadd.f32 %v1911_v1, %v6457_v46 }
 0x3dc   :  { %v1581_v52 = vsub.f32 %v4447_v44, %v8398_v59  ;;  %v4448_v49 = vld [vmem:[#allocation2 + $0x9a] sm:$0xff]  ;;  %v1948_v44 = vadd.f32 %v1900_v35, %v6449_v38  ;;  %v8402_v59 = vld [vmem:[#allocation101_spill] sm:$0xff]  ;;  %v1956_v6 = vadd.f32 %v1908_v3, %v6455_v13  ;;  %v8404_v10 = vld [vmem:[#allocation94_spill] sm:$0xff]  ;;  %v6726_v35 = vpop.permute.xlu1 %1813 }
 0x3dd   :  { %v1912_v21 = vsub.f32 %v4448_v49, %v8399_v9  ;;  %2901 = vrot.lane.b32.xlu1 %v8401_v30, %s4510_s21  ;;  %v1605_v62 = vsub.f32 %v4450_v40, %v8402_v59  ;;  %v4451_v56 = vld [vmem:[#allocation2 + $0xa2] sm:$0xff]  ;;  %v4452_v9 = vld [vmem:[#allocation2 + $0xaa] sm:$0xff]  ;;  %v4453_v5 = vld [vmem:[#allocation2 + $0xfa] sm:$0xff] }
 0x3de   :  { %v1913_v45 = vsub.f32 %v4451_v56, %v8403_v39  ;;  %v6722_v49 = vmul.f32 2.0, %v1581_v52  ;;  %v1914_v54 = vsub.f32 %v4452_v9, %v8404_v10  ;;  %v8405_v63 = vld [vmem:[#allocation95_spill] sm:$0xff]  ;;  %v4454_v30 = vld [vmem:[#allocation2 + $0x1a1] sm:$0xff]  ;;  %v4457_v52 = vld [vmem:[#allocation2 + $0x14a] sm:$0xff]  ;;  %v6735_v39 = vmul.f32 2.0, %v1582_v36 }
 0x3df   :  { %v1923_v38 = vsub.f32 %v4453_v5, %v8405_v63  ;;  %v1960_v33 = vadd.f32 %v1912_v21, %v6459_v24  ;;  %v8406_v40 = vld [vmem:[#allocation23_spill] sm:$0xff]  ;;  %v4455_v13 = vld [vmem:[#allocation2 + $0x102] sm:$0xff]  ;;  %v1932_v56 = vsub.f32 %v4457_v52, %v6494_v7  ;;  %v1995_v9 = vmul.f32 0.125, %v1947_v34 }
 0x3e0   :  { %v1606_v59 = vsub.f32 %v4454_v30, %v8406_v40  ;;  %v1924_v46 = vsub.f32 %v4455_v13, %v6462_v51  ;;  %v4456_v3 = vld [vmem:[#allocation2 + $0x142] sm:$0xff]  ;;  %v1996_v10 = vmul.f32 0.125, %v1948_v44  ;;  %v2003_v5 = vmul.f32 0.125, %v1955_v25  ;;  %v4458_v40 = vld [vmem:[#allocation2 + $0x16a] sm:$0xff]  ;;  %v6741_v13 = vpop.permute.xlu1 %1829  ;;  %v8407_v25 = vld [vmem:[#allocation31_spill] sm:$0xff] }
 0x3e1   :  { %v1931_v1 = vsub.f32 %v4456_v3, %v6464_v58  ;;  %v6737_v63 = vmul.f32 2.0, %v1605_v62  ;;  %v2004_v24 = vmul.f32 0.125, %v1956_v6  ;;  %v2007_v21 = vmul.f32 0.125, %v1959_v20  ;;  %v6743_v58 = vpop.permute.xlu0 %1839  ;;  %v8408_v6 = vld [vmem:[#allocation104_spill] sm:$0xff]  ;;  %v8409_v20 = vld [vmem:[#allocation115_spill] sm:$0xff] }
 0x3e2   :  { %v1961_v30 = vadd.f32 %v1913_v45, %v6466_v26  ;;  %v1935_v51 = vsub.f32 %v4458_v40, %v6496_v17  ;;  %v2008_v3 = vmul.f32 0.125, %v1960_v33  ;;  %v1962_v7 = vadd.f32 %v1914_v54, %v6468_v4  ;;  %v4459_v45 = vld [vmem:[#allocation2 + $0x172] sm:$0xff]  ;;  %v4460_v4 = vld [vmem:[#allocation2 + $0x17a] sm:$0xff] }
 0x3e3   :  { %v1971_v36 = vadd.f32 %v1923_v38, %v6470_v28  ;;  %v6747_v34 = vmul.f32 2.0, %v1606_v59  ;;  %v1972_v44 = vadd.f32 %v1924_v46, %v6472_v18  ;;  %v1979_v62 = vadd.f32 %v1931_v1, %v8407_v25  ;;  %v8411_v54 = vld [vmem:[#allocation39_spill] sm:$0xff] }
 0x3e4   :  { %v1980_v26 = vadd.f32 %v1932_v56, %v8408_v6  ;;  %v1936_v17 = vsub.f32 %v4459_v45, %v8409_v20  ;;  %v6753_v52 = vmul.f32 %v1995_v9, %v1995_v9  ;;  %v6755_v40 = vmul.f32 %v1996_v10, %v1996_v10  ;;  %v6764_v46 = vpop.permute.xlu1 %1841  ;;  %v8415_v10 = vld [vmem:[#allocation36_spill] sm:$0xff] }
 0x3e5   :  { %v6757_v33 = vmul.f32 %v2003_v5, %v2003_v5  ;;  %v1937_v28 = vsub.f32 %v4460_v4, %v8411_v54  ;;  %v6760_v38 = vmul.f32 %v2004_v24, %v2004_v24  ;;  %v6762_v59 = vmul.f32 %v2007_v21, %v2007_v21  ;;  %v6766_v1 = vpop.permute.xlu0 %1795  ;;  %v4461_v5 = vld [vmem:[#allocation2 + $0x182] sm:$0xff]  ;;  %v4462_v54 = vld [vmem:[#allocation2 + $0x32] sm:$0xff] }
 0x3e6   :  { %v2009_v18 = vmul.f32 0.125, %v1961_v30  ;;  %v6768_v56 = vmul.f32 %v2008_v3, %v2008_v3  ;;  %v2010_v9 = vmul.f32 0.125, %v1962_v7  ;;  %v2019_v25 = vmul.f32 0.125, %v1971_v36  ;;  %v4463_v30 = vld [vmem:[#allocation2 + $0x3a] sm:$0xff]  ;;  %v4465_v36 = vld [vmem:[#allocation2 + $0x82] sm:$0xff] }
 0x3e7   :  { %8410 = vst [vmem:[#allocation62_spill] sm:$0xff] %v6757_v33  ;;  %8412 = vst [vmem:[#allocation67_spill] sm:$0xff] %v6760_v38  ;;  %v1983_v6 = vadd.f32 %v1935_v51, %v8415_v10  ;;  %v1938_v45 = vsub.f32 %v4461_v5, %v6557_v55  ;;  %v2020_v20 = vmul.f32 0.125, %v1972_v44  ;;  %v2027_v4 = vmul.f32 0.125, %v1979_v62  ;;  %v4466_v10 = vld [vmem:[#allocation2 + $0xb2] sm:$0xff]  ;;  %v4467_v5 = vld [vmem:[#allocation2 + $0xc0] sm:$0xff] }
 0x3e8   :  { %8413 = vst [vmem:[#allocation68_spill] sm:$0xff] %v6762_v59  ;;  %8414 = vst [vmem:[#allocation73_spill] sm:$0xff] %v6768_v56  ;;  %v2028_v24 = vmul.f32 0.125, %v1980_v26  ;;  %v1901_v21 = vsub.f32 %v4462_v54, %v6600_v8  ;;  %v1902_v38 = vsub.f32 %v4463_v30, %v6619_v53  ;;  %v4464_v59 = vld [vmem:[#allocation2 + $0x7a] sm:$0xff]  ;;  %v8416_v56 = vld [vmem:[#allocation106_spill] sm:$0xff]  ;;  %v1910_v51 = vsub.f32 %v4465_v36, %v6662_v16  ;;  %v6782_v33 = vpop.permute.xlu1 %1797 }
 0x3e9   :  { %v1909_v3 = vsub.f32 %v4464_v59, %v6621_v37  ;;  %v1984_v7 = vadd.f32 %v1936_v17, %v8416_v56  ;;  %v1915_v55 = vsub.f32 %v4466_v10, %v6664_v61  ;;  %v6778_v44 = vmul.f32 %v2009_v18, %v2009_v18  ;;  %v8417_v62 = vld [vmem:[#allocation35_spill] sm:$0xff]  ;;  %v6784_v53 = vpop.permute.xlu0 %1843  ;;  %v8419_v18 = vld [vmem:[#allocation105_spill] sm:$0xff] }
 0x3ea   :  { %v1985_v26 = vadd.f32 %v1937_v28, %v8417_v62  ;;  %v8418_v8 = vld [vmem:[#allocation107_spill] sm:$0xff]  ;;  %v6786_v37 = vmul.f32 %v2010_v9, %v2010_v9  ;;  %v6788_v17 = vmul.f32 %v2019_v25, %v2019_v25  ;;  %v2031_v59 = vmul.f32 0.125, %v1983_v6 }
 0x3eb   :  { %v1341_v54 = vsub.f32 %v4467_v5, %v8418_v8  ;;  %v6790_v16 = vmul.f32 %v2020_v20, %v2020_v20  ;;  %v6792_v56 = vmul.f32 %v2027_v4, %v2027_v4  ;;  %v6794_v61 = vmul.f32 %v2028_v24, %v2028_v24  ;;  %v4468_v9 = vld [vmem:[#allocation2 + $0xba] sm:$0xff]  ;;  %v4469_v24 = vld [vmem:[#allocation2 + $0xc8] sm:$0xff] }
 0x3ec   :  { %v1986_v28 = vadd.f32 %v1938_v45, %v8419_v18  ;;  %v2032_v30 = vmul.f32 0.125, %v1984_v7  ;;  %v1949_v36 = vadd.f32 %v1901_v21, %v6639_v29  ;;  %v1950_v10 = vadd.f32 %v1902_v38, %v6650_v19  ;;  %v4470_v7 = vld [vmem:[#allocation2 + $0x10a] sm:$0xff]  ;;  %v6808_v19 = vpop.permute.xlu1 %1845 }
 0x3ed   :  { %v1957_v62 = vadd.f32 %v1909_v3, %v6653_v32  ;;  %v1916_v25 = vsub.f32 %v4468_v9, %v6698_v12  ;;  %v2033_v5 = vmul.f32 0.125, %v1985_v26  ;;  %v1958_v6 = vadd.f32 %v1910_v51, %v6658_v50  ;;  %v2808_v32 = vpop.permute.xlu0 %2807  ;;  %v4471_v12 = vld [vmem:[#allocation2 + $0x198] sm:$0xff]  ;;  %v4472_v50 = vld [vmem:[#allocation2 + $0x1a0] sm:$0xff] }
 0x3ee   :  { %v1963_v20 = vadd.f32 %v1915_v55, %v6683_v0  ;;  %v6804_v4 = vadd.f32 %v6722_v49, %v1341_v54  ;;  %v1342_v45 = vsub.f32 %v4469_v24, %v6576_v22  ;;  %v1925_v29 = vsub.f32 %v4470_v7, %v6700_v42 }
 0x3ef   :  { %v6810_v38 = vmul.f32 %v2031_v59, %v2031_v59  ;;  %v1365_v21 = vsub.f32 %v4471_v12, %v6578_v48  ;;  %v1366_v0 = vsub.f32 %v4472_v50, %v6598_v27  ;;  %v2951_v49 = vadd.f32 %v2808_v32, %v6590_v31  ;;  %v4473_v48 = vld [vmem:[#allocation2 + $0x112] sm:$0xff] }
 0x3f0   :  { %v2034_v3 = vmul.f32 0.125, %v1986_v28  ;;  %v6815_v51 = vmul.f32 %v2032_v30, %v2032_v30  ;;  %v1997_v22 = vmul.f32 0.125, %v1949_v36  ;;  %v1998_v55 = vmul.f32 0.125, %v1950_v10  ;;  %v2810_v31 = vpop.permute.xlu1 %2809 }
 0x3f1   :  { %v2005_v26 = vmul.f32 0.125, %v1957_v62  ;;  %v6817_v42 = vmul.f32 %v2033_v5, %v2033_v5  ;;  %v2006_v8 = vmul.f32 0.125, %v1958_v6  ;;  %v2011_v54 = vmul.f32 0.125, %v1963_v20  ;;  %v2812_v28 = vpop.permute.xlu0 %2811  ;;  %v4474_v20 = vld [vmem:[#allocation2 + $0x152] sm:$0xff] }
 0x3f2   :  { %v1964_v59 = vadd.f32 %v1916_v25, %v6686_v60  ;;  %v1678_v18 = vadd.f32 %v6735_v39, %v1342_v45  ;;  %v1926_v9 = vsub.f32 %v4473_v48, %v6726_v35  ;;  %v6822_v27 = vadd.f32 1e-06, %v2951_v49  ;;  %v8420_v60 = vld [vmem:[#allocation100_spill] sm:$0xff] }
 0x3f3   :  { %v1973_v30 = vadd.f32 %v1925_v29, %v6691_v14  ;;  %v1701_v36 = vadd.f32 %v6737_v63, %v1365_v21  ;;  %v1702_v10 = vadd.f32 %v6747_v34, %v1366_v0  ;;  %v2952_v62 = vadd.f32 %v2810_v31, %v6594_v15  ;;  %v4475_v45 = vld [vmem:[#allocation2 + $0x15a] sm:$0xff]  ;;  %v4476_v21 = vld [vmem:[#allocation2 + $0x18a] sm:$0xff]  ;;  %v4481_v31 = vld [vmem:[#allocation2 + $0x1a2] sm:$0xff] }
 0x3f4   :  { %v6828_v5 = vmul.f32 %v2034_v3, %v2034_v3  ;;  %v2953_v25 = vadd.f32 %v2812_v28, %v8420_v60  ;;  %v6831_v39 = vmul.f32 %v1997_v22, %v1997_v22  ;;  %v6833_v6 = vmul.f32 %v1998_v55, %v1998_v55  ;;  %v2814_v7 = vpop.permute.xlu1 %2813  ;;  %v4477_v22 = vld [vmem:[#allocation2 + $0x192] sm:$0xff]  ;;  %v8422_v60 = vld [vmem:[#allocation108_spill] sm:$0xff] }
 0x3f5   :  { %v6835_v35 = vmul.f32 %v2005_v26, %v2005_v26  ;;  %v1933_v24 = vsub.f32 %v4474_v20, %v6728_v11  ;;  %v6838_v14 = vmul.f32 %v2006_v8, %v2006_v8  ;;  %v6840_v63 = vmul.f32 %v2011_v54, %v2011_v54  ;;  %v2824_v29 = vpop.permute.xlu0 %2823  ;;  %v8421_v11 = vld [vmem:[#allocation43_spill] sm:$0xff]  ;;  %v4479_v8 = vld [vmem:[#allocation2 + $0xca] sm:$0xff] }
 0x3f6   :  { %v2012_v34 = vmul.f32 0.125, %v1964_v59  ;;  %v1934_v15 = vsub.f32 %v4475_v45, %v6741_v13  ;;  %4210 = vrsqrt.f32 %v6822_v27  ;;  %v2021_v32 = vmul.f32 0.125, %v1973_v30  ;;  %v4478_v13 = vld [vmem:[#allocation2 + $0xc2] sm:$0xff] }
 0x3f7   :  { %v1974_v12 = vadd.f32 %v1926_v9, %v6694_v43  ;;  %v1939_v50 = vsub.f32 %v4476_v21, %v6743_v58  ;;  %v6846_v0 = vadd.f32 1e-06, %v2952_v62  ;;  %v2954_v49 = vadd.f32 %v2814_v7, %v8421_v11  ;;  %v4480_v43 = vld [vmem:[#allocation2 + $0x19a] sm:$0xff] }
 0x3f8   :  { %v2959_v3 = vadd.f32 %v2824_v29, %v6610_v57  ;;  %v1940_v55 = vsub.f32 %v4477_v22, %v6764_v46  ;;  %v1917_v26 = vsub.f32 %v4478_v13, %v6766_v1  ;;  %v1918_v54 = vsub.f32 %v4479_v8, %v6782_v33  ;;  %v2826_v1 = vpop.permute.xlu1 %2825 }
 0x3f9   :  { %v6853_v59 = vadd.f32 1e-06, %v2953_v25  ;;  %v1941_v58 = vsub.f32 %v4480_v43, %v6784_v53  ;;  %v6858_v9 = vmul.f32 %v2012_v34, %v2012_v34  ;;  %v1981_v57 = vadd.f32 %v1933_v24, %v6703_v41  ;;  %v2828_v30 = vpop.permute.xlu0 %2827  ;;  %v8423_v25 = vld [vmem:[#allocation44_spill] sm:$0xff] }
 0x3fa   :  { %v6856_v48 = vadd.f32 1e-06, %v2959_v3  ;;  %v1942_v46 = vsub.f32 %v4481_v31, %v6808_v19  ;;  %v6862_v28 = vadd.f32 1e-06, %v2954_v49  ;;  %v2022_v62 = vmul.f32 0.125, %v1974_v12 }
 0x3fb   :  { %v1982_v33 = vadd.f32 %v1934_v15, %v6706_v23  ;;  %4212 = vrsqrt.f32 %v6846_v0  ;;  %v2960_v53 = vadd.f32 %v2826_v1, %v8422_v60  ;;  %v2961_v20 = vadd.f32 %v2828_v30, %v8423_v25  ;;  %v8427_v30 = vld [vmem:[#allocation50_spill] sm:$0xff] }
 0x3fc   :  { %v1987_v34 = vadd.f32 %v1939_v50, %v6708_v2  ;;  %4214 = vrsqrt.f32 %v6853_v59  ;;  %v1988_v41 = vadd.f32 %v1940_v55, %v6710_v47  ;;  %v1965_v19 = vadd.f32 %v1917_v26, %v6804_v4  ;;  %v2830_v7 = vpop.permute.xlu1 %2829  ;;  %v8424_v47 = vld [vmem:[#allocation109_spill] sm:$0xff]  ;;  %v8425_v4 = vld [vmem:[#allocation47_spill] sm:$0xff] }
 0x3fd   :  { %v1966_v24 = vadd.f32 %v1918_v54, %v1678_v18  ;;  %4216 = vrsqrt.f32 %v6856_v48  ;;  %v6873_v45 = vadd.f32 1e-06, %v2960_v53  ;;  %v6875_v23 = vadd.f32 1e-06, %v2961_v20  ;;  %v2856_v29 = vpop.permute.xlu0 %2855 }
 0x3fe   :  { %v1989_v15 = vadd.f32 %v1941_v58, %v1701_v36  ;;  %4218 = vrsqrt.f32 %v6862_v28  ;;  %v2029_v12 = vmul.f32 0.125, %v1981_v57  ;;  %v2030_v2 = vmul.f32 0.125, %v1982_v33 }
 0x3ff   :  { %v1990_v21 = vadd.f32 %v1942_v46, %v1702_v10  ;;  %4220 = vrsqrt.f32 %v6873_v45  ;;  %v2962_v50 = vadd.f32 %v2830_v7, %v8424_v47  ;;  %v2975_v18 = vadd.f32 %v2856_v29, %v8425_v4  ;;  %v8426_v46 = vld [vmem:[#allocation110_spill] sm:$0xff]  ;;  %v8431_v29 = vld [vmem:[#allocation116_spill] sm:$0xff] }
 0x400   :  { %v2035_v11 = vmul.f32 0.125, %v1987_v34  ;;  %4222 = vrsqrt.f32 %v6875_v23  ;;  %v2036_v49 = vmul.f32 0.125, %v1988_v41  ;;  %v2013_v3 = vmul.f32 0.125, %v1965_v19  ;;  %v2858_v10 = vpop.permute.xlu1 %2857 }
 0x401   :  { %v2014_v22 = vmul.f32 0.125, %v1966_v24  ;;  %v6882_v36 = vadd.f32 1e-06, %v2962_v50  ;;  %v6884_v55 = vadd.f32 1e-06, %v2975_v18  ;;  %v6886_v13 = vmul.f32 %v2021_v32, %v2021_v32  ;;  %v2860_v8 = vpop.permute.xlu0 %2859 }
 0x402   :  { %v2037_v26 = vmul.f32 0.125, %v1989_v15  ;;  %v6888_v54 = vmul.f32 %v2022_v62, %v2022_v62  ;;  %v6890_v43 = vmul.f32 %v2029_v12, %v2029_v12  ;;  %v6892_v58 = vmul.f32 %v2030_v2, %v2030_v2  ;;  %v8432_v2 = vld [vmem:[#allocation55_spill] sm:$0xff] }
 0x403   :  { %v2038_v57 = vmul.f32 0.125, %v1990_v21  ;;  %v4211_v31 = vpop.eup %4210  ;;  %4224 = vrsqrt.f32 %v6882_v36  ;;  %v2976_v1 = vadd.f32 %v2858_v10, %v8426_v46  ;;  %v2977_v33 = vadd.f32 %v2860_v8, %v8427_v30 }
 0x404   :  { %v6897_v60 = vmul.f32 %v2035_v11, %v2035_v11  ;;  %4226 = vrsqrt.f32 %v6884_v55  ;;  %v6900_v32 = vmul.f32 %v2036_v49, %v2036_v49  ;;  %v6902_v62 = vmul.f32 %v2013_v3, %v2013_v3  ;;  %v2862_v41 = vpop.permute.xlu1 %2861 }
 0x405   :  { %v6904_v53 = vmul.f32 %v2014_v22, %v2014_v22  ;;  %v6906_v25 = vadd.f32 1e-06, %v2976_v1  ;;  %v6908_v20 = vadd.f32 1e-06, %v2977_v33  ;;  %vm3049_vm7 = vcmp.eq.f32.partialorder %v6822_v27, inf  ;;  %v2872_v19 = vpop.permute.xlu0 %2871  ;;  %v8433_v1 = vld [vmem:[#allocation56_spill] sm:$0xff] }
 0x406   :  { %v6911_v34 = vmul.f32 %v2037_v26, %v2037_v26  ;;  %v3048_v24 = vmul.f32 %v4211_v31, %v6822_v27  ;;  %vm3051_vm8 = vcmp.eq.f32.partialorder %v6822_v27, 0.0  ;;  %v3052_v15 = vand.u32 2147483648, %v6822_v27  ;;  %v8434_v33 = vld [vmem:[#allocation117_spill] sm:$0xff] }
 0x407   :  { %8428 = vst [vmem:[#allocation74_spill] sm:$0xff] %v6904_v53  ;;  %v6916_v7 = vmul.f32 %v2038_v57, %v2038_v57  ;;  %v2978_v12 = vadd.f32 %v2862_v41, %v8431_v29  ;;  %v2983_v21 = vadd.f32 %v2872_v19, %v8432_v2  ;;  %vm3056_vm9 = vcmp.eq.f32.partialorder %v6846_v0, inf }
 0x408   :  { %8429 = vst [vmem:[#allocation78_spill] sm:$0xff] %v6911_v34  ;;  %v3059_v47 = vand.u32 2147483648, %v6846_v0  ;;  %v4213_v50 = vpop.eup %4212  ;;  %4228 = vrsqrt.f32 %v6906_v25  ;;  %vm3105_vm10 = vcmp.eq.f32.partialorder %v6856_v48, inf  ;;  %vm3063_vm11 = vcmp.eq.f32.partialorder %v6853_v59, inf  ;;  %v2874_v10 = vpop.permute.xlu1 %2873 }
 0x409   :  { %8430 = vst [vmem:[#allocation79_spill] sm:$0xff] %v6916_v7  ;;  %v4215_v18 = vpop.eup %4214  ;;  %4230 = vrsqrt.f32 %v6908_v20  ;;  %v6927_v11 = vadd.f32 1e-06, %v2983_v21  ;;  %vm3058_vm12 = vcmp.eq.f32.partialorder %v6846_v0, 0.0  ;;  %v6932_v26 = vadd.f32 1e-06, %v2978_v12  ;;  %v2876_v8 = vpop.permute.xlu0 %2875 }
 0x40a   :  { %v4217_v22 = vpop.eup %4216  ;;  %v3050_v57 = vsel %vm3049_vm7, %v6822_v27, %v3048_v24  ;;  %vm3112_vm13 = vcmp.eq.f32.partialorder %v6873_v45, inf  ;;  %v3115_v31 = vand.u32 2147483648, %v6873_v45  ;;  %vm3065_vm14 = vcmp.eq.f32.partialorder %v6853_v59, 0.0  ;;  %v8436_v7 = vld [vmem:[#allocation62_spill] sm:$0xff] }
 0x40b   :  { %vm3070_vm15 = vcmp.eq.f32.partialorder %v6862_v28, inf  ;;  %v4219_v46 = vpop.eup %4218  ;;  %v2984_v30 = vadd.f32 %v2874_v10, %v8433_v1  ;;  %v2985_v41 = vadd.f32 %v2876_v8, %v8434_v33  ;;  %vm3107_vm0 = vcmp.eq.f32.partialorder %v6856_v48, 0.0 }
 0x40c   :  { %v3055_v19 = vmul.f32 %v4213_v50, %v6846_v0  ;;  %vm3119_vm1 = vcmp.eq.f32.partialorder %v6875_v23, inf  ;;  %v4221_v24 = vpop.eup %4220  ;;  %4232 = vrsqrt.f32 %v6927_v11  ;;  %vm3114_vm2 = vcmp.eq.f32.partialorder %v6873_v45, 0.0  ;;  %v2878_v1 = vpop.permute.xlu1 %2877 }
 0x40d   :  { %v3062_v29 = vmul.f32 %v4215_v18, %v6853_v59  ;;  %vm3121_vm3 = vcmp.eq.f32.partialorder %v6875_v23, 0.0  ;;  %v3122_v12 = vand.u32 2147483648, %v6875_v23  ;;  %v4223_v2 = vpop.eup %4222  ;;  %v6951_v21 = vadd.f32 1e-06, %v2984_v30  ;;  %v2816_v18 = vpop.permute.xlu0 %2815  ;;  %v8435_v30 = vld [vmem:[#allocation61_spill] sm:$0xff] }
 0x40e   :  { %v6953_v10 = vadd.f32 1e-06, %v2985_v41  ;;  %v3053_v50 = vsel %vm3051_vm8, %v3052_v15, %v3050_v57  ;;  %v3104_v8 = vmul.f32 %v4217_v22, %v6856_v48  ;;  %vm3072_vm4 = vcmp.eq.f32.partialorder %v6862_v28, 0.0 }
 0x40f   :  { %4234 = vrsqrt.f32 %v6932_v26  ;;  %v3111_v33 = vmul.f32 %v4221_v24, %v6873_v45  ;;  %v3118_v3 = vmul.f32 %v4223_v2, %v6875_v23  ;;  %vm3126_vm5 = vcmp.eq.f32.partialorder %v6882_v36, inf }
 0x410   :  { %4236 = vrsqrt.f32 %v6951_v21  ;;  %v2986_v41 = vadd.f32 %v2878_v1, %v8435_v30  ;;  %v3057_v27 = vsel %vm3056_vm9, %v6846_v0, %v3055_v19  ;;  %v3069_v15 = vmul.f32 %v4219_v46, %v6862_v28  ;;  %v4225_v22 = vpop.eup %4224 }
 0x411   :  { %4238 = vrsqrt.f32 %v6953_v10  ;;  %v2955_v57 = vadd.f32 %v2816_v18, %v6753_v52  ;;  %v3064_v24 = vsel %vm3063_vm11, %v6853_v59, %v3062_v29  ;;  %vm3128_vm6 = vcmp.eq.f32.partialorder %v6882_v36, 0.0  ;;  %v4227_v1 = vpop.eup %4226  ;;  %v2818_v52 = vpop.permute.xlu1 %2817 }
 0x412   :  { %v3129_v2 = vand.u32 2147483648, %v6882_v36  ;;  %v6976_v30 = vadd.f32 1e-06, %v2986_v41  ;;  %v3106_v46 = vsel %vm3105_vm10, %v6856_v48, %v3104_v8  ;;  %vm3217_vm7 = vcmp.eq.f32.partialorder %v6884_v55, inf  ;;  %v2832_v18 = vpop.permute.xlu0 %2831 }
 0x413   :  { %v3220_v19 = vand.u32 2147483648, %v6884_v55  ;;  %v3060_v29 = vsel %vm3058_vm12, %v3059_v47, %v3057_v27  ;;  %v3113_v41 = vsel %vm3112_vm13, %v6873_v45, %v3111_v33  ;;  %v3120_v49 = vsel %vm3119_vm1, %v6875_v23, %v3118_v3 }
 0x414   :  { %v3125_v8 = vmul.f32 %v4225_v22, %v6882_v36  ;;  %v2956_v4 = vadd.f32 %v2818_v52, %v6755_v40  ;;  %v2963_v34 = vadd.f32 %v2832_v18, %v8436_v7  ;;  %v8437_v53 = vand.u32 2147483648, %v6853_v59 }
 0x415   :  { %v3071_v47 = vsel %vm3070_vm15, %v6862_v28, %v3069_v15  ;;  %vm3219_vm8 = vcmp.eq.f32.partialorder %v6884_v55, 0.0  ;;  %v7004_v33 = vadd.f32 1e-06, %v2955_v57  ;;  %v8438_v3 = vand.u32 2147483648, %v6856_v48  ;;  %v2834_v57 = vpop.permute.xlu1 %2833 }
 0x416   :  { %v3067_v0 = vsel %vm3065_vm14, %v8437_v53, %v3064_v24  ;;  %v3216_v7 = vmul.f32 %v4227_v1, %v6884_v55  ;;  %vm3224_vm9 = vcmp.eq.f32.partialorder %v6906_v25, inf  ;;  %v3227_v59 = vand.u32 2147483648, %v6906_v25  ;;  %v4229_v53 = vpop.eup %4228  ;;  %v2840_v24 = vpop.permute.xlu0 %2839 }
 0x417   :  { %v3109_v40 = vsel %vm3107_vm0, %v8438_v3, %v3106_v46  ;;  %4240 = vrsqrt.f32 %v6976_v30  ;;  %v3116_v27 = vsel %vm3114_vm2, %v3115_v31, %v3113_v41  ;;  %v3123_v15 = vsel %vm3121_vm3, %v3122_v12, %v3120_v49  ;;  %v4231_v22 = vpop.eup %4230  ;;  %v8440_v49 = vld [vmem:[#allocation68_spill] sm:$0xff] }
 0x418   :  { %vm3231_vm10 = vcmp.eq.f32.partialorder %v6908_v20, inf  ;;  %v7019_v48 = vadd.f32 1e-06, %v2956_v4  ;;  %v8439_v1 = vand.u32 2147483648, %v6862_v28  ;;  %v3127_v45 = vsel %vm3126_vm5, %v6882_v36, %v3125_v8  ;;  %v8442_v36 = vld [vmem:[#allocation73_spill] sm:$0xff] }
 0x419   :  { %vm3273_vm11 = vcmp.eq.f32.partialorder %v6927_v11, inf  ;;  %v7029_v23 = vadd.f32 1e-06, %v2963_v34  ;;  %v2967_v31 = vadd.f32 %v2840_v24, %v8440_v49  ;;  %v7032_v12 = vadd.f32 %v3109_v40, %v3053_v50  ;;  %v4233_v34 = vpop.eup %4232  ;;  %v2842_v3 = vpop.permute.xlu1 %2841 }
 0x41a   :  { %v3074_v46 = vsel %vm3072_vm4, %v8439_v1, %v3071_v47  ;;  %v3276_v4 = vand.u32 2147483648, %v6927_v11  ;;  %vm3226_vm12 = vcmp.eq.f32.partialorder %v6906_v25, 0.0  ;;  %4242 = vrsqrt.f32 %v7004_v33  ;;  %v2844_v40 = vpop.permute.xlu0 %2843 }
 0x41b   :  { %v7037_v28 = vadd.f32 %v3116_v27, %v3060_v29  ;;  %v7039_v52 = vadd.f32 %v3123_v15, %v3067_v0  ;;  %v3218_v18 = vsel %vm3217_vm7, %v6884_v55, %v3216_v7  ;;  %vm3275_vm13 = vcmp.eq.f32.partialorder %v6927_v11, 0.0  ;;  %v8441_v0 = vld [vmem:[#allocation67_spill] sm:$0xff] }
 0x41c   :  { %v7045_v41 = vadd.f32 1e-06, %v2967_v31  ;;  %v3130_v50 = vsel %vm3128_vm6, %v3129_v2, %v3127_v45  ;;  %v3223_v8 = vmul.f32 %v4229_v53, %v6906_v25  ;;  %vm3280_vm14 = vcmp.eq.f32.partialorder %v6951_v21, inf  ;;  %v4235_v15 = vpop.eup %4234 }
 0x41d   :  { %v3230_v29 = vmul.f32 %v4231_v22, %v6908_v20  ;;  %4244 = vrsqrt.f32 %v7019_v48  ;;  %v2964_v47 = vadd.f32 %v2834_v57, %v8441_v0  ;;  %v3272_v7 = vmul.f32 %v4233_v34, %v6927_v11  ;;  %v4237_v22 = vpop.eup %4236  ;;  %v2846_v55 = vpop.permute.xlu1 %2845 }
 0x41e   :  { %v3283_v27 = vand.u32 2147483648, %v6951_v21  ;;  %4246 = vrsqrt.f32 %v7029_v23  ;;  %v2968_v2 = vadd.f32 %v2842_v3, %v8442_v36  ;;  %v2969_v53 = vadd.f32 %v2844_v40, %v6778_v44  ;;  %v4239_v45 = vpop.eup %4238 }
 0x41f   :  { %vm3233_vm15 = vcmp.eq.f32.partialorder %v6908_v20, 0.0  ;;  %4248 = vrsqrt.f32 %v7045_v41  ;;  %v7061_v24 = vadd.f32 %v3130_v50, %v3074_v46  ;;  %v3221_v57 = vsel %vm3219_vm8, %v3220_v19, %v3218_v18  ;;  %v2864_v19 = vpop.permute.xlu0 %2863 }
 0x420   :  { %vm3282_vm0 = vcmp.eq.f32.partialorder %v6951_v21, 0.0  ;;  %v3234_v1 = vand.u32 2147483648, %v6908_v20  ;;  %v7067_v49 = vadd.f32 1e-06, %v2968_v2  ;;  %v7069_v31 = vadd.f32 1e-06, %v2969_v53 }
 0x421   :  { %v3225_v44 = vsel %vm3224_vm9, %v6906_v25, %v3223_v8  ;;  %v3232_v46 = vsel %vm3231_vm10, %v6908_v20, %v3230_v29  ;;  %v7077_v34 = vadd.f32 1e-06, %v2964_v47  ;;  %v3274_v18 = vsel %vm3273_vm11, %v6927_v11, %v3272_v7  ;;  %v2866_v2 = vpop.permute.xlu1 %2865 }
 0x422   :  { %v3279_v50 = vmul.f32 %v4237_v22, %v6951_v21  ;;  %v3286_v0 = vmul.f32 %v4239_v45, %v6953_v10  ;;  %4250 = vrsqrt.f32 %v7067_v49  ;;  %v2970_v8 = vadd.f32 %v2846_v55, %v6786_v37 }
 0x423   :  { %v2979_v3 = vadd.f32 %v2864_v19, %v6788_v17  ;;  %vm3287_vm1 = vcmp.eq.f32.partialorder %v6953_v10, inf  ;;  %4252 = vrsqrt.f32 %v7069_v31  ;;  %v3228_v29 = vsel %vm3226_vm12, %v3227_v59, %v3225_v44  ;;  %v2880_v25 = vpop.permute.xlu0 %2879 }
 0x424   :  { %vm3289_vm2 = vcmp.eq.f32.partialorder %v6953_v10, 0.0  ;;  %v3237_v47 = vmul.f32 %v4235_v15, %v6932_v26  ;;  %v7095_v40 = vadd.f32 1e-06, %v2970_v8  ;;  %v3277_v37 = vsel %vm3275_vm13, %v3276_v4, %v3274_v18  ;;  %v4241_v36 = vpop.eup %4240 }
 0x425   :  { %v3235_v17 = vsel %vm3233_vm15, %v3234_v1, %v3232_v46  ;;  %v3290_v7 = vand.u32 2147483648, %v6953_v10  ;;  %4254 = vrsqrt.f32 %v7077_v34  ;;  %v3281_v59 = vsel %vm3280_vm14, %v6951_v21, %v3279_v50  ;;  %v2882_v19 = vpop.permute.xlu1 %2881 }
 0x426   :  { %v3288_v15 = vsel %vm3287_vm1, %v6953_v10, %v3286_v0  ;;  %vm3238_vm3 = vcmp.eq.f32.partialorder %v6932_v26, inf  ;;  %4256 = vrsqrt.f32 %v7095_v40  ;;  %v7109_v11 = vadd.f32 1e-06, %v2979_v3 }
 0x427   :  { %v2980_v20 = vadd.f32 %v2866_v2, %v6790_v16  ;;  %v2987_v4 = vadd.f32 %v2880_v25, %v6792_v56  ;;  %vm3161_vm4 = vcmp.eq.f32.partialorder %v7045_v41, inf  ;;  %vm3163_vm5 = vcmp.eq.f32.partialorder %v7045_v41, 0.0  ;;  %v4243_v45 = vpop.eup %4242 }
 0x428   :  { %v3164_v53 = vand.u32 2147483648, %v7045_v41  ;;  %v7116_v22 = vadd.f32 %v3277_v37, %v3221_v57  ;;  %v3239_v1 = vsel %vm3238_vm3, %v6932_v26, %v3237_v47  ;;  %vm3240_vm6 = vcmp.eq.f32.partialorder %v6932_v26, 0.0  ;;  %v2888_v57 = vpop.permute.xlu0 %2887 }
 0x429   :  { %v7120_v44 = vadd.f32 1e-06, %v2980_v20  ;;  %v3284_v16 = vsel %vm3282_vm0, %v3283_v27, %v3281_v59  ;;  %v3291_v56 = vsel %vm3289_vm2, %v3290_v7, %v3288_v15  ;;  %v3293_v46 = vmul.f32 %v4241_v36, %v6976_v30 }
 0x42a   :  { %v7127_v55 = vadd.f32 1e-06, %v2987_v4  ;;  %vm3168_vm7 = vcmp.eq.f32.partialorder %v7067_v49, inf  ;;  %v3171_v18 = vand.u32 2147483648, %v7067_v49  ;;  %v3178_v50 = vand.u32 2147483648, %v7069_v31  ;;  %v7133_v8 = vpop.eup %4244 }
 0x42b   :  { %v3241_v0 = vand.u32 2147483648, %v6932_v26  ;;  %4258 = vrsqrt.f32 %v7109_v11  ;;  %v2988_v21 = vadd.f32 %v2882_v19, %v6794_v61  ;;  %v2991_v10 = vadd.f32 %v2888_v57, %v6810_v38  ;;  %v4247_v3 = vpop.eup %4246 }
 0x42c   :  { %vm3431_vm8 = vcmask 539664   ;;  %vm3170_vm9 = vcmp.eq.f32.partialorder %v7067_v49, 0.0  ;;  %vm3175_vm10 = vcmp.eq.f32.partialorder %v7069_v31, inf  ;;  %v3185_v27 = vand.u32 2147483648, %v7095_v40  ;;  %v4249_v61 = vpop.eup %4248 }
 0x42d   :  { %vm3177_vm11 = vcmp.eq.f32.partialorder %v7069_v31, 0.0  ;;  %v7142_v47 = vadd.f32 %v3284_v16, %v3228_v29  ;;  %v7144_v37 = vadd.f32 %v3291_v56, %v3235_v17  ;;  %v7148_v7 = vsel %vm3240_vm6, %v3241_v0, %v3239_v1  ;;  %v2890_v29 = vpop.permute.xlu1 %2889  ;;  %v2892_v17 = vpop.permute.xlu0 %2891 }
 0x42e   :  { %vm3294_vm12 = vcmp.eq.f32.partialorder %v6976_v30, inf  ;;  %4260 = vrsqrt.f32 %v7120_v44  ;;  %v7152_v38 = vadd.f32 1e-06, %v2991_v10  ;;  %vm3296_vm13 = vcmp.eq.f32.partialorder %v6976_v30, 0.0 }
 0x42f   :  { %v3295_v36 = vsel %vm3294_vm12, %v6976_v30, %v3293_v46  ;;  %4262 = vrsqrt.f32 %v7127_v55  ;;  %v3160_v2 = vmul.f32 %v4249_v61, %v7045_v41  ;;  %v3297_v26 = vand.u32 2147483648, %v6976_v30  ;;  %v4251_v4 = vpop.eup %4250 }
 0x430   :  { %v3076_v25 = vmul.f32 %v4243_v45, %v7004_v33  ;;  %v7160_v59 = vadd.f32 1e-06, %v2988_v21  ;;  %v2992_v15 = vadd.f32 %v2890_v29, %v6815_v51  ;;  %v2993_v20 = vadd.f32 %v2892_v17, %v6817_v42  ;;  %v4253_v16 = vpop.eup %4252 }
 0x431   :  { %vm3182_vm14 = vcmp.eq.f32.partialorder %v7095_v40, inf  ;;  %vm3077_vm15 = vcmp.eq.f32.partialorder %v7004_v33, inf  ;;  %4264 = vrsqrt.f32 %v7152_v38  ;;  %v3162_v1 = vsel %vm3161_vm4, %v7045_v41, %v3160_v2  ;;  %v2894_v57 = vpop.permute.xlu1 %2893  ;;  %v2820_v0 = vpop.permute.xlu0 %2819 }
 0x432   :  { %vm3184_vm0 = vcmp.eq.f32.partialorder %v7095_v40, 0.0  ;;  %v3298_v45 = vsel %vm3296_vm13, %v3297_v26, %v3295_v36  ;;  %v3080_v51 = vand.u32 2147483648, %v7004_v33  ;;  %v7174_v42 = vadd.f32 1e-06, %v2992_v15  ;;  %v7190_v36 = vpop.eup %4254 }
 0x433   :  { %v7176_v56 = vadd.f32 1e-06, %v2993_v20  ;;  %v3165_v46 = vsel %vm3163_vm5, %v3164_v53, %v3162_v1  ;;  %v3167_v19 = vmul.f32 %v4251_v4, %v7067_v49  ;;  %vm3079_vm1 = vcmp.eq.f32.partialorder %v7004_v33, 0.0  ;;  %v4257_v29 = vpop.eup %4256 }
 0x434   :  { %v3399_v21 = vadd.f32 %v7032_v12, %v3165_v46  ;;  %v3174_v30 = vmul.f32 %v4253_v16, %v7069_v31  ;;  %v3078_v10 = vsel %vm3077_vm15, %v7004_v33, %v3076_v25  ;;  %v7188_v61 = vmul.f32 %v4247_v3, %v7029_v23 }
 0x435   :  { %4266 = vrsqrt.f32 %v7174_v42  ;;  %v2994_v41 = vadd.f32 %v2894_v57, %v6828_v5  ;;  %v2957_v53 = vadd.f32 %v2820_v0, %v6831_v39  ;;  %v3169_v12 = vsel %vm3168_vm7, %v7067_v49, %v3167_v19  ;;  %v2822_v15 = vpop.permute.xlu1 %2821 }
 0x436   :  { %4268 = vrsqrt.f32 %v7176_v56  ;;  %v7199_v17 = vmul.f32 0.33333334, %v3399_v21  ;;  %v3172_v3 = vsel %vm3170_vm9, %v3171_v18, %v3169_v12  ;;  %v3176_v2 = vsel %vm3175_vm10, %v7069_v31, %v3174_v30  ;;  %v2836_v18 = vpop.permute.xlu0 %2835 }
 0x437   :  { %4270 = vrsqrt.f32 %v7160_v59  ;;  %v7207_v5 = vadd.f32 1e-06, %v2994_v41  ;;  %v3400_v39 = vadd.f32 %v7037_v28, %v3172_v3  ;;  %v3179_v26 = vsel %vm3177_vm11, %v3178_v50, %v3176_v2 }
 0x438   :  { %v7214_v25 = vadd.f32 1e-06, %v2957_v53  ;;  %v3432_v49 = vsel %vm3431_vm8, %v7199_v17, inf  ;;  %v3401_v20 = vadd.f32 %v7039_v52, %v3179_v26  ;;  %v3181_v4 = vmul.f32 %v4257_v29, %v7095_v40  ;;  %v7226_v50 = vpop.eup %4258 }
 0x439   :  { %4272 = vrsqrt.f32 %v7207_v5  ;;  %v2958_v28 = vadd.f32 %v2822_v15, %v6833_v6  ;;  %3433 = vmin.xlane.f32.xlu0 %v3432_v49  ;;  %v2965_v1 = vadd.f32 %v2836_v18, %v6835_v35  ;;  %v7223_v31 = vmul.f32 0.33333334, %v3400_v39  ;;  %v2838_v30 = vpop.permute.xlu1 %2837 }
 0x43a   :  { %vm3329_vm2 = vcmp.eq.f32.partialorder %v7152_v38, inf  ;;  %v7228_v16 = vmul.f32 0.33333334, %v3401_v20  ;;  %v3183_v52 = vsel %vm3182_vm14, %v7095_v40, %v3181_v4  ;;  %vm3331_vm3 = vcmp.eq.f32.partialorder %v7152_v38, 0.0 }
 0x43b   :  { %v3332_v46 = vand.u32 2147483648, %v7152_v38  ;;  %v7236_v6 = vadd.f32 %v3298_v45, %v7148_v7  ;;  %v7238_v35 = vadd.f32 1e-06, %v2958_v28  ;;  %v7240_v19 = vadd.f32 1e-06, %v2965_v1  ;;  %v7248_v21 = vpop.eup %4260  ;;  %v2848_v45 = vpop.permute.xlu0 %2847 }
 0x43c   :  { %v3435_v57 = vsel %vm3431_vm8, %v7223_v31, inf  ;;  %v3186_v0 = vsel %vm3184_vm0, %v3185_v27, %v3183_v52  ;;  %v3438_v7 = vsel %vm3431_vm8, %v7228_v16, inf  ;;  %vm3336_vm4 = vcmp.eq.f32.partialorder %v7174_v42, inf  ;;  %v7258_v12 = vpop.eup %4262 }
 0x43d   :  { %3436 = vmin.xlane.f32.xlu1 %v3435_v57  ;;  %v3402_v41 = vadd.f32 %v7061_v24, %v3186_v0  ;;  %v7256_v53 = vsel %vm3079_vm1, %v3080_v51, %v3078_v10  ;;  %4274 = vrsqrt.f32 %v7214_v25  ;;  %v2966_v40 = vadd.f32 %v2838_v30, %v6838_v14  ;;  %3439 = vmin.xlane.f32.xlu0 %v3438_v7  ;;  %v2850_v10 = vpop.permute.xlu1 %2849 }
 0x43e   :  { %v2971_v27 = vadd.f32 %v2848_v45, %v6840_v63  ;;  %vm3338_vm5 = vcmp.eq.f32.partialorder %v7174_v42, 0.0  ;;  %4276 = vrsqrt.f32 %v7238_v35  ;;  %v3339_v29 = vand.u32 2147483648, %v7174_v42  ;;  %v4265_v33 = vpop.eup %4264 }
 0x43f   :  { %v7265_v24 = vmul.f32 0.33333334, %v3402_v41  ;;  %vm3343_vm6 = vcmp.eq.f32.partialorder %v7176_v56, inf  ;;  %4278 = vrsqrt.f32 %v7240_v19  ;;  %vm3345_vm7 = vcmp.eq.f32.partialorder %v7176_v56, 0.0  ;;  %v2868_v2 = vpop.permute.xlu0 %2867 }
 0x440   :  { %v7270_v51 = vadd.f32 1e-06, %v2971_v27  ;;  %v3346_v14 = vand.u32 2147483648, %v7176_v56  ;;  %v7274_v63 = vadd.f32 1e-06, %v2966_v40  ;;  %v3328_v39 = vmul.f32 %v4265_v33, %v7152_v38 }
 0x441   :  { %v3441_v3 = vsel %vm3431_vm8, %v7265_v24, inf  ;;  %vm3133_vm9 = vcmp.eq.f32.partialorder %v7029_v23, inf  ;;  %v2972_v26 = vadd.f32 %v2850_v10, %v6858_v9  ;;  %v2981_v15 = vadd.f32 %v2868_v2, %v6886_v13  ;;  %v2870_v0 = vpop.permute.xlu1 %2869 }
 0x442   :  { %3442 = vmin.xlane.f32.xlu0 %v3441_v3  ;;  %vm3350_vm10 = vcmp.eq.f32.partialorder %v7207_v5, inf  ;;  %v3353_v49 = vand.u32 2147483648, %v7207_v5  ;;  %v3134_v18 = vsel %vm3133_vm9, %v7029_v23, %v7188_v61  ;;  %v4267_v20 = vpop.eup %4266  ;;  %4280 = vrsqrt.f32 %v7270_v51 }
 0x443   :  { %v3330_v4 = vsel %vm3329_vm2, %v7152_v38, %v3328_v39  ;;  %vm3352_vm11 = vcmp.eq.f32.partialorder %v7207_v5, 0.0  ;;  %vm3135_vm12 = vcmp.eq.f32.partialorder %v7029_v23, 0.0  ;;  %v3136_v9 = vand.u32 2147483648, %v7029_v23  ;;  %v4269_v13 = vpop.eup %4268  ;;  %v2884_v30 = vpop.permute.xlu0 %2883 }
 0x444   :  { %v7293_v28 = vadd.f32 1e-06, %v2972_v26  ;;  %v7295_v1 = vadd.f32 1e-06, %v2981_v15  ;;  %v3333_v61 = vsel %vm3331_vm3, %v3332_v46, %v3330_v4  ;;  %v3335_v52 = vmul.f32 %v4267_v20, %v7174_v42  ;;  %v7300_v57 = vpop.eup %4270 }
 0x445   :  { %4282 = vrsqrt.f32 %v7274_v63  ;;  %v3407_v7 = vadd.f32 %v7116_v22, %v3333_v61  ;;  %v3342_v23 = vmul.f32 %v4269_v13, %v7176_v56  ;;  %v3137_v45 = vsel %vm3135_vm12, %v3136_v9, %v3134_v18  ;;  %v2886_v2 = vpop.permute.xlu1 %2885 }
 0x446   :  { %4284 = vrsqrt.f32 %v7293_v28  ;;  %v2982_v41 = vadd.f32 %v2870_v0, %v6888_v54  ;;  %v2989_v38 = vadd.f32 %v2884_v30, %v6890_v43  ;;  %v3337_v46 = vsel %vm3336_vm4, %v7174_v42, %v3335_v52  ;;  %v4273_v40 = vpop.eup %4272 }
 0x447   :  { %4286 = vrsqrt.f32 %v7295_v1  ;;  %v7312_v27 = vmul.f32 0.33333334, %v3407_v7  ;;  %v3340_v22 = vsel %vm3338_vm5, %v3339_v29, %v3337_v46  ;;  %v3344_v33 = vsel %vm3343_vm6, %v7176_v56, %v3342_v23  ;;  %v2896_v26 = vpop.permute.xlu0 %2895 }
 0x448   :  { %v7319_v10 = vadd.f32 1e-06, %v2982_v41  ;;  %v7321_v54 = vadd.f32 1e-06, %v2989_v38  ;;  %v3408_v43 = vadd.f32 %v7142_v47, %v3340_v22  ;;  %v3347_v3 = vsel %vm3345_vm7, %v3346_v14, %v3344_v33 }
 0x449   :  { %v3456_v39 = vsel %vm3431_vm8, %v7312_v27, inf  ;;  %v3409_v42 = vadd.f32 %v7144_v37, %v3347_v3  ;;  %v3349_v29 = vmul.f32 %v4273_v40, %v7207_v5  ;;  %v3192_v15 = vand.u32 2147483648, %v7270_v51  ;;  %v2898_v0 = vpop.permute.xlu1 %2897  ;;  %v8443_v3 = vld [vmem:[#allocation74_spill] sm:$0xff] }
 0x44a   :  { %4288 = vrsqrt.f32 %v7319_v10  ;;  %v2990_v18 = vadd.f32 %v2886_v2, %v6892_v58  ;;  %3457 = vmin.xlane.f32.xlu1 %v3456_v39  ;;  %v2995_v47 = vadd.f32 %v2896_v26, %v6897_v60  ;;  %v7334_v56 = vmul.f32 0.33333334, %v3408_v43  ;;  %v7337_v14 = vpop.eup %4274 }
 0x44b   :  { %vm3189_vm13 = vcmp.eq.f32.partialorder %v7270_v51, inf  ;;  %4290 = vrsqrt.f32 %v7321_v54  ;;  %v7340_v37 = vmul.f32 0.33333334, %v3409_v42  ;;  %v3351_v20 = vsel %vm3350_vm10, %v7207_v5, %v3349_v29  ;;  %v7347_v4 = vpop.eup %4276 }
 0x44c   :  { %vm3191_vm14 = vcmp.eq.f32.partialorder %v7270_v51, 0.0  ;;  %v3387_v58 = vadd.f32 %v3137_v45, %v7256_v53  ;;  %v7349_v60 = vadd.f32 1e-06, %v2990_v18  ;;  %v7351_v9 = vadd.f32 1e-06, %v2995_v47  ;;  %v7357_v52 = vpop.eup %4278  ;;  %v2852_v53 = vpop.permute.xlu0 %2851 }
 0x44d   :  { %v3459_v13 = vsel %vm3431_vm8, %v7334_v56, inf  ;;  %v3354_v61 = vsel %vm3352_vm11, %v3353_v49, %v3351_v20  ;;  %v3462_v30 = vsel %vm3431_vm8, %v7340_v37, inf  ;;  %v3083_v23 = vmul.f32 %v7133_v8, %v7019_v48 }
 0x44e   :  { %3460 = vmin.xlane.f32.xlu0 %v3459_v13  ;;  %v3410_v7 = vadd.f32 %v7236_v6, %v3354_v61  ;;  %vm3084_vm15 = vcmp.eq.f32.partialorder %v7019_v48, inf  ;;  %4292 = vrsqrt.f32 %v7349_v60  ;;  %v2996_v5 = vadd.f32 %v2898_v0, %v6900_v32  ;;  %3463 = vmin.xlane.f32.xlu1 %v3462_v30 }
 0x44f   :  { %v2973_v49 = vadd.f32 %v2852_v53, %v6902_v62  ;;  %vm3086_vm0 = vcmp.eq.f32.partialorder %v7019_v48, 0.0  ;;  %4294 = vrsqrt.f32 %v7351_v9  ;;  %v3085_v6 = vsel %vm3084_vm15, %v7019_v48, %v3083_v23  ;;  %v4281_v8 = vpop.eup %4280  ;;  %v2854_v62 = vpop.permute.xlu1 %2853 }
 0x450   :  { %v7370_v45 = vmul.f32 0.33333334, %v3410_v7  ;;  %v3087_v41 = vand.u32 2147483648, %v7019_v48  ;;  %v7374_v38 = vadd.f32 1e-06, %v2996_v5  ;;  %v3139_v32 = vmul.f32 %v7190_v36, %v7077_v34  ;;  %v2900_v22 = vpop.permute.xlu0 %2899  ;;  %v8444_v36 = vld [vmem:[#allocation78_spill] sm:$0xff] }
 0x451   :  { %v7376_v46 = vadd.f32 1e-06, %v2973_v49  ;;  %vm3140_vm1 = vcmp.eq.f32.partialorder %v7077_v34, inf  ;;  %v3188_v33 = vmul.f32 %v4281_v8, %v7270_v51  ;;  %vm3142_vm2 = vcmp.eq.f32.partialorder %v7077_v34, 0.0  ;;  %v8445_v5 = vld [vmem:[#allocation79_spill] sm:$0xff] }
 0x452   :  { %v3465_v40 = vsel %vm3431_vm8, %v7370_v45, inf  ;;  %v3088_v43 = vsel %vm3086_vm0, %v3087_v41, %v3085_v6  ;;  %v7385_v48 = vpop.eup %4282  ;;  %4296 = vrsqrt.f32 %v7374_v38  ;;  %v2974_v2 = vadd.f32 %v2854_v62, %v8443_v3 }
 0x453   :  { %3466 = vmin.xlane.f32.xlu0 %v3465_v40  ;;  %v2997_v39 = vadd.f32 %v2900_v22, %v8444_v36  ;;  %v3141_v26 = vsel %vm3140_vm1, %v7077_v34, %v3139_v32  ;;  %v4285_v42 = vpop.eup %4284  ;;  %4298 = vrsqrt.f32 %v7376_v46  ;;  %v3190_v29 = vsel %vm3189_vm13, %v7270_v51, %v3188_v33  ;;  %v2902_v30 = vpop.permute.xlu1 %2901 }
 0x454   :  { %v3143_v18 = vand.u32 2147483648, %v7077_v34  ;;  %vm3196_vm3 = vcmp.eq.f32.partialorder %v7293_v28, inf  ;;  %v7397_v47 = vpop.eup %4286  ;;  %v7399_v20 = vadd.f32 1e-06, %v2974_v2  ;;  %v3193_v61 = vsel %vm3191_vm14, %v3192_v15, %v3190_v29 }
 0x455   :  { %v7401_v13 = vadd.f32 1e-06, %v2997_v39  ;;  %v3195_v0 = vmul.f32 %v4285_v42, %v7293_v28  ;;  %v3403_v53 = vadd.f32 %v3387_v58, %v3193_v61  ;;  %vm3198_vm4 = vcmp.eq.f32.partialorder %v7293_v28, 0.0 }
 0x456   :  { %v3144_v7 = vsel %vm3142_vm2, %v3143_v18, %v3141_v26  ;;  %v3199_v23 = vand.u32 2147483648, %v7293_v28  ;;  %4300 = vrsqrt.f32 %v7399_v20  ;;  %v2998_v49 = vadd.f32 %v2902_v30, %v8445_v5 }
 0x457   :  { %v3197_v6 = vsel %vm3196_vm3, %v7293_v28, %v3195_v0  ;;  %v3388_v41 = vadd.f32 %v3144_v7, %v3088_v43  ;;  %v7413_v51 = vpop.eup %4288  ;;  %4302 = vrsqrt.f32 %v7401_v13  ;;  %v7416_v15 = vmul.f32 0.33333334, %v3403_v53 }
 0x458   :  { %v3200_v58 = vsel %vm3198_vm4, %v3199_v23, %v3197_v6  ;;  %v3244_v34 = vmul.f32 %v7226_v50, %v7109_v11  ;;  %v7420_v8 = vpop.eup %4290  ;;  %v7422_v32 = vadd.f32 1e-06, %v2998_v49  ;;  %vm3245_vm5 = vcmp.eq.f32.partialorder %v7109_v11, inf }
 0x459   :  { %v3404_v62 = vadd.f32 %v3388_v41, %v3200_v58  ;;  %vm3247_vm6 = vcmp.eq.f32.partialorder %v7109_v11, 0.0  ;;  %v3444_v28 = vsel %vm3431_vm8, %v7416_v15, inf  ;;  %v3248_v22 = vand.u32 2147483648, %v7109_v11 }
 0x45a   :  { %v3246_v40 = vsel %vm3245_vm5, %v7109_v11, %v3244_v34  ;;  %v3300_v33 = vmul.f32 %v7258_v12, %v7127_v55  ;;  %4304 = vrsqrt.f32 %v7422_v32  ;;  %3445 = vmin.xlane.f32.xlu1 %v3444_v28  ;;  %vm3301_vm7 = vcmp.eq.f32.partialorder %v7127_v55, inf }
 0x45b   :  { %v7433_v50 = vmul.f32 0.33333334, %v3404_v62  ;;  %vm3303_vm9 = vcmp.eq.f32.partialorder %v7127_v55, 0.0  ;;  %v7437_v43 = vpop.eup %4292  ;;  %v3249_v3 = vsel %vm3247_vm6, %v3248_v22, %v3246_v40  ;;  %v3304_v36 = vand.u32 2147483648, %v7127_v55 }
 0x45c   :  { %v3302_v2 = vsel %vm3301_vm7, %v7127_v55, %v3300_v33  ;;  %vm3357_vm10 = vcmp.eq.f32.partialorder %v7351_v9, inf  ;;  %v4295_v11 = vpop.eup %4294  ;;  %vm3359_vm11 = vcmp.eq.f32.partialorder %v7351_v9, 0.0  ;;  %v3360_v39 = vand.u32 2147483648, %v7351_v9 }
 0x45d   :  { %v3447_v12 = vsel %vm3431_vm8, %v7433_v50, inf  ;;  %v3251_v26 = vmul.f32 %v7248_v21, %v7120_v44  ;;  %v3305_v42 = vsel %vm3303_vm9, %v3304_v36, %v3302_v2  ;;  %v3356_v29 = vmul.f32 %v4295_v11, %v7351_v9 }
 0x45e   :  { %3448 = vmin.xlane.f32.xlu0 %v3447_v12  ;;  %vm3252_vm12 = vcmp.eq.f32.partialorder %v7120_v44, inf  ;;  %vm3254_vm13 = vcmp.eq.f32.partialorder %v7120_v44, 0.0  ;;  %v3395_v55 = vadd.f32 %v3305_v42, %v3249_v3  ;;  %v3255_v61 = vand.u32 2147483648, %v7120_v44 }
 0x45f   :  { %v3253_v18 = vsel %vm3252_vm12, %v7120_v44, %v3251_v26  ;;  %v3307_v0 = vmul.f32 %v7300_v57, %v7160_v59  ;;  %v4297_v30 = vpop.eup %4296  ;;  %v3358_v21 = vsel %vm3357_vm10, %v7351_v9, %v3356_v29  ;;  %vm3308_vm14 = vcmp.eq.f32.partialorder %v7160_v59, inf }
 0x460   :  { %vm3310_vm15 = vcmp.eq.f32.partialorder %v7160_v59, 0.0  ;;  %v3311_v53 = vand.u32 2147483648, %v7160_v59  ;;  %v4299_v7 = vpop.eup %4298  ;;  %v3361_v23 = vsel %vm3359_vm11, %v3360_v39, %v3358_v21  ;;  %v3256_v5 = vsel %vm3254_vm13, %v3255_v61, %v3253_v18 }
 0x461   :  { %v3309_v44 = vsel %vm3308_vm14, %v7160_v59, %v3307_v0  ;;  %v3363_v57 = vmul.f32 %v4297_v30, %v7374_v38  ;;  %v3411_v49 = vadd.f32 %v3395_v55, %v3361_v23  ;;  %vm3364_vm0 = vcmp.eq.f32.partialorder %v7374_v38, inf }
 0x462   :  { %v3312_v6 = vsel %vm3310_vm15, %v3311_v53, %v3309_v44  ;;  %vm3366_vm1 = vcmp.eq.f32.partialorder %v7374_v38, 0.0  ;;  %v3367_v58 = vand.u32 2147483648, %v7374_v38  ;;  %v3090_v9 = vmul.f32 %v7337_v14, %v7214_v25 }
 0x463   :  { %v3365_v41 = vsel %vm3364_vm0, %v7374_v38, %v3363_v57  ;;  %v3396_v34 = vadd.f32 %v3312_v6, %v3256_v5  ;;  %v4301_v62 = vpop.eup %4300  ;;  %v7471_v28 = vmul.f32 0.33333334, %v3411_v49  ;;  %vm3091_vm2 = vcmp.eq.f32.partialorder %v7214_v25, inf }
 0x464   :  { %vm3093_vm3 = vcmp.eq.f32.partialorder %v7214_v25, 0.0  ;;  %v3094_v59 = vand.u32 2147483648, %v7214_v25  ;;  %v4303_v40 = vpop.eup %4302  ;;  %v3368_v22 = vsel %vm3366_vm1, %v3367_v58, %v3365_v41  ;;  %v3092_v33 = vsel %vm3091_vm2, %v7214_v25, %v3090_v9 }
 0x465   :  { %v3146_v38 = vmul.f32 %v7357_v52, %v7240_v19  ;;  %vm3147_vm4 = vcmp.eq.f32.partialorder %v7240_v19, inf  ;;  %v3468_v14 = vsel %vm3431_vm8, %v7471_v28, inf  ;;  %v3412_v3 = vadd.f32 %v3396_v34, %v3368_v22 }
 0x466   :  { %v3095_v2 = vsel %vm3093_vm3, %v3094_v59, %v3092_v33  ;;  %vm3149_vm5 = vcmp.eq.f32.partialorder %v7240_v19, 0.0  ;;  %3469 = vmin.xlane.f32.xlu1 %v3468_v14  ;;  %v3150_v11 = vand.u32 2147483648, %v7240_v19  ;;  %v3202_v12 = vmul.f32 %v4299_v7, %v7376_v46 }
 0x467   :  { %v3148_v36 = vsel %vm3147_vm4, %v7240_v19, %v3146_v38  ;;  %vm3203_vm6 = vcmp.eq.f32.partialorder %v7376_v46, inf  ;;  %v7487_v25 = vpop.eup %4304  ;;  %v7489_v52 = vmul.f32 0.33333334, %v3412_v3  ;;  %vm3205_vm7 = vcmp.eq.f32.partialorder %v7376_v46, 0.0 }
 0x468   :  { %v3206_v39 = vand.u32 2147483648, %v7376_v46  ;;  %v3097_v26 = vmul.f32 %v7347_v4, %v7238_v35  ;;  %v3151_v42 = vsel %vm3149_vm5, %v3150_v11, %v3148_v36  ;;  %v3204_v29 = vsel %vm3203_vm6, %v7376_v46, %v3202_v12 }
 0x469   :  { %vm3098_vm9 = vcmp.eq.f32.partialorder %v7238_v35, inf  ;;  %vm3100_vm10 = vcmp.eq.f32.partialorder %v7238_v35, 0.0  ;;  %v3471_v19 = vsel %vm3431_vm8, %v7489_v52, inf  ;;  %v3389_v18 = vadd.f32 %v3151_v42, %v3095_v2 }
 0x46a   :  { %v3207_v55 = vsel %vm3205_vm7, %v3206_v39, %v3204_v29  ;;  %v3099_v61 = vsel %vm3098_vm9, %v7238_v35, %v3097_v26  ;;  %3472 = vmin.xlane.f32.xlu0 %v3471_v19  ;;  %v3101_v0 = vand.u32 2147483648, %v7238_v35  ;;  %v3153_v4 = vmul.f32 %v7385_v48, %v7274_v63 }
 0x46b   :  { %vm3154_vm11 = vcmp.eq.f32.partialorder %v7274_v63, inf  ;;  %vm3156_vm12 = vcmp.eq.f32.partialorder %v7274_v63, 0.0  ;;  %v3405_v46 = vadd.f32 %v3389_v18, %v3207_v55  ;;  %v3157_v30 = vand.u32 2147483648, %v7274_v63 }
 0x46c   :  { %v3209_v21 = vmul.f32 %v4301_v62, %v7399_v20  ;;  %vm3210_vm13 = vcmp.eq.f32.partialorder %v7399_v20, inf  ;;  %v3102_v53 = vsel %vm3100_vm10, %v3101_v0, %v3099_v61  ;;  %v3155_v7 = vsel %vm3154_vm11, %v7274_v63, %v3153_v4 }
 0x46d   :  { %vm3212_vm14 = vcmp.eq.f32.partialorder %v7399_v20, 0.0  ;;  %v3213_v35 = vand.u32 2147483648, %v7399_v20  ;;  %v7512_v23 = vmul.f32 0.33333334, %v3405_v46  ;;  %v3158_v48 = vsel %vm3156_vm12, %v3157_v30, %v3155_v7 }
 0x46e   :  { %v3211_v5 = vsel %vm3210_vm13, %v7399_v20, %v3209_v21  ;;  %v3258_v44 = vmul.f32 %v7397_v47, %v7295_v1  ;;  %v3390_v49 = vadd.f32 %v3158_v48, %v3102_v53  ;;  %vm3259_vm15 = vcmp.eq.f32.partialorder %v7295_v1, inf }
 0x46f   :  { %v3214_v57 = vsel %vm3212_vm14, %v3213_v35, %v3211_v5  ;;  %v3450_v6 = vsel %vm3431_vm8, %v7512_v23, inf  ;;  %v3262_v41 = vand.u32 2147483648, %v7295_v1  ;;  %v3314_v58 = vmul.f32 %v7420_v8, %v7321_v54 }
 0x470   :  { %v3260_v63 = vsel %vm3259_vm15, %v7295_v1, %v3258_v44  ;;  %3451 = vmin.xlane.f32.xlu1 %v3450_v6  ;;  %v3406_v34 = vadd.f32 %v3390_v49, %v3214_v57  ;;  %vm3261_vm0 = vcmp.eq.f32.partialorder %v7295_v1, 0.0  ;;  %vm3315_vm1 = vcmp.eq.f32.partialorder %v7321_v54, inf }
 0x471   :  { %v3318_v47 = vand.u32 2147483648, %v7321_v54  ;;  %v3263_v20 = vsel %vm3261_vm0, %v3262_v41, %v3260_v63  ;;  %v3316_v9 = vsel %vm3315_vm1, %v7321_v54, %v3314_v58  ;;  %vm3317_vm2 = vcmp.eq.f32.partialorder %v7321_v54, 0.0 }
 0x472   :  { %v3370_v62 = vmul.f32 %v4303_v40, %v7401_v13  ;;  %v7530_v59 = vmul.f32 0.33333334, %v3406_v34  ;;  %vm3371_vm3 = vcmp.eq.f32.partialorder %v7401_v13, inf  ;;  %v3374_v8 = vand.u32 2147483648, %v7401_v13 }
 0x473   :  { %v3319_v22 = vsel %vm3317_vm2, %v3318_v47, %v3316_v9  ;;  %vm3373_vm4 = vcmp.eq.f32.partialorder %v7401_v13, 0.0  ;;  %v3265_v38 = vmul.f32 %v7413_v51, %v7319_v10  ;;  %vm3266_vm5 = vcmp.eq.f32.partialorder %v7319_v10, inf }
 0x474   :  { %v3372_v1 = vsel %vm3371_vm3, %v7401_v13, %v3370_v62  ;;  %v3397_v33 = vadd.f32 %v3319_v22, %v3263_v20  ;;  %v3453_v54 = vsel %vm3431_vm8, %v7530_v59, inf  ;;  %vm3268_vm6 = vcmp.eq.f32.partialorder %v7319_v10, 0.0 }
 0x475   :  { %v3375_v14 = vsel %vm3373_vm4, %v3374_v8, %v3372_v1  ;;  %3454 = vmin.xlane.f32.xlu0 %v3453_v54  ;;  %v3267_v3 = vsel %vm3266_vm5, %v7319_v10, %v3265_v38  ;;  %v3321_v2 = vmul.f32 %v7437_v43, %v7349_v60  ;;  %v3269_v13 = vand.u32 2147483648, %v7319_v10 }
 0x476   :  { %v3413_v40 = vadd.f32 %v3397_v33, %v3375_v14  ;;  %vm3322_vm7 = vcmp.eq.f32.partialorder %v7349_v60, inf  ;;  %v3325_v51 = vand.u32 2147483648, %v7349_v60  ;;  %v3377_v36 = vmul.f32 %v7487_v25, %v7422_v32 }
 0x477   :  { %v3323_v12 = vsel %vm3322_vm7, %v7349_v60, %v3321_v2  ;;  %vm3324_vm9 = vcmp.eq.f32.partialorder %v7349_v60, 0.0  ;;  %vm3378_vm10 = vcmp.eq.f32.partialorder %v7422_v32, inf  ;;  %v3270_v39 = vsel %vm3268_vm6, %v3269_v13, %v3267_v3 }
 0x478   :  { %v7550_v11 = vmul.f32 0.33333334, %v3413_v40  ;;  %v3326_v26 = vsel %vm3324_vm9, %v3325_v51, %v3323_v12  ;;  %v3379_v43 = vsel %vm3378_vm10, %v7422_v32, %v3377_v36  ;;  %v3381_v10 = vand.u32 2147483648, %v7422_v32 }
 0x479   :  { %vm3380_vm11 = vcmp.eq.f32.partialorder %v7422_v32, 0.0  ;;  %v3398_v25 = vadd.f32 %v3326_v26, %v3270_v39  ;;  %vm4512_vm12 = vmmov 0   ;;  %vm3924_vm13 = vcmask 46080  }
 0x47a   :  { %v3474_v42 = vsel %vm3431_vm8, %v7550_v11, inf  ;;  %v3382_v29 = vsel %vm3380_vm11, %v3381_v10, %v3379_v43  ;;  %vm4012_vm0 = vcmask 1045504  }
 0x47b   :  { %3475 = vmin.xlane.f32.xlu1 %v3474_v42  ;;  %v3414_v19 = vadd.f32 %v3398_v25, %v3382_v29 }
 0x47d   :  { %v7560_v55 = vmul.f32 0.33333334, %v3414_v19 }
 0x47f   :  { %v3477_v60 = vsel %vm3431_vm8, %v7560_v55, inf }
 0x480   :  { %3478 = vmin.xlane.f32.xlu0 %v3477_v60 }
 0x4c2   :  { %v3434_v18 = vpop.xlane.xlu0 %3433 }
 0x4c6   :  { %v3440_v61 = vpop.xlane.xlu0 %3439  ;;  %v3437_v0 = vpop.xlane.xlu1 %3436 }
 0x4c7   :  { %v3480_v5 = vmin.f32 %v3434_v18, %v3440_v61 }
 0x4cb   :  { %v3443_v4 = vpop.xlane.xlu0 %3442 }
 0x4cc   :  { %v3481_v44 = vmin.f32 %v3437_v0, %v3443_v4 }
 0x4d3   :  { %v3458_v46 = vpop.xlane.xlu1 %3457 }
 0x4d7   :  { %v3461_v30 = vpop.xlane.xlu0 %3460  ;;  %v3464_v21 = vpop.xlane.xlu1 %3463 }
 0x4d8   :  { %v3493_v20 = vmin.f32 %v3458_v46, %v3464_v21 }
 0x4dc   :  { %v3467_v53 = vpop.xlane.xlu0 %3466 }
 0x4dd   :  { %v3494_v9 = vmin.f32 %v3461_v30, %v3467_v53 }
 0x4e3   :  { %v3446_v7 = vpop.xlane.xlu1 %3445 }
 0x4e4   :  { %v3482_v49 = vmin.f32 %v3480_v5, %v3446_v7 }
 0x4e7   :  { %v3449_v32 = vpop.xlane.xlu0 %3448 }
 0x4e8   :  { %v3483_v6 = vmin.f32 %v3481_v44, %v3449_v32 }
 0x4ef   :  { %v3470_v35 = vpop.xlane.xlu1 %3469 }
 0x4f0   :  { %v3495_v22 = vmin.f32 %v3493_v20, %v3470_v35 }
 0x4f3   :  { %v3473_v48 = vpop.xlane.xlu0 %3472 }
 0x4f4   :  { %v3496_v8 = vmin.f32 %v3494_v9, %v3473_v48 }
 0x4f9   :  { %v3452_v57 = vpop.xlane.xlu1 %3451 }
 0x4fa   :  { %v3484_v41 = vmin.f32 %v3482_v49, %v3452_v57  ;;  %v3623_v57 = vld [vmem:[%s7754_s1 + $0x38] sm:$0xff]  ;;  %v3620_v49 = vld [vmem:[%s7754_s1 + $0x20] sm:$0xff] }
 0x4fb   :  { %4123 = vmatprep.subr.mxu0 %v3623_v57 }
 0x4fc   :  { %4124 = vmatpush3.msra.mxu0 %v3623_v57 }
 0x4fe   :  { %v3455_v63 = vpop.xlane.xlu0 %3454 }
 0x4ff   :  { %v3485_v58 = vmin.f32 %v3483_v6, %v3455_v63  ;;  %v3619_v6 = vld [vmem:[%s7754_s1 + $0x18] sm:$0xff]  ;;  %v3618_v63 = vld [vmem:[%s7754_s1 + $0x10] sm:$0xff] }
 0x501   :  { %v3486_v34 = vmin.f32 %v3484_v41, %v3485_v58  ;;  %v3617_v41 = vld [vmem:[%s7754_s1 + $0x8] sm:$0xff]  ;;  %v3616_v58 = vld [vmem:[%s7754_s1] sm:$0xff] }
 0x503   :  { %v3487_v47 = vrot.slane %v3486_v34, 4 }
 0x504   :  { %v3476_v62 = vpop.xlane.xlu1 %3475 }
 0x505   :  { %v3488_v1 = vmin.f32 %v3486_v34, %v3487_v47  ;;  %v3497_v38 = vmin.f32 %v3495_v22, %v3476_v62 }
 0x507   :  { %v3489_v14 = vrot.slane %v3488_v1, 2 }
 0x509   :  { %v3479_v33 = vpop.xlane.xlu0 %3478  ;;  %v3490_v2 = vmin.f32 %v3488_v1, %v3489_v14 }
 0x50a   :  { %v3498_v54 = vmin.f32 %v3496_v8, %v3479_v33 }
 0x50b   :  { %v3491_v36 = vrot.slane %v3490_v2, 1 }
 0x50c   :  { %v3499_v40 = vmin.f32 %v3497_v38, %v3498_v54 }
 0x50d   :  { %v3492_v26 = vmin.f32 %v3490_v2, %v3491_v36 }
 0x50e   :  { %v3500_v3 = vrot.slane %v3499_v40, 4 }
 0x510   :  { %v3501_v13 = vmin.f32 %v3499_v40, %v3500_v3 }
 0x512   :  { %v3502_v51 = vrot.slane %v3501_v13, 2 }
 0x514   :  { %v3503_v12 = vmin.f32 %v3501_v13, %v3502_v51 }
 0x516   :  { %v3504_v39 = vrot.slane %v3503_v12, 1 }
 0x518   :  { %v3505_v43 = vmin.f32 %v3503_v12, %v3504_v39 }
 0x51a   :  { %v3506_v10 = vmin.f32 %v3492_v26, %v3505_v43 }
 0x51c   :  { %v3507_v42 = vand.u32 2147483647, %v3506_v10 }
 0x51e   :  { %v7565_v25 = vadd.f32 %v3507_v42, %v7223_v31  ;;  %v7568_v29 = vadd.f32 %v3507_v42, %v7199_v17  ;;  %v7575_v18 = vadd.f32 %v3507_v42, %v7265_v24  ;;  %v7578_v61 = vadd.f32 %v3507_v42, %v7228_v16 }
 0x51f   :  { %v7585_v0 = vadd.f32 %v3507_v42, %v7334_v56  ;;  %v7588_v4 = vadd.f32 %v3507_v42, %v7312_v27  ;;  %v7595_v46 = vadd.f32 %v3507_v42, %v7370_v45  ;;  %v7598_v30 = vadd.f32 %v3507_v42, %v7340_v37 }
 0x520   :  { %v3527_v19 = vsel %vm3431_vm8, %v7565_v25, -inf  ;;  %v3524_v60 = vsel %vm3431_vm8, %v7568_v29, -inf  ;;  %v3533_v31 = vsel %vm3431_vm8, %v7575_v18, -inf  ;;  %v3530_v17 = vsel %vm3431_vm8, %v7578_v61, -inf }
 0x521   :  { %3528 = vmax.xlane.f32.xlu0 %v3527_v19  ;;  %3525 = vmax.xlane.f32.xlu1 %v3524_v60  ;;  %v3551_v16 = vsel %vm3431_vm8, %v7585_v0, -inf  ;;  %v3548_v24 = vsel %vm3431_vm8, %v7588_v4, -inf  ;;  %v3557_v27 = vsel %vm3431_vm8, %v7595_v46, -inf  ;;  %v3554_v56 = vsel %vm3431_vm8, %v7598_v30, -inf }
 0x522   :  { %v7605_v21 = vadd.f32 %v3507_v42, %v7433_v50  ;;  %v7608_v53 = vadd.f32 %v3507_v42, %v7416_v15  ;;  %v7615_v7 = vadd.f32 %v3507_v42, %v7489_v52  ;;  %v7618_v32 = vadd.f32 %v3507_v42, %v7471_v28 }
 0x523   :  { %v7625_v35 = vadd.f32 %v3507_v42, %v7530_v59  ;;  %v7628_v48 = vadd.f32 %v3507_v42, %v7512_v23  ;;  %v7635_v5 = vadd.f32 %v3507_v42, %v7560_v55  ;;  %v7638_v44 = vadd.f32 %v3507_v42, %v7550_v11  ;;  %v3622_v55 = vld [vmem:[%s7754_s1 + $0x30] sm:$0xff]  ;;  %v3621_v11 = vld [vmem:[%s7754_s1 + $0x28] sm:$0xff] }
 0x524   :  { %v3539_v37 = vsel %vm3431_vm8, %v7605_v21, -inf  ;;  %v3536_v45 = vsel %vm3431_vm8, %v7608_v53, -inf  ;;  %v3563_v15 = vsel %vm3431_vm8, %v7615_v7, -inf  ;;  %v3560_v50 = vsel %vm3431_vm8, %v7618_v32, -inf  ;;  %4125 = vmatprep.subr.mxu0 %v3622_v55 }
 0x525   :  { %3534 = vmax.xlane.f32.xlu0 %v3533_v31  ;;  %3531 = vmax.xlane.f32.xlu1 %v3530_v17  ;;  %v3545_v28 = vsel %vm3431_vm8, %v7625_v35, -inf  ;;  %v3542_v52 = vsel %vm3431_vm8, %v7628_v48, -inf  ;;  %v3569_v23 = vsel %vm3431_vm8, %v7635_v5, -inf  ;;  %v3566_v59 = vsel %vm3431_vm8, %v7638_v44, -inf }
 0x526   :  { %4126 = vmatpush3.msra.mxu0 %v3622_v55  ;;  %vm3672_vm8 = vcmask 523264  }
 0x527   :  { %4127 = vmatprep.subr.mxu0 %v3621_v11 }
 0x528   :  { %4128 = vmatpush3.msra.mxu0 %v3621_v11 }
 0x529   :  { %3552 = vmax.xlane.f32.xlu0 %v3551_v16  ;;  %3549 = vmax.xlane.f32.xlu1 %v3548_v24 }
 0x52a   :  { %4129 = vmatprep.subr.mxu0 %v3620_v49 }
 0x52b   :  { %4130 = vmatpush3.msra.mxu0 %v3620_v49 }
 0x52c   :  { %4131 = vmatprep.subr.mxu0 %v3619_v6 }
 0x52d   :  { %3558 = vmax.xlane.f32.xlu0 %v3557_v27  ;;  %3555 = vmax.xlane.f32.xlu1 %v3554_v56 }
 0x52e   :  { %4132 = vmatpush3.msra.mxu0 %v3619_v6 }
 0x52f   :  { %4133 = vmatprep.subr.mxu0 %v3618_v63 }
 0x530   :  { %4134 = vmatpush3.msra.mxu0 %v3618_v63 }
 0x531   :  { %3540 = vmax.xlane.f32.xlu0 %v3539_v37  ;;  %3537 = vmax.xlane.f32.xlu1 %v3536_v45 }
 0x532   :  { %4135 = vmatprep.subr.mxu0 %v3617_v41 }
 0x533   :  { %4136 = vmatpush3.msra.mxu0 %v3617_v41 }
 0x534   :  { %4137 = vmatprep.subr.mxu0 %v3616_v58 }
 0x535   :  { %3564 = vmax.xlane.f32.xlu0 %v3563_v15  ;;  %3561 = vmax.xlane.f32.xlu1 %v3560_v50 }
 0x536   :  { %4138 = vmatpush3.msra.mxu0 %v3616_v58 }
 0x539   :  { %3546 = vmax.xlane.f32.xlu0 %v3545_v28  ;;  %3543 = vmax.xlane.f32.xlu1 %v3542_v52 }
 0x53d   :  { %3570 = vmax.xlane.f32.xlu0 %v3569_v23  ;;  %3567 = vmax.xlane.f32.xlu1 %v3566_v59 }
 0x5aa   :  { %v3529_v34 = vpop.xlane.xlu0 %3528  ;;  %v3526_v47 = vpop.xlane.xlu1 %3525 }
 0x5ae   :  { %v3535_v20 = vpop.xlane.xlu0 %3534  ;;  %v3532_v9 = vpop.xlane.xlu1 %3531 }
 0x5af   :  { %v3573_v40 = vmax.f32 %v3529_v34, %v3535_v20  ;;  %v3572_v3 = vmax.f32 %v3526_v47, %v3532_v9 }
 0x5b2   :  { %v3553_v62 = vpop.xlane.xlu0 %3552  ;;  %v3550_v22 = vpop.xlane.xlu1 %3549 }
 0x5b6   :  { %v3559_v8 = vpop.xlane.xlu0 %3558  ;;  %v3556_v1 = vpop.xlane.xlu1 %3555 }
 0x5b7   :  { %v3586_v12 = vmax.f32 %v3553_v62, %v3559_v8  ;;  %v3585_v39 = vmax.f32 %v3550_v22, %v3556_v1 }
 0x5ba   :  { %v3541_v33 = vpop.xlane.xlu0 %3540  ;;  %v3538_v38 = vpop.xlane.xlu1 %3537 }
 0x5bb   :  { %v3575_v2 = vmax.f32 %v3573_v40, %v3541_v33  ;;  %v3574_v13 = vmax.f32 %v3572_v3, %v3538_v38  ;;  %v4511_v40 = vmov 0.0  }
 0x5bc   :  { %4163 = vmatprep.subr.mxu1 %v4511_v40  ;;  %4179 = vmatprep.mubr.msk.f32.mxu1 %vm4512_vm12, %v4511_v40 }
 0x5be   :  { %v3565_v54 = vpop.xlane.xlu0 %3564  ;;  %v3562_v14 = vpop.xlane.xlu1 %3561 }
 0x5bf   :  { %v3588_v10 = vmax.f32 %v3586_v12, %v3565_v54  ;;  %v3587_v42 = vmax.f32 %v3585_v39, %v3562_v14 }
 0x5c2   :  { %v3547_v51 = vpop.xlane.xlu0 %3546  ;;  %v3544_v36 = vpop.xlane.xlu1 %3543 }
 0x5c3   :  { %v3577_v26 = vmax.f32 %v3575_v2, %v3547_v51  ;;  %v3576_v43 = vmax.f32 %v3574_v13, %v3544_v36 }
 0x5c5   :  { %v3578_v19 = vmax.f32 %v3576_v43, %v3577_v26 }
 0x5c6   :  { %v3571_v60 = vpop.xlane.xlu0 %3570  ;;  %v3568_v31 = vpop.xlane.xlu1 %3567 }
 0x5c7   :  { %v3579_v17 = vrot.slane %v3578_v19, 4  ;;  %v3590_v16 = vmax.f32 %v3588_v10, %v3571_v60  ;;  %v3589_v24 = vmax.f32 %v3587_v42, %v3568_v31  ;;  %v3850_v31 = vld [vmem:[%s7755_s2] sm:$0x3f] }
 0x5c9   :  { %v3580_v27 = vmax.f32 %v3578_v19, %v3579_v17  ;;  %v3591_v56 = vmax.f32 %v3589_v24, %v3590_v16 }
 0x5cb   :  { %v3581_v37 = vrot.slane %v3580_v27, 2  ;;  %v3592_v45 = vrot.slane %v3591_v56, 4 }
 0x5cd   :  { %v3582_v15 = vmax.f32 %v3580_v27, %v3581_v37  ;;  %v3593_v50 = vmax.f32 %v3591_v56, %v3592_v45 }
 0x5cf   :  { %v3594_v28 = vrot.slane %v3593_v50, 2  ;;  %v3583_v52 = vrot.slane %v3582_v15, 1 }
 0x5d1   :  { %v3595_v23 = vmax.f32 %v3593_v50, %v3594_v28  ;;  %v3584_v57 = vmax.f32 %v3582_v15, %v3583_v52 }
 0x5d3   :  { %v3596_v59 = vrot.slane %v3595_v23, 1 }
 0x5d5   :  { %v3597_v55 = vmax.f32 %v3595_v23, %v3596_v59 }
 0x5d7   :  { %v3598_v11 = vmax.f32 %v3584_v57, %v3597_v55 }
 0x5d9   :  { %4306 = vrcp.f32 %v3598_v11 }
 0x5e6   :  { %v4307_v49 = vpop.eup %4306 }
 0x5e7   :  { %v3601_v6 = vmul.f32 %v4307_v49, %v7565_v25  ;;  %v3600_v63 = vmul.f32 %v4307_v49, %v7568_v29  ;;  %v3604_v41 = vmul.f32 %v4307_v49, %v7608_v53  ;;  %v3602_v58 = vmul.f32 %v4307_v49, %v7578_v61 }
 0x5e8   :  { %v3606_v34 = vmul.f32 %v4307_v49, %v7628_v48  ;;  %v3603_v47 = vmul.f32 %v4307_v49, %v7575_v18  ;;  %v3608_v25 = vmul.f32 %v4307_v49, %v7588_v4  ;;  %v3605_v29 = vmul.f32 %v4307_v49, %v7605_v21 }
 0x5e9   :  { %3642 = vrot.lane.b32.xlu0 %v3601_v6, %s4509_s20  ;;  %3640 = vrot.lane.b32.xlu1 %v3600_v63, %s4509_s20  ;;  %v3610_v61 = vmul.f32 %v4307_v49, %v7598_v30  ;;  %v3607_v53 = vmul.f32 %v4307_v49, %v7625_v35  ;;  %v3612_v18 = vmul.f32 %v4307_v49, %v7618_v32 }
 0x5ea   :  { %v3609_v48 = vmul.f32 %v4307_v49, %v7585_v0  ;;  %v3614_v4 = vmul.f32 %v4307_v49, %v7638_v44  ;;  %v3611_v21 = vmul.f32 %v4307_v49, %v7595_v46  ;;  %v3613_v30 = vmul.f32 %v4307_v49, %v7615_v7 }
 0x5eb   :  { %v3615_v32 = vmul.f32 %v4307_v49, %v7635_v5 }
 0x5ed   :  { %3648 = vrot.lane.b32.xlu0 %v3604_v41, %s4509_s20  ;;  %3644 = vrot.lane.b32.xlu1 %v3602_v58, %s4509_s20 }
 0x5f1   :  { %3652 = vrot.lane.b32.xlu0 %v3606_v34, %s4509_s20  ;;  %3646 = vrot.lane.b32.xlu1 %v3603_v47, %s4509_s20 }
 0x5f5   :  { %3656 = vrot.lane.b32.xlu0 %v3608_v25, %s4509_s20  ;;  %3650 = vrot.lane.b32.xlu1 %v3605_v29, %s4509_s20 }
 0x5f9   :  { %3660 = vrot.lane.b32.xlu0 %v3610_v61, %s4509_s20  ;;  %3654 = vrot.lane.b32.xlu1 %v3607_v53, %s4509_s20 }
 0x5fd   :  { %3664 = vrot.lane.b32.xlu0 %v3612_v18, %s4509_s20  ;;  %3658 = vrot.lane.b32.xlu1 %v3609_v48, %s4509_s20 }
 0x601   :  { %3668 = vrot.lane.b32.xlu0 %v3614_v4, %s4509_s20  ;;  %3662 = vrot.lane.b32.xlu1 %v3611_v21, %s4509_s20 }
 0x605   :  { %3666 = vrot.lane.b32.xlu1 %v3613_v30, %s4509_s20 }
 0x609   :  { %3670 = vrot.lane.b32.xlu1 %v3615_v32, %s4509_s20 }
 0x65b   :  { %v3643_v0 = vpop.permute.xlu0 %3642  ;;  %v3641_v35 = vpop.permute.xlu1 %3640 }
 0x65c   :  { %4139 = vmatprep.mubr.msk.f32.mxu0 %vm3672_vm8, %v3641_v35 }
 0x65d   :  { %4140 = vmatmul.mubr.msk.f32.vlgmr.msra.gmra.mxu0 %vm3672_vm8, %v3643_v0 }
 0x65f   :  { %v3649_v46 = vpop.permute.xlu0 %3648  ;;  %v3645_v44 = vpop.permute.xlu1 %3644 }
 0x660   :  { %4142 = vmatprep.mubr.msk.f32.mxu0 %vm3672_vm8, %v3645_v44 }
 0x663   :  { %v3653_v20 = vpop.permute.xlu0 %3652  ;;  %v3647_v9 = vpop.permute.xlu1 %3646 }
 0x664   :  { %4143 = vmatmul.mubr.msk.f32.gmra.mxu0 %vm3672_vm8, %v3647_v9 }
 0x665   :  { %4145 = vmatprep.mubr.msk.f32.mxu0 %vm3672_vm8, %v3649_v46 }
 0x667   :  { %v3657_v7 = vpop.permute.xlu0 %3656  ;;  %v3651_v5 = vpop.permute.xlu1 %3650 }
 0x668   :  { %4146 = vmatmul.mubr.msk.f32.gmra.mxu0 %vm3672_vm8, %v3651_v5 }
 0x669   :  { %4148 = vmatprep.mubr.msk.f32.mxu0 %vm3672_vm8, %v3653_v20 }
 0x66b   :  { %v3655_v62 = vpop.permute.xlu1 %3654  ;;  %v3661_v22 = vpop.permute.xlu0 %3660 }
 0x66c   :  { %4149 = vmatmul.mubr.msk.f32.gmra.mxu0 %vm3672_vm8, %v3655_v62 }
 0x66d   :  { %4151 = vmatprep.mubr.msk.f32.mxu0 %vm3672_vm8, %v3657_v7 }
 0x66f   :  { %v3659_v8 = vpop.permute.xlu1 %3658  ;;  %v3665_v1 = vpop.permute.xlu0 %3664 }
 0x670   :  { %4152 = vmatmul.mubr.msk.f32.gmra.mxu0 %vm3672_vm8, %v3659_v8 }
 0x671   :  { %4154 = vmatprep.mubr.msk.f32.mxu0 %vm3672_vm8, %v3661_v22 }
 0x673   :  { %v3663_v33 = vpop.permute.xlu1 %3662  ;;  %v3669_v54 = vpop.permute.xlu0 %3668 }
 0x674   :  { %4155 = vmatmul.mubr.msk.f32.gmra.mxu0 %vm3672_vm8, %v3663_v33 }
 0x675   :  { %4157 = vmatprep.mubr.msk.f32.mxu0 %vm3672_vm8, %v3665_v1 }
 0x677   :  { %v3667_v38 = vpop.permute.xlu1 %3666 }
 0x678   :  { %4158 = vmatmul.mubr.msk.f32.gmra.mxu0 %vm3672_vm8, %v3667_v38 }
 0x679   :  { %4160 = vmatprep.mubr.msk.f32.mxu0 %vm3672_vm8, %v3669_v54 }
 0x67b   :  { %v3671_v14 = vpop.permute.xlu1 %3670 }
 0x67c   :  { %4161 = vmatmul.mubr.msk.f32.gmra.mxu0 %vm3672_vm8, %v3671_v14 }
 0x71d   :  { %v4141_v3 = vpop.f32.mrf.mxu0 }
 0x71f   :  { %v3771_v2 = vpop.f32.mrf.mxu0 }
 0x724   :  { %v4144_v13 = vpop.f32.mrf.mxu0 }
 0x726   :  { %v3781_v51 = vpop.f32.mrf.mxu0 }
 0x728   :  { %v4147_v36 = vpop.f32.mrf.mxu0 }
 0x72a   :  { %v3791_v12 = vpop.f32.mrf.mxu0 }
 0x72c   :  { %v4150_v39 = vpop.f32.mrf.mxu0 }
 0x72d   :  { %4164 = vmatpush3.msra.mxu1 %v4150_v39 }
 0x72e   :  { %v3801_v26 = vpop.f32.mrf.mxu0  ;;  %4165 = vmatprep.subr.mxu1 %v4511_v40 }
 0x72f   :  { %4166 = vmatpush3.msra.mxu1 %v3801_v26 }
 0x730   :  { %v4153_v43 = vpop.f32.mrf.mxu0  ;;  %4167 = vmatprep.subr.mxu1 %v4511_v40 }
 0x731   :  { %4168 = vmatpush3.msra.mxu1 %v4147_v36 }
 0x732   :  { %v3811_v10 = vpop.f32.mrf.mxu0  ;;  %4169 = vmatprep.subr.mxu1 %v4511_v40 }
 0x733   :  { %4170 = vmatpush3.msra.mxu1 %v3791_v12 }
 0x734   :  { %v4156_v42 = vpop.f32.mrf.mxu0  ;;  %4171 = vmatprep.subr.mxu1 %v4511_v40 }
 0x735   :  { %4172 = vmatpush3.msra.mxu1 %v4144_v13 }
 0x736   :  { %v3821_v19 = vpop.f32.mrf.mxu0  ;;  %4173 = vmatprep.subr.mxu1 %v4511_v40 }
 0x737   :  { %4174 = vmatpush3.msra.mxu1 %v3781_v51 }
 0x738   :  { %v4159_v60 = vpop.f32.mrf.mxu0  ;;  %4175 = vmatprep.subr.mxu1 %v4511_v40 }
 0x739   :  { %4176 = vmatpush3.msra.mxu1 %v4141_v3 }
 0x73a   :  { %v3831_v17 = vpop.f32.mrf.mxu0  ;;  %4177 = vmatprep.subr.mxu1 %v4511_v40 }
 0x73b   :  { %4178 = vmatpush3.msra.mxu1 %v3771_v2 }
 0x73c   :  { %v4162_v16 = vpop.f32.mrf.mxu0  ;;  %4180 = vmatmul.mubr.msk.f32.vlgmr.msra.gmra.mxu1 %vm3672_vm8, %v3850_v31  ;;  %4182 = vmatprep.subr.mxu1 %v4511_v40 }
 0x73d   :  { %4183 = vmatpush3.msra.mxu1 %v4162_v16  ;;  %4198 = vmatprep.mubr.msk.f32.mxu1 %vm4512_vm12, %v4511_v40 }
 0x73e   :  { %v3841_v24 = vpop.f32.mrf.mxu0  ;;  %4184 = vmatprep.subr.mxu1 %v4511_v40 }
 0x73f   :  { %4185 = vmatpush3.msra.mxu1 %v3841_v24 }
 0x740   :  { %4186 = vmatprep.subr.mxu1 %v4511_v40 }
 0x741   :  { %4187 = vmatpush3.msra.mxu1 %v4159_v60 }
 0x742   :  { %4188 = vmatprep.subr.mxu1 %v4511_v40 }
 0x743   :  { %4189 = vmatpush3.msra.mxu1 %v3831_v17 }
 0x744   :  { %4190 = vmatprep.subr.mxu1 %v4511_v40 }
 0x745   :  { %4191 = vmatpush3.msra.mxu1 %v4156_v42 }
 0x746   :  { %4192 = vmatprep.subr.mxu1 %v4511_v40 }
 0x747   :  { %4193 = vmatpush3.msra.mxu1 %v3821_v19 }
 0x748   :  { %4194 = vmatprep.subr.mxu1 %v4511_v40 }
 0x749   :  { %4195 = vmatpush3.msra.mxu1 %v4153_v43 }
 0x74a   :  { %4196 = vmatprep.subr.mxu1 %v4511_v40 }
 0x74b   :  { %4197 = vmatpush3.msra.mxu1 %v3811_v10 }
 0x74c   :  { %4199 = vmatmul.mubr.msk.f32.vlgmr.msra.gmra.mxu1 %vm3672_vm8, %v3850_v31 }
 0x7fc   :  { %v3920_v27 = vpop.f32.mrf.mxu1 }
 0x7fd   :  { %3925 = vst.msk [vmem:[%s7756_s3] sm:$0x3f] %vm3924_vm13, %v3920_v27 }
 0x7fe   :  { %v4181_v56 = vpop.f32.mrf.mxu1 }
 0x804   :  { %v3998_v37 = vld [vmem:[%s7756_s3] sm:$0x3f] }
 0x805   :  { %vm4000_vm14 = vcmp.gt.f32.partialorder %v3998_v37, 0.0  ;;  %v4002_v45 = vmul.f32 0.2, %v3998_v37 }
 0x807   :  { %v4004_v15 = vsel %vm4000_vm14, %v3998_v37, %v4002_v45 }
 0x808   :  { %v4006_v50 = vsel %vm3924_vm13, %v4004_v15, inf }
 0x809   :  { %4007 = vmin.xlane.f32.xlu0 %v4006_v50 }
 0x80c   :  { %v3992_v28 = vpop.f32.mrf.mxu1 }
 0x80d   :  { %4080 = vst.msk [vmem:[%s7756_s3 + $0x8] sm:$0x3f] %vm3924_vm13, %v3992_v28 }
 0x80e   :  { %v4200_v52 = vpop.f32.mrf.mxu1 }
 0x814   :  { %v3999_v23 = vld [vmem:[%s7756_s3 + $0x8] sm:$0x3f] }
 0x815   :  { %vm4001_vm15 = vcmp.gt.f32.partialorder %v3999_v23, 0.0  ;;  %v4003_v59 = vmul.f32 0.2, %v3999_v23 }
 0x817   :  { %v4005_v57 = vsel %vm4001_vm15, %v3999_v23, %v4003_v59 }
 0x818   :  { %v4009_v55 = vsel %vm3924_vm13, %v4005_v57, inf }
 0x819   :  { %4010 = vmin.xlane.f32.xlu1 %v4009_v55 }
 0x892   :  { %v4008_v11 = vpop.xlane.xlu0 %4007 }
 0x893   :  { %v4013_v49 = vsel %vm4012_vm0, %v4008_v11, inf }
 0x894   :  { %v4014_v6 = vrot.slane %v4013_v49, 4 }
 0x896   :  { %v4015_v63 = vmin.f32 %v4013_v49, %v4014_v6 }
 0x898   :  { %v4016_v41 = vrot.slane %v4015_v63, 2 }
 0x89a   :  { %v4017_v25 = vmin.f32 %v4015_v63, %v4016_v41 }
 0x89c   :  { %v4018_v53 = vrot.slane %v4017_v25, 1 }
 0x89e   :  { %v4019_v4 = vmin.f32 %v4017_v25, %v4018_v53 }
 0x8a2   :  { %v4011_v58 = vpop.xlane.xlu1 %4010 }
 0x8a3   :  { %v4020_v34 = vsel %vm4012_vm0, %v4011_v58, inf }
 0x8a4   :  { %v4021_v47 = vrot.slane %v4020_v34, 4 }
 0x8a6   :  { %v4022_v29 = vmin.f32 %v4020_v34, %v4021_v47 }
 0x8a8   :  { %v4023_v61 = vrot.slane %v4022_v29, 2 }
 0x8aa   :  { %v4024_v18 = vmin.f32 %v4022_v29, %v4023_v61 }
 0x8ac   :  { %v4025_v48 = vrot.slane %v4024_v18, 1 }
 0x8ae   :  { %v4026_v21 = vmin.f32 %v4024_v18, %v4025_v48 }
 0x8b0   :  { %v4027_v30 = vmin.f32 %v4019_v4, %v4026_v21 }
 0x8b2   :  { %v4028_v32 = vand.u32 2147483647, %v4027_v30 }
 0x8b4   :  { %v4029_v0 = vadd.f32 %v4028_v32, %v4004_v15  ;;  %v4030_v46 = vadd.f32 %v4028_v32, %v4005_v57 }
 0x8b6   :  { %v4031_v35 = vsel %vm3924_vm13, %v4029_v0, -inf  ;;  %v4034_v44 = vsel %vm3924_vm13, %v4030_v46, -inf }
 0x8b7   :  { %4032 = vmax.xlane.f32.xlu0 %v4031_v35 }
 0x8bb   :  { %4035 = vmax.xlane.f32.xlu0 %v4034_v44 }
 0x940   :  { %v4033_v20 = vpop.xlane.xlu0 %4032 }
 0x941   :  { %v4037_v9 = vsel %vm4012_vm0, %v4033_v20, -inf }
 0x942   :  { %v4038_v7 = vrot.slane %v4037_v9, 4 }
 0x944   :  { %v4039_v5 = vmax.f32 %v4037_v9, %v4038_v7  ;;  %v4036_v62 = vpop.xlane.xlu0 %4035 }
 0x945   :  { %v4044_v22 = vsel %vm4012_vm0, %v4036_v62, -inf }
 0x946   :  { %v4040_v8 = vrot.slane %v4039_v5, 2  ;;  %v4045_v1 = vrot.slane %v4044_v22, 4 }
 0x948   :  { %v4041_v33 = vmax.f32 %v4039_v5, %v4040_v8  ;;  %v4046_v38 = vmax.f32 %v4044_v22, %v4045_v1 }
 0x94a   :  { %v4047_v54 = vrot.slane %v4046_v38, 2  ;;  %v4042_v14 = vrot.slane %v4041_v33, 1 }
 0x94c   :  { %v4048_v40 = vmax.f32 %v4046_v38, %v4047_v54  ;;  %v4043_v2 = vmax.f32 %v4041_v33, %v4042_v14 }
 0x94e   :  { %v4049_v3 = vrot.slane %v4048_v40, 1 }
 0x950   :  { %v4050_v13 = vmax.f32 %v4048_v40, %v4049_v3 }
 0x952   :  { %v4051_v51 = vmax.f32 %v4043_v2, %v4050_v13 }
 0x954   :  { %4308 = vrcp.f32 %v4051_v51 }
 0x961   :  { %v4309_v36 = vpop.eup %4308 }
 0x962   :  { %v4053_v12 = vmul.f32 %v4309_v36, %v4029_v0  ;;  %v4054_v39 = vmul.f32 %v4309_v36, %v4030_v46 }
 0x964   :  { %4055 = vst.msk [vmem:[%s7756_s3] sm:$0x3f] %vm3924_vm13, %v4053_v12  ;;  %4056 = vst.msk [vmem:[%s7756_s3 + $0x8] sm:$0x3f] %vm3924_vm13, %v4054_v39 }
 0x965   :  { %4061 = vsyncpa [#allocation4], 1 }

</bundles_post_ra>
